<compile_context>
chip_gen: v6e
topology: v6e:2x2x1
jax: 0.10.0
libtpu: 0.0.40
codegen_flags: <defaults>
</compile_context>

<pallas_src>
import functools

import jax
import jax.numpy as jnp
from jax import lax
from jax.experimental import pallas as pl
from jax.experimental.pallas import tpu as pltpu

# ----------------------------- config (cfg.*) -------------------------------
LANES = 128
SUB_ROWS = 32              # 32 rows x 128 lanes = 4096 rays per vector working set
CHUNK_SIZE = 16384         # rays per grid step: 128 rows = 4 sub-tiles of 32 rows
NEAR = 1e-3
FAR = 10.0
MAX_ITERS = 64
UNROLL = 4                 # tracing steps per fori_loop body
HIDDEN = 32
SPHERE_CENTER = (0.0, 0.0, 0.0)
SPHERE_RADIUS = 1.0


# ------------------------------- kernel -------------------------------------
def sphere_tracing_kernel(w1_ref, b1_ref, w2_ref, b2_ref,    # scalar prefetch (SMEM)
                          o_ref, d_ref, color_ref, *,
                          near, far, max_iters, unroll, sub_rows,
                          center, radius):
    # o_ref / d_ref / color_ref: (3, BR, 128) f32 VMEM tiles (ray = row*128 + lane)
    # w1_ref (3*H,), b1_ref (H,), w2_ref (H*3,), b2_ref (3,): flat f32 in SMEM
    cx, cy, cz = (float(c) for c in center)
    rad = float(radius)
    hidden = b1_ref.shape[0]
    block_rows = o_ref.shape[1]
    n_sub = block_rows // sub_rows

    @pl.loop(0, n_sub)                       # sub-tiles bound vreg live ranges
    def _(t):
        r0 = pl.multiple_of(t * sub_rows, sub_rows)
        rows = pl.ds(r0, sub_rows)
        px0 = o_ref[0, rows, :]              # (sub_rows, 128) lane-dense tiles
        py0 = o_ref[1, rows, :]
        pz0 = o_ref[2, rows, :]
        dx = d_ref[0, rows, :]
        dy = d_ref[1, rows, :]
        dz = d_ref[2, rows, :]

        def trace_step(carry):
            px, py, pz, dist = carry
            ex = px if cx == 0.0 else px - cx
            ey = py if cy == 0.0 else py - cy
            ez = pz if cz == 0.0 else pz - cz
            # sphere SDF: pure row-wise VPU/EUP work (no cross-lane reduce)
            sdf = jnp.sqrt(ex * ex + ey * ey + ez * ez) - rad
            valid = (sdf <= near) & (dist < far)
            # single masked step reused for dist and all point components
            step = jnp.where(valid, 0.0, sdf)
            dist = dist + step
            px = px + dx * step
            py = py + dy * step
            pz = pz + dz * step
            return (px, py, pz, dist)

        def body(_, carry):
            for _ in range(unroll):          # partial unroll: LLO visibility
                carry = trace_step(carry)
            return carry

        # TODO(synk): the data-dependent `if final_mask.all(): break` early
        # exit of the PyTorch reference is dropped; the fixed iteration count
        # gives identical results because converged rays are frozen (step=0).
        carry = (px0, py0, pz0, jnp.zeros_like(px0))
        carry = lax.fori_loop(0, max_iters // unroll, body, carry)
        for _ in range(max_iters % unroll):
            carry = trace_step(carry)
        px, py, pz, dist = carry

        # Once a ray becomes valid its step is 0 and its distance freezes below
        # `far`, so the accumulated hit mask equals (dist < far) at loop end
        # (matches `final_mask |= valid; ...; final_mask |= dist < far`).
        final_mask = dist < far

        # get_color MLP on the VPU: scalar weights from SMEM broadcast-FMA'd
        # into lane-dense (sub_rows, 128) tiles; b2 folded into the init.
        out0 = jnp.full_like(px, b2_ref[0])
        out1 = jnp.full_like(px, b2_ref[1])
        out2 = jnp.full_like(px, b2_ref[2])
        for j in range(hidden):
            hj = (px * w1_ref[j] + py * w1_ref[hidden + j]
                  + pz * w1_ref[2 * hidden + j] + b1_ref[j])
            hj = jnp.maximum(hj, 0.0)
            out0 = out0 + hj * w2_ref[3 * j]
            out1 = out1 + hj * w2_ref[3 * j + 1]
            out2 = out2 + hj * w2_ref[3 * j + 2]

        # component-wise unmasked lane-dense stores (no stacked intermediate)
        color_ref[0, rows, :] = jnp.where(final_mask, jax.nn.sigmoid(out0), 0.0)
        color_ref[1, rows, :] = jnp.where(final_mask, jax.nn.sigmoid(out1), 0.0)
        color_ref[2, rows, :] = jnp.where(final_mask, jax.nn.sigmoid(out2), 0.0)


# ------------------------------- wrapper -------------------------------------
def _ray_axis_semantics():
    """CORE_PARALLEL on v7x (2 TensorCores/chip); PARALLEL elsewhere."""
    try:
        kind = jax.devices()[0].device_kind.lower()
    except Exception:
        kind = ""
    return (pltpu.CORE_PARALLEL,) if "v7" in kind else (pltpu.PARALLEL,)


def sphere_tracing_render(origins, directions, w1, b1, w2, b2,
                          *, chunk_size=CHUNK_SIZE, near=NEAR, far=FAR,
                          max_iters=MAX_ITERS):
    assert chunk_size % (SUB_ROWS * LANES) == 0
    n_rays = origins.shape[0]

    # Pad ray count to a multiple of chunk_size (padded rays are discarded;
    # they land at the sphere center, go valid on step 0, and stay frozen).
    n_pad = (-n_rays) % chunk_size
    if n_pad:
        origins = jnp.concatenate(
            [origins, jnp.zeros((n_pad, 3), origins.dtype)], axis=0)
        directions = jnp.concatenate(
            [directions, jnp.zeros((n_pad, 3), directions.dtype)], axis=0)
    n_total = n_rays + n_pad
    rows = n_total // LANES
    block_rows = chunk_size // LANES
    n_chunks = n_total // chunk_size

    # SoA / lane-dense layout: (component, row, lane), ray = row*128 + lane.
    o_soa = origins.astype(jnp.float32).T.reshape(3, rows, LANES)
    d_soa = directions.astype(jnp.float32).T.reshape(3, rows, LANES)

    # Flattened 1-D weights for scalar prefetch (minimal SMEM padding).
    w1f = w1.astype(jnp.float32).reshape(-1)      # (3*H,)  w1[c,j] -> c*H + j
    b1f = b1.astype(jnp.float32).reshape(-1)      # (H,)
    w2f = w2.astype(jnp.float32).reshape(-1)      # (H*3,)  w2[j,k] -> 3*j + k
    b2f = b2.astype(jnp.float32).reshape(-1)      # (3,)

    kernel = functools.partial(
        sphere_tracing_kernel,
        near=near, far=far, max_iters=max_iters, unroll=UNROLL,
        sub_rows=SUB_ROWS, center=SPHERE_CENTER, radius=SPHERE_RADIUS)

    ray_spec = pl.BlockSpec((3, block_rows, LANES), lambda i, *_: (0, i, 0))

    color_soa = pl.pallas_call(
        kernel,
        out_shape=jax.ShapeDtypeStruct((3, rows, LANES), jnp.float32),
        grid_spec=pltpu.PrefetchScalarGridSpec(
            num_scalar_prefetch=4,          # w1, b1, w2, b2 -> SMEM, copied once
            grid=(n_chunks,),
            in_specs=[ray_spec, ray_spec],
            out_specs=pl.BlockSpec((3, block_rows, LANES),
                                   lambda i, *_: (0, i, 0)),
        ),
        compiler_params=pltpu.CompilerParams(
            dimension_semantics=_ray_axis_semantics()),
    )(w1f, b1f, w2f, b2f, o_soa, d_soa)

    color = color_soa.reshape(3, n_total).T[:n_rays]     # back to (N, 3)
    return {"color": color}


# --------------------------- pure-JAX reference ------------------------------
def _reference(origins, directions, w1, b1, w2, b2,
               near=NEAR, far=FAR, max_iters=MAX_ITERS):
    c = jnp.asarray(SPHERE_CENTER, jnp.float32).reshape(1, 3)
    points = origins
    dist = jnp.zeros((origins.shape[0], 1), jnp.float32)
    fmask = jnp.zeros((origins.shape[0], 1), jnp.bool_)
    for _ in range(max_iters):
        diff = points - c
        sdfs = jnp.sqrt(jnp.sum(diff * diff, axis=-1, keepdims=True)) - SPHERE_RADIUS
        valid = (sdfs <= near) & (dist < far)
        fmask = fmask | valid
        step = jnp.where(valid, 0.0, sdfs)
        dist = dist + step
        points = points + directions * step
    fmask = fmask | (dist < far)
    h = jnp.maximum(points @ w1 + b1, 0.0)
    col = jax.nn.sigmoid(h @ w2 + b2)
    return jnp.where(fmask, col, 0.0)


# --------------------------------- main ---------------------------------------
if __name__ == "__main__":
    key = jax.random.PRNGKey(0)
    k_o, k_d, k_w1, k_b1, k_w2, k_b2 = jax.random.split(key, 6)

    n_rays = 32768   # 2 chunks of 16384 rays (even chunk count for v7x cores)
    # Camera-ish origins around (0, 0, -3), directions pointing roughly at +z.
    origins = jnp.array([0.0, 0.0, -3.0], jnp.float32) + \
        0.05 * jax.random.normal(k_o, (n_rays, 3), jnp.float32)
    directions = jnp.array([0.0, 0.0, 1.0], jnp.float32) + \
        0.4 * jax.random.normal(k_d, (n_rays, 3), jnp.float32)
    directions = directions / jnp.linalg.norm(directions, axis=-1, keepdims=True)

    # Deterministic "get_color" MLP parameters (3 -> HIDDEN -> 3).
    w1 = 0.5 * jax.random.normal(k_w1, (3, HIDDEN), jnp.float32)
    b1 = 0.1 * jax.random.normal(k_b1, (1, HIDDEN), jnp.float32)
    w2 = 0.5 * jax.random.normal(k_w2, (HIDDEN, 3), jnp.float32)
    b2 = 0.1 * jax.random.normal(k_b2, (1, 3), jnp.float32)

    out = sphere_tracing_render(origins, directions, w1, b1, w2, b2)
    color = jax.block_until_ready(out["color"])

    ref = _reference(origins, directions, w1, b1, w2, b2)
    assert color.shape == (n_rays, 3) and color.dtype == jnp.float32
    assert jnp.allclose(color, ref, atol=1e-3, rtol=1e-3), \
        float(jnp.max(jnp.abs(color - ref)))

    print("KERNEL_OK")
</pallas_src>

<mosaic_0001>
module attributes {stable_mosaic.version = 11 : i64} {
  func.func @sphere_tracing_kernel(%arg0: i32, %arg1: memref<96xf32, #tpu.memory_space<smem>>, %arg2: memref<32xf32, #tpu.memory_space<smem>>, %arg3: memref<96xf32, #tpu.memory_space<smem>>, %arg4: memref<3xf32, #tpu.memory_space<smem>>, %arg5: memref<3x128x128xf32, #tpu.memory_space<vmem>>, %arg6: memref<3x128x128xf32, #tpu.memory_space<vmem>>, %arg7: memref<3x128x128xf32, #tpu.memory_space<vmem>>) attributes {dimension_semantics = [#tpu.dimension_semantics<parallel>], iteration_bounds = array<i64: 2>, scalar_prefetch = 4 : i64, scratch_operands = 0 : i64, tpu.core_type = #tpu.core_type<tc>, window_params = [{transform_indices = @transform_0, window_bounds = array<i64: 3, 128, 128>}, {transform_indices = @transform_1, window_bounds = array<i64: 3, 128, 128>}, {transform_indices = @transform_2, window_bounds = array<i64: 3, 128, 128>}]} {
    %c0_i32 = arith.constant 0 : i32
    %c4_i32 = arith.constant 4 : i32
    %0 = arith.addi %c0_i32, %c4_i32 : i32
    %c1_i32 = arith.constant 1 : i32
    scf.for %arg8 = %c0_i32 to %0 step %c1_i32  : i32 {
      %c1_i32_1 = arith.constant 1 : i32
      %1 = arith.muli %arg8, %c1_i32_1 : i32
      %c0_i32_2 = arith.constant 0 : i32
      %2 = arith.addi %c0_i32_2, %1 : i32
      %c32_i32 = arith.constant 32 : i32
      %3 = arith.muli %2, %c32_i32 : i32
      %4 = tpu.assume_multiple %3, 32 : i32
      %c0 = arith.constant 0 : index
      %5 = arith.index_cast %4 : i32 to index
      %c0_3 = arith.constant 0 : index
      %6 = vector.load %arg5[%c0, %5, %c0_3] : memref<3x128x128xf32, #tpu.memory_space<vmem>>, vector<1x32x128xf32>
      %7 = vector.shape_cast %6 : vector<1x32x128xf32> to vector<32x128xf32>
      %c1 = arith.constant 1 : index
      %8 = arith.index_cast %4 : i32 to index
      %c0_4 = arith.constant 0 : index
      %9 = vector.load %arg5[%c1, %8, %c0_4] : memref<3x128x128xf32, #tpu.memory_space<vmem>>, vector<1x32x128xf32>
      %10 = vector.shape_cast %9 : vector<1x32x128xf32> to vector<32x128xf32>
      %c2 = arith.constant 2 : index
      %11 = arith.index_cast %4 : i32 to index
      %c0_5 = arith.constant 0 : index
      %12 = vector.load %arg5[%c2, %11, %c0_5] : memref<3x128x128xf32, #tpu.memory_space<vmem>>, vector<1x32x128xf32>
      %13 = vector.shape_cast %12 : vector<1x32x128xf32> to vector<32x128xf32>
      %c0_6 = arith.constant 0 : index
      %14 = arith.index_cast %4 : i32 to index
      %c0_7 = arith.constant 0 : index
      %15 = vector.load %arg6[%c0_6, %14, %c0_7] : memref<3x128x128xf32, #tpu.memory_space<vmem>>, vector<1x32x128xf32>
      %16 = vector.shape_cast %15 : vector<1x32x128xf32> to vector<32x128xf32>
      %c1_8 = arith.constant 1 : index
      %17 = arith.index_cast %4 : i32 to index
      %c0_9 = arith.constant 0 : index
      %18 = vector.load %arg6[%c1_8, %17, %c0_9] : memref<3x128x128xf32, #tpu.memory_space<vmem>>, vector<1x32x128xf32>
      %19 = vector.shape_cast %18 : vector<1x32x128xf32> to vector<32x128xf32>
      %c2_10 = arith.constant 2 : index
      %20 = arith.index_cast %4 : i32 to index
      %c0_11 = arith.constant 0 : index
      %21 = vector.load %arg6[%c2_10, %20, %c0_11] : memref<3x128x128xf32, #tpu.memory_space<vmem>>, vector<1x32x128xf32>
      %22 = vector.shape_cast %21 : vector<1x32x128xf32> to vector<32x128xf32>
      %cst = arith.constant 0.000000e+00 : f32
      %23 = vector.broadcast %cst : f32 to vector<32x128xf32>
      %c0_i32_12 = arith.constant 0 : i32
      %c16_i32 = arith.constant 16 : i32
      %24 = arith.addi %c0_i32_12, %c16_i32 : i32
      %c1_i32_13 = arith.constant 1 : i32
      %25:4 = scf.for %arg9 = %c0_i32_12 to %24 step %c1_i32_13 iter_args(%arg10 = %7, %arg11 = %10, %arg12 = %13, %arg13 = %23) -> (vector<32x128xf32>, vector<32x128xf32>, vector<32x128xf32>, vector<32x128xf32>)  : i32 {
        %963 = arith.mulf %arg10, %arg10 : vector<32x128xf32>
        %964 = arith.mulf %arg11, %arg11 : vector<32x128xf32>
        %965 = arith.addf %963, %964 : vector<32x128xf32>
        %966 = arith.mulf %arg12, %arg12 : vector<32x128xf32>
        %967 = arith.addf %965, %966 : vector<32x128xf32>
        %968 = math.sqrt %967 : vector<32x128xf32>
        %cst_193 = arith.constant 1.000000e+00 : f32
        %969 = vector.broadcast %cst_193 : f32 to vector<32x128xf32>
        %970 = arith.subf %968, %969 : vector<32x128xf32>
        %cst_194 = arith.constant 1.000000e-03 : f32
        %971 = vector.broadcast %cst_194 : f32 to vector<32x128xf32>
        %972 = arith.cmpf ole, %970, %971 : vector<32x128xf32>
        %cst_195 = arith.constant 1.000000e+01 : f32
        %973 = vector.broadcast %cst_195 : f32 to vector<32x128xf32>
        %974 = arith.cmpf olt, %arg13, %973 : vector<32x128xf32>
        %975 = arith.andi %972, %974 : vector<32x128xi1>
        %cst_196 = arith.constant 0.000000e+00 : f32
        %976 = vector.broadcast %cst_196 : f32 to vector<32x128xf32>
        %977 = arith.select %975, %976, %970 : vector<32x128xi1>, vector<32x128xf32>
        %978 = arith.addf %arg13, %977 : vector<32x128xf32>
        %979 = arith.mulf %16, %977 : vector<32x128xf32>
        %980 = arith.addf %arg10, %979 : vector<32x128xf32>
        %981 = arith.mulf %19, %977 : vector<32x128xf32>
        %982 = arith.addf %arg11, %981 : vector<32x128xf32>
        %983 = arith.mulf %22, %977 : vector<32x128xf32>
        %984 = arith.addf %arg12, %983 : vector<32x128xf32>
        %985 = arith.mulf %980, %980 : vector<32x128xf32>
        %986 = arith.mulf %982, %982 : vector<32x128xf32>
        %987 = arith.addf %985, %986 : vector<32x128xf32>
        %988 = arith.mulf %984, %984 : vector<32x128xf32>
        %989 = arith.addf %987, %988 : vector<32x128xf32>
        %990 = math.sqrt %989 : vector<32x128xf32>
        %cst_197 = arith.constant 1.000000e+00 : f32
        %991 = vector.broadcast %cst_197 : f32 to vector<32x128xf32>
        %992 = arith.subf %990, %991 : vector<32x128xf32>
        %cst_198 = arith.constant 1.000000e-03 : f32
        %993 = vector.broadcast %cst_198 : f32 to vector<32x128xf32>
        %994 = arith.cmpf ole, %992, %993 : vector<32x128xf32>
        %cst_199 = arith.constant 1.000000e+01 : f32
        %995 = vector.broadcast %cst_199 : f32 to vector<32x128xf32>
        %996 = arith.cmpf olt, %978, %995 : vector<32x128xf32>
        %997 = arith.andi %994, %996 : vector<32x128xi1>
        %cst_200 = arith.constant 0.000000e+00 : f32
        %998 = vector.broadcast %cst_200 : f32 to vector<32x128xf32>
        %999 = arith.select %997, %998, %992 : vector<32x128xi1>, vector<32x128xf32>
        %1000 = arith.addf %978, %999 : vector<32x128xf32>
        %1001 = arith.mulf %16, %999 : vector<32x128xf32>
        %1002 = arith.addf %980, %1001 : vector<32x128xf32>
        %1003 = arith.mulf %19, %999 : vector<32x128xf32>
        %1004 = arith.addf %982, %1003 : vector<32x128xf32>
        %1005 = arith.mulf %22, %999 : vector<32x128xf32>
        %1006 = arith.addf %984, %1005 : vector<32x128xf32>
        %1007 = arith.mulf %1002, %1002 : vector<32x128xf32>
        %1008 = arith.mulf %1004, %1004 : vector<32x128xf32>
        %1009 = arith.addf %1007, %1008 : vector<32x128xf32>
        %1010 = arith.mulf %1006, %1006 : vector<32x128xf32>
        %1011 = arith.addf %1009, %1010 : vector<32x128xf32>
        %1012 = math.sqrt %1011 : vector<32x128xf32>
        %cst_201 = arith.constant 1.000000e+00 : f32
        %1013 = vector.broadcast %cst_201 : f32 to vector<32x128xf32>
        %1014 = arith.subf %1012, %1013 : vector<32x128xf32>
        %cst_202 = arith.constant 1.000000e-03 : f32
        %1015 = vector.broadcast %cst_202 : f32 to vector<32x128xf32>
        %1016 = arith.cmpf ole, %1014, %1015 : vector<32x128xf32>
        %cst_203 = arith.constant 1.000000e+01 : f32
        %1017 = vector.broadcast %cst_203 : f32 to vector<32x128xf32>
        %1018 = arith.cmpf olt, %1000, %1017 : vector<32x128xf32>
        %1019 = arith.andi %1016, %1018 : vector<32x128xi1>
        %cst_204 = arith.constant 0.000000e+00 : f32
        %1020 = vector.broadcast %cst_204 : f32 to vector<32x128xf32>
        %1021 = arith.select %1019, %1020, %1014 : vector<32x128xi1>, vector<32x128xf32>
        %1022 = arith.addf %1000, %1021 : vector<32x128xf32>
        %1023 = arith.mulf %16, %1021 : vector<32x128xf32>
        %1024 = arith.addf %1002, %1023 : vector<32x128xf32>
        %1025 = arith.mulf %19, %1021 : vector<32x128xf32>
        %1026 = arith.addf %1004, %1025 : vector<32x128xf32>
        %1027 = arith.mulf %22, %1021 : vector<32x128xf32>
        %1028 = arith.addf %1006, %1027 : vector<32x128xf32>
        %1029 = arith.mulf %1024, %1024 : vector<32x128xf32>
        %1030 = arith.mulf %1026, %1026 : vector<32x128xf32>
        %1031 = arith.addf %1029, %1030 : vector<32x128xf32>
        %1032 = arith.mulf %1028, %1028 : vector<32x128xf32>
        %1033 = arith.addf %1031, %1032 : vector<32x128xf32>
        %1034 = math.sqrt %1033 : vector<32x128xf32>
        %cst_205 = arith.constant 1.000000e+00 : f32
        %1035 = vector.broadcast %cst_205 : f32 to vector<32x128xf32>
        %1036 = arith.subf %1034, %1035 : vector<32x128xf32>
        %cst_206 = arith.constant 1.000000e-03 : f32
        %1037 = vector.broadcast %cst_206 : f32 to vector<32x128xf32>
        %1038 = arith.cmpf ole, %1036, %1037 : vector<32x128xf32>
        %cst_207 = arith.constant 1.000000e+01 : f32
        %1039 = vector.broadcast %cst_207 : f32 to vector<32x128xf32>
        %1040 = arith.cmpf olt, %1022, %1039 : vector<32x128xf32>
        %1041 = arith.andi %1038, %1040 : vector<32x128xi1>
        %cst_208 = arith.constant 0.000000e+00 : f32
        %1042 = vector.broadcast %cst_208 : f32 to vector<32x128xf32>
        %1043 = arith.select %1041, %1042, %1036 : vector<32x128xi1>, vector<32x128xf32>
        %1044 = arith.addf %1022, %1043 : vector<32x128xf32>
        %1045 = arith.mulf %16, %1043 : vector<32x128xf32>
        %1046 = arith.addf %1024, %1045 : vector<32x128xf32>
        %1047 = arith.mulf %19, %1043 : vector<32x128xf32>
        %1048 = arith.addf %1026, %1047 : vector<32x128xf32>
        %1049 = arith.mulf %22, %1043 : vector<32x128xf32>
        %1050 = arith.addf %1028, %1049 : vector<32x128xf32>
        scf.yield %1046, %1048, %1050, %1044 : vector<32x128xf32>, vector<32x128xf32>, vector<32x128xf32>, vector<32x128xf32>
      }
      %cst_14 = arith.constant 1.000000e+01 : f32
      %26 = vector.broadcast %cst_14 : f32 to vector<32x128xf32>
      %27 = arith.cmpf olt, %25#3, %26 : vector<32x128xf32>
      %c0_15 = arith.constant 0 : index
      %28 = memref.load %arg4[%c0_15] : memref<3xf32, #tpu.memory_space<smem>>
      %29 = vector.broadcast %28 : f32 to vector<32x128xf32>
      %c1_16 = arith.constant 1 : index
      %30 = memref.load %arg4[%c1_16] : memref<3xf32, #tpu.memory_space<smem>>
      %31 = vector.broadcast %30 : f32 to vector<32x128xf32>
      %c2_17 = arith.constant 2 : index
      %32 = memref.load %arg4[%c2_17] : memref<3xf32, #tpu.memory_space<smem>>
      %33 = vector.broadcast %32 : f32 to vector<32x128xf32>
      %c0_18 = arith.constant 0 : index
      %34 = memref.load %arg1[%c0_18] : memref<96xf32, #tpu.memory_space<smem>>
      %35 = vector.broadcast %34 : f32 to vector<32x128xf32>
      %36 = arith.mulf %25#0, %35 : vector<32x128xf32>
      %c32 = arith.constant 32 : index
      %37 = memref.load %arg1[%c32] : memref<96xf32, #tpu.memory_space<smem>>
      %38 = vector.broadcast %37 : f32 to vector<32x128xf32>
      %39 = arith.mulf %25#1, %38 : vector<32x128xf32>
      %40 = arith.addf %36, %39 : vector<32x128xf32>
      %c64 = arith.constant 64 : index
      %41 = memref.load %arg1[%c64] : memref<96xf32, #tpu.memory_space<smem>>
      %42 = vector.broadcast %41 : f32 to vector<32x128xf32>
      %43 = arith.mulf %25#2, %42 : vector<32x128xf32>
      %44 = arith.addf %40, %43 : vector<32x128xf32>
      %c0_19 = arith.constant 0 : index
      %45 = memref.load %arg2[%c0_19] : memref<32xf32, #tpu.memory_space<smem>>
      %46 = vector.broadcast %45 : f32 to vector<32x128xf32>
      %47 = arith.addf %44, %46 : vector<32x128xf32>
      %cst_20 = arith.constant 0.000000e+00 : f32
      %48 = vector.broadcast %cst_20 : f32 to vector<32x128xf32>
      %49 = arith.maximumf %47, %48 : vector<32x128xf32>
      %c0_21 = arith.constant 0 : index
      %50 = memref.load %arg3[%c0_21] : memref<96xf32, #tpu.memory_space<smem>>
      %51 = vector.broadcast %50 : f32 to vector<32x128xf32>
      %52 = arith.mulf %49, %51 : vector<32x128xf32>
      %53 = arith.addf %29, %52 : vector<32x128xf32>
      %c1_22 = arith.constant 1 : index
      %54 = memref.load %arg3[%c1_22] : memref<96xf32, #tpu.memory_space<smem>>
      %55 = vector.broadcast %54 : f32 to vector<32x128xf32>
      %56 = arith.mulf %49, %55 : vector<32x128xf32>
      %57 = arith.addf %31, %56 : vector<32x128xf32>
      %c2_23 = arith.constant 2 : index
      %58 = memref.load %arg3[%c2_23] : memref<96xf32, #tpu.memory_space<smem>>
      %59 = vector.broadcast %58 : f32 to vector<32x128xf32>
      %60 = arith.mulf %49, %59 : vector<32x128xf32>
      %61 = arith.addf %33, %60 : vector<32x128xf32>
      %c1_24 = arith.constant 1 : index
      %62 = memref.load %arg1[%c1_24] : memref<96xf32, #tpu.memory_space<smem>>
      %63 = vector.broadcast %62 : f32 to vector<32x128xf32>
      %64 = arith.mulf %25#0, %63 : vector<32x128xf32>
      %c33 = arith.constant 33 : index
      %65 = memref.load %arg1[%c33] : memref<96xf32, #tpu.memory_space<smem>>
      %66 = vector.broadcast %65 : f32 to vector<32x128xf32>
      %67 = arith.mulf %25#1, %66 : vector<32x128xf32>
      %68 = arith.addf %64, %67 : vector<32x128xf32>
      %c65 = arith.constant 65 : index
      %69 = memref.load %arg1[%c65] : memref<96xf32, #tpu.memory_space<smem>>
      %70 = vector.broadcast %69 : f32 to vector<32x128xf32>
      %71 = arith.mulf %25#2, %70 : vector<32x128xf32>
      %72 = arith.addf %68, %71 : vector<32x128xf32>
      %c1_25 = arith.constant 1 : index
      %73 = memref.load %arg2[%c1_25] : memref<32xf32, #tpu.memory_space<smem>>
      %74 = vector.broadcast %73 : f32 to vector<32x128xf32>
      %75 = arith.addf %72, %74 : vector<32x128xf32>
      %cst_26 = arith.constant 0.000000e+00 : f32
      %76 = vector.broadcast %cst_26 : f32 to vector<32x128xf32>
      %77 = arith.maximumf %75, %76 : vector<32x128xf32>
      %c3 = arith.constant 3 : index
      %78 = memref.load %arg3[%c3] : memref<96xf32, #tpu.memory_space<smem>>
      %79 = vector.broadcast %78 : f32 to vector<32x128xf32>
      %80 = arith.mulf %77, %79 : vector<32x128xf32>
      %81 = arith.addf %53, %80 : vector<32x128xf32>
      %c4 = arith.constant 4 : index
      %82 = memref.load %arg3[%c4] : memref<96xf32, #tpu.memory_space<smem>>
      %83 = vector.broadcast %82 : f32 to vector<32x128xf32>
      %84 = arith.mulf %77, %83 : vector<32x128xf32>
      %85 = arith.addf %57, %84 : vector<32x128xf32>
      %c5 = arith.constant 5 : index
      %86 = memref.load %arg3[%c5] : memref<96xf32, #tpu.memory_space<smem>>
      %87 = vector.broadcast %86 : f32 to vector<32x128xf32>
      %88 = arith.mulf %77, %87 : vector<32x128xf32>
      %89 = arith.addf %61, %88 : vector<32x128xf32>
      %c2_27 = arith.constant 2 : index
      %90 = memref.load %arg1[%c2_27] : memref<96xf32, #tpu.memory_space<smem>>
      %91 = vector.broadcast %90 : f32 to vector<32x128xf32>
      %92 = arith.mulf %25#0, %91 : vector<32x128xf32>
      %c34 = arith.constant 34 : index
      %93 = memref.load %arg1[%c34] : memref<96xf32, #tpu.memory_space<smem>>
      %94 = vector.broadcast %93 : f32 to vector<32x128xf32>
      %95 = arith.mulf %25#1, %94 : vector<32x128xf32>
      %96 = arith.addf %92, %95 : vector<32x128xf32>
      %c66 = arith.constant 66 : index
      %97 = memref.load %arg1[%c66] : memref<96xf32, #tpu.memory_space<smem>>
      %98 = vector.broadcast %97 : f32 to vector<32x128xf32>
      %99 = arith.mulf %25#2, %98 : vector<32x128xf32>
      %100 = arith.addf %96, %99 : vector<32x128xf32>
      %c2_28 = arith.constant 2 : index
      %101 = memref.load %arg2[%c2_28] : memref<32xf32, #tpu.memory_space<smem>>
      %102 = vector.broadcast %101 : f32 to vector<32x128xf32>
      %103 = arith.addf %100, %102 : vector<32x128xf32>
      %cst_29 = arith.constant 0.000000e+00 : f32
      %104 = vector.broadcast %cst_29 : f32 to vector<32x128xf32>
      %105 = arith.maximumf %103, %104 : vector<32x128xf32>
      %c6 = arith.constant 6 : index
      %106 = memref.load %arg3[%c6] : memref<96xf32, #tpu.memory_space<smem>>
      %107 = vector.broadcast %106 : f32 to vector<32x128xf32>
      %108 = arith.mulf %105, %107 : vector<32x128xf32>
      %109 = arith.addf %81, %108 : vector<32x128xf32>
      %c7 = arith.constant 7 : index
      %110 = memref.load %arg3[%c7] : memref<96xf32, #tpu.memory_space<smem>>
      %111 = vector.broadcast %110 : f32 to vector<32x128xf32>
      %112 = arith.mulf %105, %111 : vector<32x128xf32>
      %113 = arith.addf %85, %112 : vector<32x128xf32>
      %c8 = arith.constant 8 : index
      %114 = memref.load %arg3[%c8] : memref<96xf32, #tpu.memory_space<smem>>
      %115 = vector.broadcast %114 : f32 to vector<32x128xf32>
      %116 = arith.mulf %105, %115 : vector<32x128xf32>
      %117 = arith.addf %89, %116 : vector<32x128xf32>
      %c3_30 = arith.constant 3 : index
      %118 = memref.load %arg1[%c3_30] : memref<96xf32, #tpu.memory_space<smem>>
      %119 = vector.broadcast %118 : f32 to vector<32x128xf32>
      %120 = arith.mulf %25#0, %119 : vector<32x128xf32>
      %c35 = arith.constant 35 : index
      %121 = memref.load %arg1[%c35] : memref<96xf32, #tpu.memory_space<smem>>
      %122 = vector.broadcast %121 : f32 to vector<32x128xf32>
      %123 = arith.mulf %25#1, %122 : vector<32x128xf32>
      %124 = arith.addf %120, %123 : vector<32x128xf32>
      %c67 = arith.constant 67 : index
      %125 = memref.load %arg1[%c67] : memref<96xf32, #tpu.memory_space<smem>>
      %126 = vector.broadcast %125 : f32 to vector<32x128xf32>
      %127 = arith.mulf %25#2, %126 : vector<32x128xf32>
      %128 = arith.addf %124, %127 : vector<32x128xf32>
      %c3_31 = arith.constant 3 : index
      %129 = memref.load %arg2[%c3_31] : memref<32xf32, #tpu.memory_space<smem>>
      %130 = vector.broadcast %129 : f32 to vector<32x128xf32>
      %131 = arith.addf %128, %130 : vector<32x128xf32>
      %cst_32 = arith.constant 0.000000e+00 : f32
      %132 = vector.broadcast %cst_32 : f32 to vector<32x128xf32>
      %133 = arith.maximumf %131, %132 : vector<32x128xf32>
      %c9 = arith.constant 9 : index
      %134 = memref.load %arg3[%c9] : memref<96xf32, #tpu.memory_space<smem>>
      %135 = vector.broadcast %134 : f32 to vector<32x128xf32>
      %136 = arith.mulf %133, %135 : vector<32x128xf32>
      %137 = arith.addf %109, %136 : vector<32x128xf32>
      %c10 = arith.constant 10 : index
      %138 = memref.load %arg3[%c10] : memref<96xf32, #tpu.memory_space<smem>>
      %139 = vector.broadcast %138 : f32 to vector<32x128xf32>
      %140 = arith.mulf %133, %139 : vector<32x128xf32>
      %141 = arith.addf %113, %140 : vector<32x128xf32>
      %c11 = arith.constant 11 : index
      %142 = memref.load %arg3[%c11] : memref<96xf32, #tpu.memory_space<smem>>
      %143 = vector.broadcast %142 : f32 to vector<32x128xf32>
      %144 = arith.mulf %133, %143 : vector<32x128xf32>
      %145 = arith.addf %117, %144 : vector<32x128xf32>
      %c4_33 = arith.constant 4 : index
      %146 = memref.load %arg1[%c4_33] : memref<96xf32, #tpu.memory_space<smem>>
      %147 = vector.broadcast %146 : f32 to vector<32x128xf32>
      %148 = arith.mulf %25#0, %147 : vector<32x128xf32>
      %c36 = arith.constant 36 : index
      %149 = memref.load %arg1[%c36] : memref<96xf32, #tpu.memory_space<smem>>
      %150 = vector.broadcast %149 : f32 to vector<32x128xf32>
      %151 = arith.mulf %25#1, %150 : vector<32x128xf32>
      %152 = arith.addf %148, %151 : vector<32x128xf32>
      %c68 = arith.constant 68 : index
      %153 = memref.load %arg1[%c68] : memref<96xf32, #tpu.memory_space<smem>>
      %154 = vector.broadcast %153 : f32 to vector<32x128xf32>
      %155 = arith.mulf %25#2, %154 : vector<32x128xf32>
      %156 = arith.addf %152, %155 : vector<32x128xf32>
      %c4_34 = arith.constant 4 : index
      %157 = memref.load %arg2[%c4_34] : memref<32xf32, #tpu.memory_space<smem>>
      %158 = vector.broadcast %157 : f32 to vector<32x128xf32>
      %159 = arith.addf %156, %158 : vector<32x128xf32>
      %cst_35 = arith.constant 0.000000e+00 : f32
      %160 = vector.broadcast %cst_35 : f32 to vector<32x128xf32>
      %161 = arith.maximumf %159, %160 : vector<32x128xf32>
      %c12 = arith.constant 12 : index
      %162 = memref.load %arg3[%c12] : memref<96xf32, #tpu.memory_space<smem>>
      %163 = vector.broadcast %162 : f32 to vector<32x128xf32>
      %164 = arith.mulf %161, %163 : vector<32x128xf32>
      %165 = arith.addf %137, %164 : vector<32x128xf32>
      %c13 = arith.constant 13 : index
      %166 = memref.load %arg3[%c13] : memref<96xf32, #tpu.memory_space<smem>>
      %167 = vector.broadcast %166 : f32 to vector<32x128xf32>
      %168 = arith.mulf %161, %167 : vector<32x128xf32>
      %169 = arith.addf %141, %168 : vector<32x128xf32>
      %c14 = arith.constant 14 : index
      %170 = memref.load %arg3[%c14] : memref<96xf32, #tpu.memory_space<smem>>
      %171 = vector.broadcast %170 : f32 to vector<32x128xf32>
      %172 = arith.mulf %161, %171 : vector<32x128xf32>
      %173 = arith.addf %145, %172 : vector<32x128xf32>
      %c5_36 = arith.constant 5 : index
      %174 = memref.load %arg1[%c5_36] : memref<96xf32, #tpu.memory_space<smem>>
      %175 = vector.broadcast %174 : f32 to vector<32x128xf32>
      %176 = arith.mulf %25#0, %175 : vector<32x128xf32>
      %c37 = arith.constant 37 : index
      %177 = memref.load %arg1[%c37] : memref<96xf32, #tpu.memory_space<smem>>
      %178 = vector.broadcast %177 : f32 to vector<32x128xf32>
      %179 = arith.mulf %25#1, %178 : vector<32x128xf32>
      %180 = arith.addf %176, %179 : vector<32x128xf32>
      %c69 = arith.constant 69 : index
      %181 = memref.load %arg1[%c69] : memref<96xf32, #tpu.memory_space<smem>>
      %182 = vector.broadcast %181 : f32 to vector<32x128xf32>
      %183 = arith.mulf %25#2, %182 : vector<32x128xf32>
      %184 = arith.addf %180, %183 : vector<32x128xf32>
      %c5_37 = arith.constant 5 : index
      %185 = memref.load %arg2[%c5_37] : memref<32xf32, #tpu.memory_space<smem>>
      %186 = vector.broadcast %185 : f32 to vector<32x128xf32>
      %187 = arith.addf %184, %186 : vector<32x128xf32>
      %cst_38 = arith.constant 0.000000e+00 : f32
      %188 = vector.broadcast %cst_38 : f32 to vector<32x128xf32>
      %189 = arith.maximumf %187, %188 : vector<32x128xf32>
      %c15 = arith.constant 15 : index
      %190 = memref.load %arg3[%c15] : memref<96xf32, #tpu.memory_space<smem>>
      %191 = vector.broadcast %190 : f32 to vector<32x128xf32>
      %192 = arith.mulf %189, %191 : vector<32x128xf32>
      %193 = arith.addf %165, %192 : vector<32x128xf32>
      %c16 = arith.constant 16 : index
      %194 = memref.load %arg3[%c16] : memref<96xf32, #tpu.memory_space<smem>>
      %195 = vector.broadcast %194 : f32 to vector<32x128xf32>
      %196 = arith.mulf %189, %195 : vector<32x128xf32>
      %197 = arith.addf %169, %196 : vector<32x128xf32>
      %c17 = arith.constant 17 : index
      %198 = memref.load %arg3[%c17] : memref<96xf32, #tpu.memory_space<smem>>
      %199 = vector.broadcast %198 : f32 to vector<32x128xf32>
      %200 = arith.mulf %189, %199 : vector<32x128xf32>
      %201 = arith.addf %173, %200 : vector<32x128xf32>
      %c6_39 = arith.constant 6 : index
      %202 = memref.load %arg1[%c6_39] : memref<96xf32, #tpu.memory_space<smem>>
      %203 = vector.broadcast %202 : f32 to vector<32x128xf32>
      %204 = arith.mulf %25#0, %203 : vector<32x128xf32>
      %c38 = arith.constant 38 : index
      %205 = memref.load %arg1[%c38] : memref<96xf32, #tpu.memory_space<smem>>
      %206 = vector.broadcast %205 : f32 to vector<32x128xf32>
      %207 = arith.mulf %25#1, %206 : vector<32x128xf32>
      %208 = arith.addf %204, %207 : vector<32x128xf32>
      %c70 = arith.constant 70 : index
      %209 = memref.load %arg1[%c70] : memref<96xf32, #tpu.memory_space<smem>>
      %210 = vector.broadcast %209 : f32 to vector<32x128xf32>
      %211 = arith.mulf %25#2, %210 : vector<32x128xf32>
      %212 = arith.addf %208, %211 : vector<32x128xf32>
      %c6_40 = arith.constant 6 : index
      %213 = memref.load %arg2[%c6_40] : memref<32xf32, #tpu.memory_space<smem>>
      %214 = vector.broadcast %213 : f32 to vector<32x128xf32>
      %215 = arith.addf %212, %214 : vector<32x128xf32>
      %cst_41 = arith.constant 0.000000e+00 : f32
      %216 = vector.broadcast %cst_41 : f32 to vector<32x128xf32>
      %217 = arith.maximumf %215, %216 : vector<32x128xf32>
      %c18 = arith.constant 18 : index
      %218 = memref.load %arg3[%c18] : memref<96xf32, #tpu.memory_space<smem>>
      %219 = vector.broadcast %218 : f32 to vector<32x128xf32>
      %220 = arith.mulf %217, %219 : vector<32x128xf32>
      %221 = arith.addf %193, %220 : vector<32x128xf32>
      %c19 = arith.constant 19 : index
      %222 = memref.load %arg3[%c19] : memref<96xf32, #tpu.memory_space<smem>>
      %223 = vector.broadcast %222 : f32 to vector<32x128xf32>
      %224 = arith.mulf %217, %223 : vector<32x128xf32>
      %225 = arith.addf %197, %224 : vector<32x128xf32>
      %c20 = arith.constant 20 : index
      %226 = memref.load %arg3[%c20] : memref<96xf32, #tpu.memory_space<smem>>
      %227 = vector.broadcast %226 : f32 to vector<32x128xf32>
      %228 = arith.mulf %217, %227 : vector<32x128xf32>
      %229 = arith.addf %201, %228 : vector<32x128xf32>
      %c7_42 = arith.constant 7 : index
      %230 = memref.load %arg1[%c7_42] : memref<96xf32, #tpu.memory_space<smem>>
      %231 = vector.broadcast %230 : f32 to vector<32x128xf32>
      %232 = arith.mulf %25#0, %231 : vector<32x128xf32>
      %c39 = arith.constant 39 : index
      %233 = memref.load %arg1[%c39] : memref<96xf32, #tpu.memory_space<smem>>
      %234 = vector.broadcast %233 : f32 to vector<32x128xf32>
      %235 = arith.mulf %25#1, %234 : vector<32x128xf32>
      %236 = arith.addf %232, %235 : vector<32x128xf32>
      %c71 = arith.constant 71 : index
      %237 = memref.load %arg1[%c71] : memref<96xf32, #tpu.memory_space<smem>>
      %238 = vector.broadcast %237 : f32 to vector<32x128xf32>
      %239 = arith.mulf %25#2, %238 : vector<32x128xf32>
      %240 = arith.addf %236, %239 : vector<32x128xf32>
      %c7_43 = arith.constant 7 : index
      %241 = memref.load %arg2[%c7_43] : memref<32xf32, #tpu.memory_space<smem>>
      %242 = vector.broadcast %241 : f32 to vector<32x128xf32>
      %243 = arith.addf %240, %242 : vector<32x128xf32>
      %cst_44 = arith.constant 0.000000e+00 : f32
      %244 = vector.broadcast %cst_44 : f32 to vector<32x128xf32>
      %245 = arith.maximumf %243, %244 : vector<32x128xf32>
      %c21 = arith.constant 21 : index
      %246 = memref.load %arg3[%c21] : memref<96xf32, #tpu.memory_space<smem>>
      %247 = vector.broadcast %246 : f32 to vector<32x128xf32>
      %248 = arith.mulf %245, %247 : vector<32x128xf32>
      %249 = arith.addf %221, %248 : vector<32x128xf32>
      %c22 = arith.constant 22 : index
      %250 = memref.load %arg3[%c22] : memref<96xf32, #tpu.memory_space<smem>>
      %251 = vector.broadcast %250 : f32 to vector<32x128xf32>
      %252 = arith.mulf %245, %251 : vector<32x128xf32>
      %253 = arith.addf %225, %252 : vector<32x128xf32>
      %c23 = arith.constant 23 : index
      %254 = memref.load %arg3[%c23] : memref<96xf32, #tpu.memory_space<smem>>
      %255 = vector.broadcast %254 : f32 to vector<32x128xf32>
      %256 = arith.mulf %245, %255 : vector<32x128xf32>
      %257 = arith.addf %229, %256 : vector<32x128xf32>
      %c8_45 = arith.constant 8 : index
      %258 = memref.load %arg1[%c8_45] : memref<96xf32, #tpu.memory_space<smem>>
      %259 = vector.broadcast %258 : f32 to vector<32x128xf32>
      %260 = arith.mulf %25#0, %259 : vector<32x128xf32>
      %c40 = arith.constant 40 : index
      %261 = memref.load %arg1[%c40] : memref<96xf32, #tpu.memory_space<smem>>
      %262 = vector.broadcast %261 : f32 to vector<32x128xf32>
      %263 = arith.mulf %25#1, %262 : vector<32x128xf32>
      %264 = arith.addf %260, %263 : vector<32x128xf32>
      %c72 = arith.constant 72 : index
      %265 = memref.load %arg1[%c72] : memref<96xf32, #tpu.memory_space<smem>>
      %266 = vector.broadcast %265 : f32 to vector<32x128xf32>
      %267 = arith.mulf %25#2, %266 : vector<32x128xf32>
      %268 = arith.addf %264, %267 : vector<32x128xf32>
      %c8_46 = arith.constant 8 : index
      %269 = memref.load %arg2[%c8_46] : memref<32xf32, #tpu.memory_space<smem>>
      %270 = vector.broadcast %269 : f32 to vector<32x128xf32>
      %271 = arith.addf %268, %270 : vector<32x128xf32>
      %cst_47 = arith.constant 0.000000e+00 : f32
      %272 = vector.broadcast %cst_47 : f32 to vector<32x128xf32>
      %273 = arith.maximumf %271, %272 : vector<32x128xf32>
      %c24 = arith.constant 24 : index
      %274 = memref.load %arg3[%c24] : memref<96xf32, #tpu.memory_space<smem>>
      %275 = vector.broadcast %274 : f32 to vector<32x128xf32>
      %276 = arith.mulf %273, %275 : vector<32x128xf32>
      %277 = arith.addf %249, %276 : vector<32x128xf32>
      %c25 = arith.constant 25 : index
      %278 = memref.load %arg3[%c25] : memref<96xf32, #tpu.memory_space<smem>>
      %279 = vector.broadcast %278 : f32 to vector<32x128xf32>
      %280 = arith.mulf %273, %279 : vector<32x128xf32>
      %281 = arith.addf %253, %280 : vector<32x128xf32>
      %c26 = arith.constant 26 : index
      %282 = memref.load %arg3[%c26] : memref<96xf32, #tpu.memory_space<smem>>
      %283 = vector.broadcast %282 : f32 to vector<32x128xf32>
      %284 = arith.mulf %273, %283 : vector<32x128xf32>
      %285 = arith.addf %257, %284 : vector<32x128xf32>
      %c9_48 = arith.constant 9 : index
      %286 = memref.load %arg1[%c9_48] : memref<96xf32, #tpu.memory_space<smem>>
      %287 = vector.broadcast %286 : f32 to vector<32x128xf32>
      %288 = arith.mulf %25#0, %287 : vector<32x128xf32>
      %c41 = arith.constant 41 : index
      %289 = memref.load %arg1[%c41] : memref<96xf32, #tpu.memory_space<smem>>
      %290 = vector.broadcast %289 : f32 to vector<32x128xf32>
      %291 = arith.mulf %25#1, %290 : vector<32x128xf32>
      %292 = arith.addf %288, %291 : vector<32x128xf32>
      %c73 = arith.constant 73 : index
      %293 = memref.load %arg1[%c73] : memref<96xf32, #tpu.memory_space<smem>>
      %294 = vector.broadcast %293 : f32 to vector<32x128xf32>
      %295 = arith.mulf %25#2, %294 : vector<32x128xf32>
      %296 = arith.addf %292, %295 : vector<32x128xf32>
      %c9_49 = arith.constant 9 : index
      %297 = memref.load %arg2[%c9_49] : memref<32xf32, #tpu.memory_space<smem>>
      %298 = vector.broadcast %297 : f32 to vector<32x128xf32>
      %299 = arith.addf %296, %298 : vector<32x128xf32>
      %cst_50 = arith.constant 0.000000e+00 : f32
      %300 = vector.broadcast %cst_50 : f32 to vector<32x128xf32>
      %301 = arith.maximumf %299, %300 : vector<32x128xf32>
      %c27 = arith.constant 27 : index
      %302 = memref.load %arg3[%c27] : memref<96xf32, #tpu.memory_space<smem>>
      %303 = vector.broadcast %302 : f32 to vector<32x128xf32>
      %304 = arith.mulf %301, %303 : vector<32x128xf32>
      %305 = arith.addf %277, %304 : vector<32x128xf32>
      %c28 = arith.constant 28 : index
      %306 = memref.load %arg3[%c28] : memref<96xf32, #tpu.memory_space<smem>>
      %307 = vector.broadcast %306 : f32 to vector<32x128xf32>
      %308 = arith.mulf %301, %307 : vector<32x128xf32>
      %309 = arith.addf %281, %308 : vector<32x128xf32>
      %c29 = arith.constant 29 : index
      %310 = memref.load %arg3[%c29] : memref<96xf32, #tpu.memory_space<smem>>
      %311 = vector.broadcast %310 : f32 to vector<32x128xf32>
      %312 = arith.mulf %301, %311 : vector<32x128xf32>
      %313 = arith.addf %285, %312 : vector<32x128xf32>
      %c10_51 = arith.constant 10 : index
      %314 = memref.load %arg1[%c10_51] : memref<96xf32, #tpu.memory_space<smem>>
      %315 = vector.broadcast %314 : f32 to vector<32x128xf32>
      %316 = arith.mulf %25#0, %315 : vector<32x128xf32>
      %c42 = arith.constant 42 : index
      %317 = memref.load %arg1[%c42] : memref<96xf32, #tpu.memory_space<smem>>
      %318 = vector.broadcast %317 : f32 to vector<32x128xf32>
      %319 = arith.mulf %25#1, %318 : vector<32x128xf32>
      %320 = arith.addf %316, %319 : vector<32x128xf32>
      %c74 = arith.constant 74 : index
      %321 = memref.load %arg1[%c74] : memref<96xf32, #tpu.memory_space<smem>>
      %322 = vector.broadcast %321 : f32 to vector<32x128xf32>
      %323 = arith.mulf %25#2, %322 : vector<32x128xf32>
      %324 = arith.addf %320, %323 : vector<32x128xf32>
      %c10_52 = arith.constant 10 : index
      %325 = memref.load %arg2[%c10_52] : memref<32xf32, #tpu.memory_space<smem>>
      %326 = vector.broadcast %325 : f32 to vector<32x128xf32>
      %327 = arith.addf %324, %326 : vector<32x128xf32>
      %cst_53 = arith.constant 0.000000e+00 : f32
      %328 = vector.broadcast %cst_53 : f32 to vector<32x128xf32>
      %329 = arith.maximumf %327, %328 : vector<32x128xf32>
      %c30 = arith.constant 30 : index
      %330 = memref.load %arg3[%c30] : memref<96xf32, #tpu.memory_space<smem>>
      %331 = vector.broadcast %330 : f32 to vector<32x128xf32>
      %332 = arith.mulf %329, %331 : vector<32x128xf32>
      %333 = arith.addf %305, %332 : vector<32x128xf32>
      %c31 = arith.constant 31 : index
      %334 = memref.load %arg3[%c31] : memref<96xf32, #tpu.memory_space<smem>>
      %335 = vector.broadcast %334 : f32 to vector<32x128xf32>
      %336 = arith.mulf %329, %335 : vector<32x128xf32>
      %337 = arith.addf %309, %336 : vector<32x128xf32>
      %c32_54 = arith.constant 32 : index
      %338 = memref.load %arg3[%c32_54] : memref<96xf32, #tpu.memory_space<smem>>
      %339 = vector.broadcast %338 : f32 to vector<32x128xf32>
      %340 = arith.mulf %329, %339 : vector<32x128xf32>
      %341 = arith.addf %313, %340 : vector<32x128xf32>
      %c11_55 = arith.constant 11 : index
      %342 = memref.load %arg1[%c11_55] : memref<96xf32, #tpu.memory_space<smem>>
      %343 = vector.broadcast %342 : f32 to vector<32x128xf32>
      %344 = arith.mulf %25#0, %343 : vector<32x128xf32>
      %c43 = arith.constant 43 : index
      %345 = memref.load %arg1[%c43] : memref<96xf32, #tpu.memory_space<smem>>
      %346 = vector.broadcast %345 : f32 to vector<32x128xf32>
      %347 = arith.mulf %25#1, %346 : vector<32x128xf32>
      %348 = arith.addf %344, %347 : vector<32x128xf32>
      %c75 = arith.constant 75 : index
      %349 = memref.load %arg1[%c75] : memref<96xf32, #tpu.memory_space<smem>>
      %350 = vector.broadcast %349 : f32 to vector<32x128xf32>
      %351 = arith.mulf %25#2, %350 : vector<32x128xf32>
      %352 = arith.addf %348, %351 : vector<32x128xf32>
      %c11_56 = arith.constant 11 : index
      %353 = memref.load %arg2[%c11_56] : memref<32xf32, #tpu.memory_space<smem>>
      %354 = vector.broadcast %353 : f32 to vector<32x128xf32>
      %355 = arith.addf %352, %354 : vector<32x128xf32>
      %cst_57 = arith.constant 0.000000e+00 : f32
      %356 = vector.broadcast %cst_57 : f32 to vector<32x128xf32>
      %357 = arith.maximumf %355, %356 : vector<32x128xf32>
      %c33_58 = arith.constant 33 : index
      %358 = memref.load %arg3[%c33_58] : memref<96xf32, #tpu.memory_space<smem>>
      %359 = vector.broadcast %358 : f32 to vector<32x128xf32>
      %360 = arith.mulf %357, %359 : vector<32x128xf32>
      %361 = arith.addf %333, %360 : vector<32x128xf32>
      %c34_59 = arith.constant 34 : index
      %362 = memref.load %arg3[%c34_59] : memref<96xf32, #tpu.memory_space<smem>>
      %363 = vector.broadcast %362 : f32 to vector<32x128xf32>
      %364 = arith.mulf %357, %363 : vector<32x128xf32>
      %365 = arith.addf %337, %364 : vector<32x128xf32>
      %c35_60 = arith.constant 35 : index
      %366 = memref.load %arg3[%c35_60] : memref<96xf32, #tpu.memory_space<smem>>
      %367 = vector.broadcast %366 : f32 to vector<32x128xf32>
      %368 = arith.mulf %357, %367 : vector<32x128xf32>
      %369 = arith.addf %341, %368 : vector<32x128xf32>
      %c12_61 = arith.constant 12 : index
      %370 = memref.load %arg1[%c12_61] : memref<96xf32, #tpu.memory_space<smem>>
      %371 = vector.broadcast %370 : f32 to vector<32x128xf32>
      %372 = arith.mulf %25#0, %371 : vector<32x128xf32>
      %c44 = arith.constant 44 : index
      %373 = memref.load %arg1[%c44] : memref<96xf32, #tpu.memory_space<smem>>
      %374 = vector.broadcast %373 : f32 to vector<32x128xf32>
      %375 = arith.mulf %25#1, %374 : vector<32x128xf32>
      %376 = arith.addf %372, %375 : vector<32x128xf32>
      %c76 = arith.constant 76 : index
      %377 = memref.load %arg1[%c76] : memref<96xf32, #tpu.memory_space<smem>>
      %378 = vector.broadcast %377 : f32 to vector<32x128xf32>
      %379 = arith.mulf %25#2, %378 : vector<32x128xf32>
      %380 = arith.addf %376, %379 : vector<32x128xf32>
      %c12_62 = arith.constant 12 : index
      %381 = memref.load %arg2[%c12_62] : memref<32xf32, #tpu.memory_space<smem>>
      %382 = vector.broadcast %381 : f32 to vector<32x128xf32>
      %383 = arith.addf %380, %382 : vector<32x128xf32>
      %cst_63 = arith.constant 0.000000e+00 : f32
      %384 = vector.broadcast %cst_63 : f32 to vector<32x128xf32>
      %385 = arith.maximumf %383, %384 : vector<32x128xf32>
      %c36_64 = arith.constant 36 : index
      %386 = memref.load %arg3[%c36_64] : memref<96xf32, #tpu.memory_space<smem>>
      %387 = vector.broadcast %386 : f32 to vector<32x128xf32>
      %388 = arith.mulf %385, %387 : vector<32x128xf32>
      %389 = arith.addf %361, %388 : vector<32x128xf32>
      %c37_65 = arith.constant 37 : index
      %390 = memref.load %arg3[%c37_65] : memref<96xf32, #tpu.memory_space<smem>>
      %391 = vector.broadcast %390 : f32 to vector<32x128xf32>
      %392 = arith.mulf %385, %391 : vector<32x128xf32>
      %393 = arith.addf %365, %392 : vector<32x128xf32>
      %c38_66 = arith.constant 38 : index
      %394 = memref.load %arg3[%c38_66] : memref<96xf32, #tpu.memory_space<smem>>
      %395 = vector.broadcast %394 : f32 to vector<32x128xf32>
      %396 = arith.mulf %385, %395 : vector<32x128xf32>
      %397 = arith.addf %369, %396 : vector<32x128xf32>
      %c13_67 = arith.constant 13 : index
      %398 = memref.load %arg1[%c13_67] : memref<96xf32, #tpu.memory_space<smem>>
      %399 = vector.broadcast %398 : f32 to vector<32x128xf32>
      %400 = arith.mulf %25#0, %399 : vector<32x128xf32>
      %c45 = arith.constant 45 : index
      %401 = memref.load %arg1[%c45] : memref<96xf32, #tpu.memory_space<smem>>
      %402 = vector.broadcast %401 : f32 to vector<32x128xf32>
      %403 = arith.mulf %25#1, %402 : vector<32x128xf32>
      %404 = arith.addf %400, %403 : vector<32x128xf32>
      %c77 = arith.constant 77 : index
      %405 = memref.load %arg1[%c77] : memref<96xf32, #tpu.memory_space<smem>>
      %406 = vector.broadcast %405 : f32 to vector<32x128xf32>
      %407 = arith.mulf %25#2, %406 : vector<32x128xf32>
      %408 = arith.addf %404, %407 : vector<32x128xf32>
      %c13_68 = arith.constant 13 : index
      %409 = memref.load %arg2[%c13_68] : memref<32xf32, #tpu.memory_space<smem>>
      %410 = vector.broadcast %409 : f32 to vector<32x128xf32>
      %411 = arith.addf %408, %410 : vector<32x128xf32>
      %cst_69 = arith.constant 0.000000e+00 : f32
      %412 = vector.broadcast %cst_69 : f32 to vector<32x128xf32>
      %413 = arith.maximumf %411, %412 : vector<32x128xf32>
      %c39_70 = arith.constant 39 : index
      %414 = memref.load %arg3[%c39_70] : memref<96xf32, #tpu.memory_space<smem>>
      %415 = vector.broadcast %414 : f32 to vector<32x128xf32>
      %416 = arith.mulf %413, %415 : vector<32x128xf32>
      %417 = arith.addf %389, %416 : vector<32x128xf32>
      %c40_71 = arith.constant 40 : index
      %418 = memref.load %arg3[%c40_71] : memref<96xf32, #tpu.memory_space<smem>>
      %419 = vector.broadcast %418 : f32 to vector<32x128xf32>
      %420 = arith.mulf %413, %419 : vector<32x128xf32>
      %421 = arith.addf %393, %420 : vector<32x128xf32>
      %c41_72 = arith.constant 41 : index
      %422 = memref.load %arg3[%c41_72] : memref<96xf32, #tpu.memory_space<smem>>
      %423 = vector.broadcast %422 : f32 to vector<32x128xf32>
      %424 = arith.mulf %413, %423 : vector<32x128xf32>
      %425 = arith.addf %397, %424 : vector<32x128xf32>
      %c14_73 = arith.constant 14 : index
      %426 = memref.load %arg1[%c14_73] : memref<96xf32, #tpu.memory_space<smem>>
      %427 = vector.broadcast %426 : f32 to vector<32x128xf32>
      %428 = arith.mulf %25#0, %427 : vector<32x128xf32>
      %c46 = arith.constant 46 : index
      %429 = memref.load %arg1[%c46] : memref<96xf32, #tpu.memory_space<smem>>
      %430 = vector.broadcast %429 : f32 to vector<32x128xf32>
      %431 = arith.mulf %25#1, %430 : vector<32x128xf32>
      %432 = arith.addf %428, %431 : vector<32x128xf32>
      %c78 = arith.constant 78 : index
      %433 = memref.load %arg1[%c78] : memref<96xf32, #tpu.memory_space<smem>>
      %434 = vector.broadcast %433 : f32 to vector<32x128xf32>
      %435 = arith.mulf %25#2, %434 : vector<32x128xf32>
      %436 = arith.addf %432, %435 : vector<32x128xf32>
      %c14_74 = arith.constant 14 : index
      %437 = memref.load %arg2[%c14_74] : memref<32xf32, #tpu.memory_space<smem>>
      %438 = vector.broadcast %437 : f32 to vector<32x128xf32>
      %439 = arith.addf %436, %438 : vector<32x128xf32>
      %cst_75 = arith.constant 0.000000e+00 : f32
      %440 = vector.broadcast %cst_75 : f32 to vector<32x128xf32>
      %441 = arith.maximumf %439, %440 : vector<32x128xf32>
      %c42_76 = arith.constant 42 : index
      %442 = memref.load %arg3[%c42_76] : memref<96xf32, #tpu.memory_space<smem>>
      %443 = vector.broadcast %442 : f32 to vector<32x128xf32>
      %444 = arith.mulf %441, %443 : vector<32x128xf32>
      %445 = arith.addf %417, %444 : vector<32x128xf32>
      %c43_77 = arith.constant 43 : index
      %446 = memref.load %arg3[%c43_77] : memref<96xf32, #tpu.memory_space<smem>>
      %447 = vector.broadcast %446 : f32 to vector<32x128xf32>
      %448 = arith.mulf %441, %447 : vector<32x128xf32>
      %449 = arith.addf %421, %448 : vector<32x128xf32>
      %c44_78 = arith.constant 44 : index
      %450 = memref.load %arg3[%c44_78] : memref<96xf32, #tpu.memory_space<smem>>
      %451 = vector.broadcast %450 : f32 to vector<32x128xf32>
      %452 = arith.mulf %441, %451 : vector<32x128xf32>
      %453 = arith.addf %425, %452 : vector<32x128xf32>
      %c15_79 = arith.constant 15 : index
      %454 = memref.load %arg1[%c15_79] : memref<96xf32, #tpu.memory_space<smem>>
      %455 = vector.broadcast %454 : f32 to vector<32x128xf32>
      %456 = arith.mulf %25#0, %455 : vector<32x128xf32>
      %c47 = arith.constant 47 : index
      %457 = memref.load %arg1[%c47] : memref<96xf32, #tpu.memory_space<smem>>
      %458 = vector.broadcast %457 : f32 to vector<32x128xf32>
      %459 = arith.mulf %25#1, %458 : vector<32x128xf32>
      %460 = arith.addf %456, %459 : vector<32x128xf32>
      %c79 = arith.constant 79 : index
      %461 = memref.load %arg1[%c79] : memref<96xf32, #tpu.memory_space<smem>>
      %462 = vector.broadcast %461 : f32 to vector<32x128xf32>
      %463 = arith.mulf %25#2, %462 : vector<32x128xf32>
      %464 = arith.addf %460, %463 : vector<32x128xf32>
      %c15_80 = arith.constant 15 : index
      %465 = memref.load %arg2[%c15_80] : memref<32xf32, #tpu.memory_space<smem>>
      %466 = vector.broadcast %465 : f32 to vector<32x128xf32>
      %467 = arith.addf %464, %466 : vector<32x128xf32>
      %cst_81 = arith.constant 0.000000e+00 : f32
      %468 = vector.broadcast %cst_81 : f32 to vector<32x128xf32>
      %469 = arith.maximumf %467, %468 : vector<32x128xf32>
      %c45_82 = arith.constant 45 : index
      %470 = memref.load %arg3[%c45_82] : memref<96xf32, #tpu.memory_space<smem>>
      %471 = vector.broadcast %470 : f32 to vector<32x128xf32>
      %472 = arith.mulf %469, %471 : vector<32x128xf32>
      %473 = arith.addf %445, %472 : vector<32x128xf32>
      %c46_83 = arith.constant 46 : index
      %474 = memref.load %arg3[%c46_83] : memref<96xf32, #tpu.memory_space<smem>>
      %475 = vector.broadcast %474 : f32 to vector<32x128xf32>
      %476 = arith.mulf %469, %475 : vector<32x128xf32>
      %477 = arith.addf %449, %476 : vector<32x128xf32>
      %c47_84 = arith.constant 47 : index
      %478 = memref.load %arg3[%c47_84] : memref<96xf32, #tpu.memory_space<smem>>
      %479 = vector.broadcast %478 : f32 to vector<32x128xf32>
      %480 = arith.mulf %469, %479 : vector<32x128xf32>
      %481 = arith.addf %453, %480 : vector<32x128xf32>
      %c16_85 = arith.constant 16 : index
      %482 = memref.load %arg1[%c16_85] : memref<96xf32, #tpu.memory_space<smem>>
      %483 = vector.broadcast %482 : f32 to vector<32x128xf32>
      %484 = arith.mulf %25#0, %483 : vector<32x128xf32>
      %c48 = arith.constant 48 : index
      %485 = memref.load %arg1[%c48] : memref<96xf32, #tpu.memory_space<smem>>
      %486 = vector.broadcast %485 : f32 to vector<32x128xf32>
      %487 = arith.mulf %25#1, %486 : vector<32x128xf32>
      %488 = arith.addf %484, %487 : vector<32x128xf32>
      %c80 = arith.constant 80 : index
      %489 = memref.load %arg1[%c80] : memref<96xf32, #tpu.memory_space<smem>>
      %490 = vector.broadcast %489 : f32 to vector<32x128xf32>
      %491 = arith.mulf %25#2, %490 : vector<32x128xf32>
      %492 = arith.addf %488, %491 : vector<32x128xf32>
      %c16_86 = arith.constant 16 : index
      %493 = memref.load %arg2[%c16_86] : memref<32xf32, #tpu.memory_space<smem>>
      %494 = vector.broadcast %493 : f32 to vector<32x128xf32>
      %495 = arith.addf %492, %494 : vector<32x128xf32>
      %cst_87 = arith.constant 0.000000e+00 : f32
      %496 = vector.broadcast %cst_87 : f32 to vector<32x128xf32>
      %497 = arith.maximumf %495, %496 : vector<32x128xf32>
      %c48_88 = arith.constant 48 : index
      %498 = memref.load %arg3[%c48_88] : memref<96xf32, #tpu.memory_space<smem>>
      %499 = vector.broadcast %498 : f32 to vector<32x128xf32>
      %500 = arith.mulf %497, %499 : vector<32x128xf32>
      %501 = arith.addf %473, %500 : vector<32x128xf32>
      %c49 = arith.constant 49 : index
      %502 = memref.load %arg3[%c49] : memref<96xf32, #tpu.memory_space<smem>>
      %503 = vector.broadcast %502 : f32 to vector<32x128xf32>
      %504 = arith.mulf %497, %503 : vector<32x128xf32>
      %505 = arith.addf %477, %504 : vector<32x128xf32>
      %c50 = arith.constant 50 : index
      %506 = memref.load %arg3[%c50] : memref<96xf32, #tpu.memory_space<smem>>
      %507 = vector.broadcast %506 : f32 to vector<32x128xf32>
      %508 = arith.mulf %497, %507 : vector<32x128xf32>
      %509 = arith.addf %481, %508 : vector<32x128xf32>
      %c17_89 = arith.constant 17 : index
      %510 = memref.load %arg1[%c17_89] : memref<96xf32, #tpu.memory_space<smem>>
      %511 = vector.broadcast %510 : f32 to vector<32x128xf32>
      %512 = arith.mulf %25#0, %511 : vector<32x128xf32>
      %c49_90 = arith.constant 49 : index
      %513 = memref.load %arg1[%c49_90] : memref<96xf32, #tpu.memory_space<smem>>
      %514 = vector.broadcast %513 : f32 to vector<32x128xf32>
      %515 = arith.mulf %25#1, %514 : vector<32x128xf32>
      %516 = arith.addf %512, %515 : vector<32x128xf32>
      %c81 = arith.constant 81 : index
      %517 = memref.load %arg1[%c81] : memref<96xf32, #tpu.memory_space<smem>>
      %518 = vector.broadcast %517 : f32 to vector<32x128xf32>
      %519 = arith.mulf %25#2, %518 : vector<32x128xf32>
      %520 = arith.addf %516, %519 : vector<32x128xf32>
      %c17_91 = arith.constant 17 : index
      %521 = memref.load %arg2[%c17_91] : memref<32xf32, #tpu.memory_space<smem>>
      %522 = vector.broadcast %521 : f32 to vector<32x128xf32>
      %523 = arith.addf %520, %522 : vector<32x128xf32>
      %cst_92 = arith.constant 0.000000e+00 : f32
      %524 = vector.broadcast %cst_92 : f32 to vector<32x128xf32>
      %525 = arith.maximumf %523, %524 : vector<32x128xf32>
      %c51 = arith.constant 51 : index
      %526 = memref.load %arg3[%c51] : memref<96xf32, #tpu.memory_space<smem>>
      %527 = vector.broadcast %526 : f32 to vector<32x128xf32>
      %528 = arith.mulf %525, %527 : vector<32x128xf32>
      %529 = arith.addf %501, %528 : vector<32x128xf32>
      %c52 = arith.constant 52 : index
      %530 = memref.load %arg3[%c52] : memref<96xf32, #tpu.memory_space<smem>>
      %531 = vector.broadcast %530 : f32 to vector<32x128xf32>
      %532 = arith.mulf %525, %531 : vector<32x128xf32>
      %533 = arith.addf %505, %532 : vector<32x128xf32>
      %c53 = arith.constant 53 : index
      %534 = memref.load %arg3[%c53] : memref<96xf32, #tpu.memory_space<smem>>
      %535 = vector.broadcast %534 : f32 to vector<32x128xf32>
      %536 = arith.mulf %525, %535 : vector<32x128xf32>
      %537 = arith.addf %509, %536 : vector<32x128xf32>
      %c18_93 = arith.constant 18 : index
      %538 = memref.load %arg1[%c18_93] : memref<96xf32, #tpu.memory_space<smem>>
      %539 = vector.broadcast %538 : f32 to vector<32x128xf32>
      %540 = arith.mulf %25#0, %539 : vector<32x128xf32>
      %c50_94 = arith.constant 50 : index
      %541 = memref.load %arg1[%c50_94] : memref<96xf32, #tpu.memory_space<smem>>
      %542 = vector.broadcast %541 : f32 to vector<32x128xf32>
      %543 = arith.mulf %25#1, %542 : vector<32x128xf32>
      %544 = arith.addf %540, %543 : vector<32x128xf32>
      %c82 = arith.constant 82 : index
      %545 = memref.load %arg1[%c82] : memref<96xf32, #tpu.memory_space<smem>>
      %546 = vector.broadcast %545 : f32 to vector<32x128xf32>
      %547 = arith.mulf %25#2, %546 : vector<32x128xf32>
      %548 = arith.addf %544, %547 : vector<32x128xf32>
      %c18_95 = arith.constant 18 : index
      %549 = memref.load %arg2[%c18_95] : memref<32xf32, #tpu.memory_space<smem>>
      %550 = vector.broadcast %549 : f32 to vector<32x128xf32>
      %551 = arith.addf %548, %550 : vector<32x128xf32>
      %cst_96 = arith.constant 0.000000e+00 : f32
      %552 = vector.broadcast %cst_96 : f32 to vector<32x128xf32>
      %553 = arith.maximumf %551, %552 : vector<32x128xf32>
      %c54 = arith.constant 54 : index
      %554 = memref.load %arg3[%c54] : memref<96xf32, #tpu.memory_space<smem>>
      %555 = vector.broadcast %554 : f32 to vector<32x128xf32>
      %556 = arith.mulf %553, %555 : vector<32x128xf32>
      %557 = arith.addf %529, %556 : vector<32x128xf32>
      %c55 = arith.constant 55 : index
      %558 = memref.load %arg3[%c55] : memref<96xf32, #tpu.memory_space<smem>>
      %559 = vector.broadcast %558 : f32 to vector<32x128xf32>
      %560 = arith.mulf %553, %559 : vector<32x128xf32>
      %561 = arith.addf %533, %560 : vector<32x128xf32>
      %c56 = arith.constant 56 : index
      %562 = memref.load %arg3[%c56] : memref<96xf32, #tpu.memory_space<smem>>
      %563 = vector.broadcast %562 : f32 to vector<32x128xf32>
      %564 = arith.mulf %553, %563 : vector<32x128xf32>
      %565 = arith.addf %537, %564 : vector<32x128xf32>
      %c19_97 = arith.constant 19 : index
      %566 = memref.load %arg1[%c19_97] : memref<96xf32, #tpu.memory_space<smem>>
      %567 = vector.broadcast %566 : f32 to vector<32x128xf32>
      %568 = arith.mulf %25#0, %567 : vector<32x128xf32>
      %c51_98 = arith.constant 51 : index
      %569 = memref.load %arg1[%c51_98] : memref<96xf32, #tpu.memory_space<smem>>
      %570 = vector.broadcast %569 : f32 to vector<32x128xf32>
      %571 = arith.mulf %25#1, %570 : vector<32x128xf32>
      %572 = arith.addf %568, %571 : vector<32x128xf32>
      %c83 = arith.constant 83 : index
      %573 = memref.load %arg1[%c83] : memref<96xf32, #tpu.memory_space<smem>>
      %574 = vector.broadcast %573 : f32 to vector<32x128xf32>
      %575 = arith.mulf %25#2, %574 : vector<32x128xf32>
      %576 = arith.addf %572, %575 : vector<32x128xf32>
      %c19_99 = arith.constant 19 : index
      %577 = memref.load %arg2[%c19_99] : memref<32xf32, #tpu.memory_space<smem>>
      %578 = vector.broadcast %577 : f32 to vector<32x128xf32>
      %579 = arith.addf %576, %578 : vector<32x128xf32>
      %cst_100 = arith.constant 0.000000e+00 : f32
      %580 = vector.broadcast %cst_100 : f32 to vector<32x128xf32>
      %581 = arith.maximumf %579, %580 : vector<32x128xf32>
      %c57 = arith.constant 57 : index
      %582 = memref.load %arg3[%c57] : memref<96xf32, #tpu.memory_space<smem>>
      %583 = vector.broadcast %582 : f32 to vector<32x128xf32>
      %584 = arith.mulf %581, %583 : vector<32x128xf32>
      %585 = arith.addf %557, %584 : vector<32x128xf32>
      %c58 = arith.constant 58 : index
      %586 = memref.load %arg3[%c58] : memref<96xf32, #tpu.memory_space<smem>>
      %587 = vector.broadcast %586 : f32 to vector<32x128xf32>
      %588 = arith.mulf %581, %587 : vector<32x128xf32>
      %589 = arith.addf %561, %588 : vector<32x128xf32>
      %c59 = arith.constant 59 : index
      %590 = memref.load %arg3[%c59] : memref<96xf32, #tpu.memory_space<smem>>
      %591 = vector.broadcast %590 : f32 to vector<32x128xf32>
      %592 = arith.mulf %581, %591 : vector<32x128xf32>
      %593 = arith.addf %565, %592 : vector<32x128xf32>
      %c20_101 = arith.constant 20 : index
      %594 = memref.load %arg1[%c20_101] : memref<96xf32, #tpu.memory_space<smem>>
      %595 = vector.broadcast %594 : f32 to vector<32x128xf32>
      %596 = arith.mulf %25#0, %595 : vector<32x128xf32>
      %c52_102 = arith.constant 52 : index
      %597 = memref.load %arg1[%c52_102] : memref<96xf32, #tpu.memory_space<smem>>
      %598 = vector.broadcast %597 : f32 to vector<32x128xf32>
      %599 = arith.mulf %25#1, %598 : vector<32x128xf32>
      %600 = arith.addf %596, %599 : vector<32x128xf32>
      %c84 = arith.constant 84 : index
      %601 = memref.load %arg1[%c84] : memref<96xf32, #tpu.memory_space<smem>>
      %602 = vector.broadcast %601 : f32 to vector<32x128xf32>
      %603 = arith.mulf %25#2, %602 : vector<32x128xf32>
      %604 = arith.addf %600, %603 : vector<32x128xf32>
      %c20_103 = arith.constant 20 : index
      %605 = memref.load %arg2[%c20_103] : memref<32xf32, #tpu.memory_space<smem>>
      %606 = vector.broadcast %605 : f32 to vector<32x128xf32>
      %607 = arith.addf %604, %606 : vector<32x128xf32>
      %cst_104 = arith.constant 0.000000e+00 : f32
      %608 = vector.broadcast %cst_104 : f32 to vector<32x128xf32>
      %609 = arith.maximumf %607, %608 : vector<32x128xf32>
      %c60 = arith.constant 60 : index
      %610 = memref.load %arg3[%c60] : memref<96xf32, #tpu.memory_space<smem>>
      %611 = vector.broadcast %610 : f32 to vector<32x128xf32>
      %612 = arith.mulf %609, %611 : vector<32x128xf32>
      %613 = arith.addf %585, %612 : vector<32x128xf32>
      %c61 = arith.constant 61 : index
      %614 = memref.load %arg3[%c61] : memref<96xf32, #tpu.memory_space<smem>>
      %615 = vector.broadcast %614 : f32 to vector<32x128xf32>
      %616 = arith.mulf %609, %615 : vector<32x128xf32>
      %617 = arith.addf %589, %616 : vector<32x128xf32>
      %c62 = arith.constant 62 : index
      %618 = memref.load %arg3[%c62] : memref<96xf32, #tpu.memory_space<smem>>
      %619 = vector.broadcast %618 : f32 to vector<32x128xf32>
      %620 = arith.mulf %609, %619 : vector<32x128xf32>
      %621 = arith.addf %593, %620 : vector<32x128xf32>
      %c21_105 = arith.constant 21 : index
      %622 = memref.load %arg1[%c21_105] : memref<96xf32, #tpu.memory_space<smem>>
      %623 = vector.broadcast %622 : f32 to vector<32x128xf32>
      %624 = arith.mulf %25#0, %623 : vector<32x128xf32>
      %c53_106 = arith.constant 53 : index
      %625 = memref.load %arg1[%c53_106] : memref<96xf32, #tpu.memory_space<smem>>
      %626 = vector.broadcast %625 : f32 to vector<32x128xf32>
      %627 = arith.mulf %25#1, %626 : vector<32x128xf32>
      %628 = arith.addf %624, %627 : vector<32x128xf32>
      %c85 = arith.constant 85 : index
      %629 = memref.load %arg1[%c85] : memref<96xf32, #tpu.memory_space<smem>>
      %630 = vector.broadcast %629 : f32 to vector<32x128xf32>
      %631 = arith.mulf %25#2, %630 : vector<32x128xf32>
      %632 = arith.addf %628, %631 : vector<32x128xf32>
      %c21_107 = arith.constant 21 : index
      %633 = memref.load %arg2[%c21_107] : memref<32xf32, #tpu.memory_space<smem>>
      %634 = vector.broadcast %633 : f32 to vector<32x128xf32>
      %635 = arith.addf %632, %634 : vector<32x128xf32>
      %cst_108 = arith.constant 0.000000e+00 : f32
      %636 = vector.broadcast %cst_108 : f32 to vector<32x128xf32>
      %637 = arith.maximumf %635, %636 : vector<32x128xf32>
      %c63 = arith.constant 63 : index
      %638 = memref.load %arg3[%c63] : memref<96xf32, #tpu.memory_space<smem>>
      %639 = vector.broadcast %638 : f32 to vector<32x128xf32>
      %640 = arith.mulf %637, %639 : vector<32x128xf32>
      %641 = arith.addf %613, %640 : vector<32x128xf32>
      %c64_109 = arith.constant 64 : index
      %642 = memref.load %arg3[%c64_109] : memref<96xf32, #tpu.memory_space<smem>>
      %643 = vector.broadcast %642 : f32 to vector<32x128xf32>
      %644 = arith.mulf %637, %643 : vector<32x128xf32>
      %645 = arith.addf %617, %644 : vector<32x128xf32>
      %c65_110 = arith.constant 65 : index
      %646 = memref.load %arg3[%c65_110] : memref<96xf32, #tpu.memory_space<smem>>
      %647 = vector.broadcast %646 : f32 to vector<32x128xf32>
      %648 = arith.mulf %637, %647 : vector<32x128xf32>
      %649 = arith.addf %621, %648 : vector<32x128xf32>
      %c22_111 = arith.constant 22 : index
      %650 = memref.load %arg1[%c22_111] : memref<96xf32, #tpu.memory_space<smem>>
      %651 = vector.broadcast %650 : f32 to vector<32x128xf32>
      %652 = arith.mulf %25#0, %651 : vector<32x128xf32>
      %c54_112 = arith.constant 54 : index
      %653 = memref.load %arg1[%c54_112] : memref<96xf32, #tpu.memory_space<smem>>
      %654 = vector.broadcast %653 : f32 to vector<32x128xf32>
      %655 = arith.mulf %25#1, %654 : vector<32x128xf32>
      %656 = arith.addf %652, %655 : vector<32x128xf32>
      %c86 = arith.constant 86 : index
      %657 = memref.load %arg1[%c86] : memref<96xf32, #tpu.memory_space<smem>>
      %658 = vector.broadcast %657 : f32 to vector<32x128xf32>
      %659 = arith.mulf %25#2, %658 : vector<32x128xf32>
      %660 = arith.addf %656, %659 : vector<32x128xf32>
      %c22_113 = arith.constant 22 : index
      %661 = memref.load %arg2[%c22_113] : memref<32xf32, #tpu.memory_space<smem>>
      %662 = vector.broadcast %661 : f32 to vector<32x128xf32>
      %663 = arith.addf %660, %662 : vector<32x128xf32>
      %cst_114 = arith.constant 0.000000e+00 : f32
      %664 = vector.broadcast %cst_114 : f32 to vector<32x128xf32>
      %665 = arith.maximumf %663, %664 : vector<32x128xf32>
      %c66_115 = arith.constant 66 : index
      %666 = memref.load %arg3[%c66_115] : memref<96xf32, #tpu.memory_space<smem>>
      %667 = vector.broadcast %666 : f32 to vector<32x128xf32>
      %668 = arith.mulf %665, %667 : vector<32x128xf32>
      %669 = arith.addf %641, %668 : vector<32x128xf32>
      %c67_116 = arith.constant 67 : index
      %670 = memref.load %arg3[%c67_116] : memref<96xf32, #tpu.memory_space<smem>>
      %671 = vector.broadcast %670 : f32 to vector<32x128xf32>
      %672 = arith.mulf %665, %671 : vector<32x128xf32>
      %673 = arith.addf %645, %672 : vector<32x128xf32>
      %c68_117 = arith.constant 68 : index
      %674 = memref.load %arg3[%c68_117] : memref<96xf32, #tpu.memory_space<smem>>
      %675 = vector.broadcast %674 : f32 to vector<32x128xf32>
      %676 = arith.mulf %665, %675 : vector<32x128xf32>
      %677 = arith.addf %649, %676 : vector<32x128xf32>
      %c23_118 = arith.constant 23 : index
      %678 = memref.load %arg1[%c23_118] : memref<96xf32, #tpu.memory_space<smem>>
      %679 = vector.broadcast %678 : f32 to vector<32x128xf32>
      %680 = arith.mulf %25#0, %679 : vector<32x128xf32>
      %c55_119 = arith.constant 55 : index
      %681 = memref.load %arg1[%c55_119] : memref<96xf32, #tpu.memory_space<smem>>
      %682 = vector.broadcast %681 : f32 to vector<32x128xf32>
      %683 = arith.mulf %25#1, %682 : vector<32x128xf32>
      %684 = arith.addf %680, %683 : vector<32x128xf32>
      %c87 = arith.constant 87 : index
      %685 = memref.load %arg1[%c87] : memref<96xf32, #tpu.memory_space<smem>>
      %686 = vector.broadcast %685 : f32 to vector<32x128xf32>
      %687 = arith.mulf %25#2, %686 : vector<32x128xf32>
      %688 = arith.addf %684, %687 : vector<32x128xf32>
      %c23_120 = arith.constant 23 : index
      %689 = memref.load %arg2[%c23_120] : memref<32xf32, #tpu.memory_space<smem>>
      %690 = vector.broadcast %689 : f32 to vector<32x128xf32>
      %691 = arith.addf %688, %690 : vector<32x128xf32>
      %cst_121 = arith.constant 0.000000e+00 : f32
      %692 = vector.broadcast %cst_121 : f32 to vector<32x128xf32>
      %693 = arith.maximumf %691, %692 : vector<32x128xf32>
      %c69_122 = arith.constant 69 : index
      %694 = memref.load %arg3[%c69_122] : memref<96xf32, #tpu.memory_space<smem>>
      %695 = vector.broadcast %694 : f32 to vector<32x128xf32>
      %696 = arith.mulf %693, %695 : vector<32x128xf32>
      %697 = arith.addf %669, %696 : vector<32x128xf32>
      %c70_123 = arith.constant 70 : index
      %698 = memref.load %arg3[%c70_123] : memref<96xf32, #tpu.memory_space<smem>>
      %699 = vector.broadcast %698 : f32 to vector<32x128xf32>
      %700 = arith.mulf %693, %699 : vector<32x128xf32>
      %701 = arith.addf %673, %700 : vector<32x128xf32>
      %c71_124 = arith.constant 71 : index
      %702 = memref.load %arg3[%c71_124] : memref<96xf32, #tpu.memory_space<smem>>
      %703 = vector.broadcast %702 : f32 to vector<32x128xf32>
      %704 = arith.mulf %693, %703 : vector<32x128xf32>
      %705 = arith.addf %677, %704 : vector<32x128xf32>
      %c24_125 = arith.constant 24 : index
      %706 = memref.load %arg1[%c24_125] : memref<96xf32, #tpu.memory_space<smem>>
      %707 = vector.broadcast %706 : f32 to vector<32x128xf32>
      %708 = arith.mulf %25#0, %707 : vector<32x128xf32>
      %c56_126 = arith.constant 56 : index
      %709 = memref.load %arg1[%c56_126] : memref<96xf32, #tpu.memory_space<smem>>
      %710 = vector.broadcast %709 : f32 to vector<32x128xf32>
      %711 = arith.mulf %25#1, %710 : vector<32x128xf32>
      %712 = arith.addf %708, %711 : vector<32x128xf32>
      %c88 = arith.constant 88 : index
      %713 = memref.load %arg1[%c88] : memref<96xf32, #tpu.memory_space<smem>>
      %714 = vector.broadcast %713 : f32 to vector<32x128xf32>
      %715 = arith.mulf %25#2, %714 : vector<32x128xf32>
      %716 = arith.addf %712, %715 : vector<32x128xf32>
      %c24_127 = arith.constant 24 : index
      %717 = memref.load %arg2[%c24_127] : memref<32xf32, #tpu.memory_space<smem>>
      %718 = vector.broadcast %717 : f32 to vector<32x128xf32>
      %719 = arith.addf %716, %718 : vector<32x128xf32>
      %cst_128 = arith.constant 0.000000e+00 : f32
      %720 = vector.broadcast %cst_128 : f32 to vector<32x128xf32>
      %721 = arith.maximumf %719, %720 : vector<32x128xf32>
      %c72_129 = arith.constant 72 : index
      %722 = memref.load %arg3[%c72_129] : memref<96xf32, #tpu.memory_space<smem>>
      %723 = vector.broadcast %722 : f32 to vector<32x128xf32>
      %724 = arith.mulf %721, %723 : vector<32x128xf32>
      %725 = arith.addf %697, %724 : vector<32x128xf32>
      %c73_130 = arith.constant 73 : index
      %726 = memref.load %arg3[%c73_130] : memref<96xf32, #tpu.memory_space<smem>>
      %727 = vector.broadcast %726 : f32 to vector<32x128xf32>
      %728 = arith.mulf %721, %727 : vector<32x128xf32>
      %729 = arith.addf %701, %728 : vector<32x128xf32>
      %c74_131 = arith.constant 74 : index
      %730 = memref.load %arg3[%c74_131] : memref<96xf32, #tpu.memory_space<smem>>
      %731 = vector.broadcast %730 : f32 to vector<32x128xf32>
      %732 = arith.mulf %721, %731 : vector<32x128xf32>
      %733 = arith.addf %705, %732 : vector<32x128xf32>
      %c25_132 = arith.constant 25 : index
      %734 = memref.load %arg1[%c25_132] : memref<96xf32, #tpu.memory_space<smem>>
      %735 = vector.broadcast %734 : f32 to vector<32x128xf32>
      %736 = arith.mulf %25#0, %735 : vector<32x128xf32>
      %c57_133 = arith.constant 57 : index
      %737 = memref.load %arg1[%c57_133] : memref<96xf32, #tpu.memory_space<smem>>
      %738 = vector.broadcast %737 : f32 to vector<32x128xf32>
      %739 = arith.mulf %25#1, %738 : vector<32x128xf32>
      %740 = arith.addf %736, %739 : vector<32x128xf32>
      %c89 = arith.constant 89 : index
      %741 = memref.load %arg1[%c89] : memref<96xf32, #tpu.memory_space<smem>>
      %742 = vector.broadcast %741 : f32 to vector<32x128xf32>
      %743 = arith.mulf %25#2, %742 : vector<32x128xf32>
      %744 = arith.addf %740, %743 : vector<32x128xf32>
      %c25_134 = arith.constant 25 : index
      %745 = memref.load %arg2[%c25_134] : memref<32xf32, #tpu.memory_space<smem>>
      %746 = vector.broadcast %745 : f32 to vector<32x128xf32>
      %747 = arith.addf %744, %746 : vector<32x128xf32>
      %cst_135 = arith.constant 0.000000e+00 : f32
      %748 = vector.broadcast %cst_135 : f32 to vector<32x128xf32>
      %749 = arith.maximumf %747, %748 : vector<32x128xf32>
      %c75_136 = arith.constant 75 : index
      %750 = memref.load %arg3[%c75_136] : memref<96xf32, #tpu.memory_space<smem>>
      %751 = vector.broadcast %750 : f32 to vector<32x128xf32>
      %752 = arith.mulf %749, %751 : vector<32x128xf32>
      %753 = arith.addf %725, %752 : vector<32x128xf32>
      %c76_137 = arith.constant 76 : index
      %754 = memref.load %arg3[%c76_137] : memref<96xf32, #tpu.memory_space<smem>>
      %755 = vector.broadcast %754 : f32 to vector<32x128xf32>
      %756 = arith.mulf %749, %755 : vector<32x128xf32>
      %757 = arith.addf %729, %756 : vector<32x128xf32>
      %c77_138 = arith.constant 77 : index
      %758 = memref.load %arg3[%c77_138] : memref<96xf32, #tpu.memory_space<smem>>
      %759 = vector.broadcast %758 : f32 to vector<32x128xf32>
      %760 = arith.mulf %749, %759 : vector<32x128xf32>
      %761 = arith.addf %733, %760 : vector<32x128xf32>
      %c26_139 = arith.constant 26 : index
      %762 = memref.load %arg1[%c26_139] : memref<96xf32, #tpu.memory_space<smem>>
      %763 = vector.broadcast %762 : f32 to vector<32x128xf32>
      %764 = arith.mulf %25#0, %763 : vector<32x128xf32>
      %c58_140 = arith.constant 58 : index
      %765 = memref.load %arg1[%c58_140] : memref<96xf32, #tpu.memory_space<smem>>
      %766 = vector.broadcast %765 : f32 to vector<32x128xf32>
      %767 = arith.mulf %25#1, %766 : vector<32x128xf32>
      %768 = arith.addf %764, %767 : vector<32x128xf32>
      %c90 = arith.constant 90 : index
      %769 = memref.load %arg1[%c90] : memref<96xf32, #tpu.memory_space<smem>>
      %770 = vector.broadcast %769 : f32 to vector<32x128xf32>
      %771 = arith.mulf %25#2, %770 : vector<32x128xf32>
      %772 = arith.addf %768, %771 : vector<32x128xf32>
      %c26_141 = arith.constant 26 : index
      %773 = memref.load %arg2[%c26_141] : memref<32xf32, #tpu.memory_space<smem>>
      %774 = vector.broadcast %773 : f32 to vector<32x128xf32>
      %775 = arith.addf %772, %774 : vector<32x128xf32>
      %cst_142 = arith.constant 0.000000e+00 : f32
      %776 = vector.broadcast %cst_142 : f32 to vector<32x128xf32>
      %777 = arith.maximumf %775, %776 : vector<32x128xf32>
      %c78_143 = arith.constant 78 : index
      %778 = memref.load %arg3[%c78_143] : memref<96xf32, #tpu.memory_space<smem>>
      %779 = vector.broadcast %778 : f32 to vector<32x128xf32>
      %780 = arith.mulf %777, %779 : vector<32x128xf32>
      %781 = arith.addf %753, %780 : vector<32x128xf32>
      %c79_144 = arith.constant 79 : index
      %782 = memref.load %arg3[%c79_144] : memref<96xf32, #tpu.memory_space<smem>>
      %783 = vector.broadcast %782 : f32 to vector<32x128xf32>
      %784 = arith.mulf %777, %783 : vector<32x128xf32>
      %785 = arith.addf %757, %784 : vector<32x128xf32>
      %c80_145 = arith.constant 80 : index
      %786 = memref.load %arg3[%c80_145] : memref<96xf32, #tpu.memory_space<smem>>
      %787 = vector.broadcast %786 : f32 to vector<32x128xf32>
      %788 = arith.mulf %777, %787 : vector<32x128xf32>
      %789 = arith.addf %761, %788 : vector<32x128xf32>
      %c27_146 = arith.constant 27 : index
      %790 = memref.load %arg1[%c27_146] : memref<96xf32, #tpu.memory_space<smem>>
      %791 = vector.broadcast %790 : f32 to vector<32x128xf32>
      %792 = arith.mulf %25#0, %791 : vector<32x128xf32>
      %c59_147 = arith.constant 59 : index
      %793 = memref.load %arg1[%c59_147] : memref<96xf32, #tpu.memory_space<smem>>
      %794 = vector.broadcast %793 : f32 to vector<32x128xf32>
      %795 = arith.mulf %25#1, %794 : vector<32x128xf32>
      %796 = arith.addf %792, %795 : vector<32x128xf32>
      %c91 = arith.constant 91 : index
      %797 = memref.load %arg1[%c91] : memref<96xf32, #tpu.memory_space<smem>>
      %798 = vector.broadcast %797 : f32 to vector<32x128xf32>
      %799 = arith.mulf %25#2, %798 : vector<32x128xf32>
      %800 = arith.addf %796, %799 : vector<32x128xf32>
      %c27_148 = arith.constant 27 : index
      %801 = memref.load %arg2[%c27_148] : memref<32xf32, #tpu.memory_space<smem>>
      %802 = vector.broadcast %801 : f32 to vector<32x128xf32>
      %803 = arith.addf %800, %802 : vector<32x128xf32>
      %cst_149 = arith.constant 0.000000e+00 : f32
      %804 = vector.broadcast %cst_149 : f32 to vector<32x128xf32>
      %805 = arith.maximumf %803, %804 : vector<32x128xf32>
      %c81_150 = arith.constant 81 : index
      %806 = memref.load %arg3[%c81_150] : memref<96xf32, #tpu.memory_space<smem>>
      %807 = vector.broadcast %806 : f32 to vector<32x128xf32>
      %808 = arith.mulf %805, %807 : vector<32x128xf32>
      %809 = arith.addf %781, %808 : vector<32x128xf32>
      %c82_151 = arith.constant 82 : index
      %810 = memref.load %arg3[%c82_151] : memref<96xf32, #tpu.memory_space<smem>>
      %811 = vector.broadcast %810 : f32 to vector<32x128xf32>
      %812 = arith.mulf %805, %811 : vector<32x128xf32>
      %813 = arith.addf %785, %812 : vector<32x128xf32>
      %c83_152 = arith.constant 83 : index
      %814 = memref.load %arg3[%c83_152] : memref<96xf32, #tpu.memory_space<smem>>
      %815 = vector.broadcast %814 : f32 to vector<32x128xf32>
      %816 = arith.mulf %805, %815 : vector<32x128xf32>
      %817 = arith.addf %789, %816 : vector<32x128xf32>
      %c28_153 = arith.constant 28 : index
      %818 = memref.load %arg1[%c28_153] : memref<96xf32, #tpu.memory_space<smem>>
      %819 = vector.broadcast %818 : f32 to vector<32x128xf32>
      %820 = arith.mulf %25#0, %819 : vector<32x128xf32>
      %c60_154 = arith.constant 60 : index
      %821 = memref.load %arg1[%c60_154] : memref<96xf32, #tpu.memory_space<smem>>
      %822 = vector.broadcast %821 : f32 to vector<32x128xf32>
      %823 = arith.mulf %25#1, %822 : vector<32x128xf32>
      %824 = arith.addf %820, %823 : vector<32x128xf32>
      %c92 = arith.constant 92 : index
      %825 = memref.load %arg1[%c92] : memref<96xf32, #tpu.memory_space<smem>>
      %826 = vector.broadcast %825 : f32 to vector<32x128xf32>
      %827 = arith.mulf %25#2, %826 : vector<32x128xf32>
      %828 = arith.addf %824, %827 : vector<32x128xf32>
      %c28_155 = arith.constant 28 : index
      %829 = memref.load %arg2[%c28_155] : memref<32xf32, #tpu.memory_space<smem>>
      %830 = vector.broadcast %829 : f32 to vector<32x128xf32>
      %831 = arith.addf %828, %830 : vector<32x128xf32>
      %cst_156 = arith.constant 0.000000e+00 : f32
      %832 = vector.broadcast %cst_156 : f32 to vector<32x128xf32>
      %833 = arith.maximumf %831, %832 : vector<32x128xf32>
      %c84_157 = arith.constant 84 : index
      %834 = memref.load %arg3[%c84_157] : memref<96xf32, #tpu.memory_space<smem>>
      %835 = vector.broadcast %834 : f32 to vector<32x128xf32>
      %836 = arith.mulf %833, %835 : vector<32x128xf32>
      %837 = arith.addf %809, %836 : vector<32x128xf32>
      %c85_158 = arith.constant 85 : index
      %838 = memref.load %arg3[%c85_158] : memref<96xf32, #tpu.memory_space<smem>>
      %839 = vector.broadcast %838 : f32 to vector<32x128xf32>
      %840 = arith.mulf %833, %839 : vector<32x128xf32>
      %841 = arith.addf %813, %840 : vector<32x128xf32>
      %c86_159 = arith.constant 86 : index
      %842 = memref.load %arg3[%c86_159] : memref<96xf32, #tpu.memory_space<smem>>
      %843 = vector.broadcast %842 : f32 to vector<32x128xf32>
      %844 = arith.mulf %833, %843 : vector<32x128xf32>
      %845 = arith.addf %817, %844 : vector<32x128xf32>
      %c29_160 = arith.constant 29 : index
      %846 = memref.load %arg1[%c29_160] : memref<96xf32, #tpu.memory_space<smem>>
      %847 = vector.broadcast %846 : f32 to vector<32x128xf32>
      %848 = arith.mulf %25#0, %847 : vector<32x128xf32>
      %c61_161 = arith.constant 61 : index
      %849 = memref.load %arg1[%c61_161] : memref<96xf32, #tpu.memory_space<smem>>
      %850 = vector.broadcast %849 : f32 to vector<32x128xf32>
      %851 = arith.mulf %25#1, %850 : vector<32x128xf32>
      %852 = arith.addf %848, %851 : vector<32x128xf32>
      %c93 = arith.constant 93 : index
      %853 = memref.load %arg1[%c93] : memref<96xf32, #tpu.memory_space<smem>>
      %854 = vector.broadcast %853 : f32 to vector<32x128xf32>
      %855 = arith.mulf %25#2, %854 : vector<32x128xf32>
      %856 = arith.addf %852, %855 : vector<32x128xf32>
      %c29_162 = arith.constant 29 : index
      %857 = memref.load %arg2[%c29_162] : memref<32xf32, #tpu.memory_space<smem>>
      %858 = vector.broadcast %857 : f32 to vector<32x128xf32>
      %859 = arith.addf %856, %858 : vector<32x128xf32>
      %cst_163 = arith.constant 0.000000e+00 : f32
      %860 = vector.broadcast %cst_163 : f32 to vector<32x128xf32>
      %861 = arith.maximumf %859, %860 : vector<32x128xf32>
      %c87_164 = arith.constant 87 : index
      %862 = memref.load %arg3[%c87_164] : memref<96xf32, #tpu.memory_space<smem>>
      %863 = vector.broadcast %862 : f32 to vector<32x128xf32>
      %864 = arith.mulf %861, %863 : vector<32x128xf32>
      %865 = arith.addf %837, %864 : vector<32x128xf32>
      %c88_165 = arith.constant 88 : index
      %866 = memref.load %arg3[%c88_165] : memref<96xf32, #tpu.memory_space<smem>>
      %867 = vector.broadcast %866 : f32 to vector<32x128xf32>
      %868 = arith.mulf %861, %867 : vector<32x128xf32>
      %869 = arith.addf %841, %868 : vector<32x128xf32>
      %c89_166 = arith.constant 89 : index
      %870 = memref.load %arg3[%c89_166] : memref<96xf32, #tpu.memory_space<smem>>
      %871 = vector.broadcast %870 : f32 to vector<32x128xf32>
      %872 = arith.mulf %861, %871 : vector<32x128xf32>
      %873 = arith.addf %845, %872 : vector<32x128xf32>
      %c30_167 = arith.constant 30 : index
      %874 = memref.load %arg1[%c30_167] : memref<96xf32, #tpu.memory_space<smem>>
      %875 = vector.broadcast %874 : f32 to vector<32x128xf32>
      %876 = arith.mulf %25#0, %875 : vector<32x128xf32>
      %c62_168 = arith.constant 62 : index
      %877 = memref.load %arg1[%c62_168] : memref<96xf32, #tpu.memory_space<smem>>
      %878 = vector.broadcast %877 : f32 to vector<32x128xf32>
      %879 = arith.mulf %25#1, %878 : vector<32x128xf32>
      %880 = arith.addf %876, %879 : vector<32x128xf32>
      %c94 = arith.constant 94 : index
      %881 = memref.load %arg1[%c94] : memref<96xf32, #tpu.memory_space<smem>>
      %882 = vector.broadcast %881 : f32 to vector<32x128xf32>
      %883 = arith.mulf %25#2, %882 : vector<32x128xf32>
      %884 = arith.addf %880, %883 : vector<32x128xf32>
      %c30_169 = arith.constant 30 : index
      %885 = memref.load %arg2[%c30_169] : memref<32xf32, #tpu.memory_space<smem>>
      %886 = vector.broadcast %885 : f32 to vector<32x128xf32>
      %887 = arith.addf %884, %886 : vector<32x128xf32>
      %cst_170 = arith.constant 0.000000e+00 : f32
      %888 = vector.broadcast %cst_170 : f32 to vector<32x128xf32>
      %889 = arith.maximumf %887, %888 : vector<32x128xf32>
      %c90_171 = arith.constant 90 : index
      %890 = memref.load %arg3[%c90_171] : memref<96xf32, #tpu.memory_space<smem>>
      %891 = vector.broadcast %890 : f32 to vector<32x128xf32>
      %892 = arith.mulf %889, %891 : vector<32x128xf32>
      %893 = arith.addf %865, %892 : vector<32x128xf32>
      %c91_172 = arith.constant 91 : index
      %894 = memref.load %arg3[%c91_172] : memref<96xf32, #tpu.memory_space<smem>>
      %895 = vector.broadcast %894 : f32 to vector<32x128xf32>
      %896 = arith.mulf %889, %895 : vector<32x128xf32>
      %897 = arith.addf %869, %896 : vector<32x128xf32>
      %c92_173 = arith.constant 92 : index
      %898 = memref.load %arg3[%c92_173] : memref<96xf32, #tpu.memory_space<smem>>
      %899 = vector.broadcast %898 : f32 to vector<32x128xf32>
      %900 = arith.mulf %889, %899 : vector<32x128xf32>
      %901 = arith.addf %873, %900 : vector<32x128xf32>
      %c31_174 = arith.constant 31 : index
      %902 = memref.load %arg1[%c31_174] : memref<96xf32, #tpu.memory_space<smem>>
      %903 = vector.broadcast %902 : f32 to vector<32x128xf32>
      %904 = arith.mulf %25#0, %903 : vector<32x128xf32>
      %c63_175 = arith.constant 63 : index
      %905 = memref.load %arg1[%c63_175] : memref<96xf32, #tpu.memory_space<smem>>
      %906 = vector.broadcast %905 : f32 to vector<32x128xf32>
      %907 = arith.mulf %25#1, %906 : vector<32x128xf32>
      %908 = arith.addf %904, %907 : vector<32x128xf32>
      %c95 = arith.constant 95 : index
      %909 = memref.load %arg1[%c95] : memref<96xf32, #tpu.memory_space<smem>>
      %910 = vector.broadcast %909 : f32 to vector<32x128xf32>
      %911 = arith.mulf %25#2, %910 : vector<32x128xf32>
      %912 = arith.addf %908, %911 : vector<32x128xf32>
      %c31_176 = arith.constant 31 : index
      %913 = memref.load %arg2[%c31_176] : memref<32xf32, #tpu.memory_space<smem>>
      %914 = vector.broadcast %913 : f32 to vector<32x128xf32>
      %915 = arith.addf %912, %914 : vector<32x128xf32>
      %cst_177 = arith.constant 0.000000e+00 : f32
      %916 = vector.broadcast %cst_177 : f32 to vector<32x128xf32>
      %917 = arith.maximumf %915, %916 : vector<32x128xf32>
      %c93_178 = arith.constant 93 : index
      %918 = memref.load %arg3[%c93_178] : memref<96xf32, #tpu.memory_space<smem>>
      %919 = vector.broadcast %918 : f32 to vector<32x128xf32>
      %920 = arith.mulf %917, %919 : vector<32x128xf32>
      %921 = arith.addf %893, %920 : vector<32x128xf32>
      %c94_179 = arith.constant 94 : index
      %922 = memref.load %arg3[%c94_179] : memref<96xf32, #tpu.memory_space<smem>>
      %923 = vector.broadcast %922 : f32 to vector<32x128xf32>
      %924 = arith.mulf %917, %923 : vector<32x128xf32>
      %925 = arith.addf %897, %924 : vector<32x128xf32>
      %c95_180 = arith.constant 95 : index
      %926 = memref.load %arg3[%c95_180] : memref<96xf32, #tpu.memory_space<smem>>
      %927 = vector.broadcast %926 : f32 to vector<32x128xf32>
      %928 = arith.mulf %917, %927 : vector<32x128xf32>
      %929 = arith.addf %901, %928 : vector<32x128xf32>
      %930 = arith.negf %921 : vector<32x128xf32>
      %931 = math.exp %930 : vector<32x128xf32>
      %cst_181 = arith.constant 1.000000e+00 : f32
      %932 = vector.broadcast %cst_181 : f32 to vector<32x128xf32>
      %933 = arith.addf %932, %931 : vector<32x128xf32>
      %934 = arith.divf %932, %933 : vector<32x128xf32>
      %cst_182 = arith.constant 0.000000e+00 : f32
      %935 = vector.broadcast %cst_182 : f32 to vector<32x128xf32>
      %936 = arith.select %27, %934, %935 : vector<32x128xi1>, vector<32x128xf32>
      %c0_183 = arith.constant 0 : index
      %937 = arith.index_cast %4 : i32 to index
      %c0_184 = arith.constant 0 : index
      %938 = vector.load %arg7[%c0_183, %937, %c0_184] : memref<3x128x128xf32, #tpu.memory_space<vmem>>, vector<1x32x128xf32>
      %939 = vector.shape_cast %938 : vector<1x32x128xf32> to vector<32x128xf32>
      %940 = vector.shape_cast %936 : vector<32x128xf32> to vector<1x32x128xf32>
      tpu.vector_store %arg7[%c0_183, %937, %c0_184], %940 {strides = array<i32>} : memref<3x128x128xf32, #tpu.memory_space<vmem>>, vector<1x32x128xf32>,
      %941 = arith.negf %925 : vector<32x128xf32>
      %942 = math.exp %941 : vector<32x128xf32>
      %cst_185 = arith.constant 1.000000e+00 : f32
      %943 = vector.broadcast %cst_185 : f32 to vector<32x128xf32>
      %944 = arith.addf %943, %942 : vector<32x128xf32>
      %945 = arith.divf %943, %944 : vector<32x128xf32>
      %cst_186 = arith.constant 0.000000e+00 : f32
      %946 = vector.broadcast %cst_186 : f32 to vector<32x128xf32>
      %947 = arith.select %27, %945, %946 : vector<32x128xi1>, vector<32x128xf32>
      %c1_187 = arith.constant 1 : index
      %948 = arith.index_cast %4 : i32 to index
      %c0_188 = arith.constant 0 : index
      %949 = vector.load %arg7[%c1_187, %948, %c0_188] : memref<3x128x128xf32, #tpu.memory_space<vmem>>, vector<1x32x128xf32>
      %950 = vector.shape_cast %949 : vector<1x32x128xf32> to vector<32x128xf32>
      %951 = vector.shape_cast %947 : vector<32x128xf32> to vector<1x32x128xf32>
      tpu.vector_store %arg7[%c1_187, %948, %c0_188], %951 {strides = array<i32>} : memref<3x128x128xf32, #tpu.memory_space<vmem>>, vector<1x32x128xf32>,
      %952 = arith.negf %929 : vector<32x128xf32>
      %953 = math.exp %952 : vector<32x128xf32>
      %cst_189 = arith.constant 1.000000e+00 : f32
      %954 = vector.broadcast %cst_189 : f32 to vector<32x128xf32>
      %955 = arith.addf %954, %953 : vector<32x128xf32>
      %956 = arith.divf %954, %955 : vector<32x128xf32>
      %cst_190 = arith.constant 0.000000e+00 : f32
      %957 = vector.broadcast %cst_190 : f32 to vector<32x128xf32>
      %958 = arith.select %27, %956, %957 : vector<32x128xi1>, vector<32x128xf32>
      %c2_191 = arith.constant 2 : index
      %959 = arith.index_cast %4 : i32 to index
      %c0_192 = arith.constant 0 : index
      %960 = vector.load %arg7[%c2_191, %959, %c0_192] : memref<3x128x128xf32, #tpu.memory_space<vmem>>, vector<1x32x128xf32>
      %961 = vector.shape_cast %960 : vector<1x32x128xf32> to vector<32x128xf32>
      %962 = vector.shape_cast %958 : vector<32x128xf32> to vector<1x32x128xf32>
      tpu.vector_store %arg7[%c2_191, %959, %c0_192], %962 {strides = array<i32>} : memref<3x128x128xf32, #tpu.memory_space<vmem>>, vector<1x32x128xf32>,
    }
    %c4_i32_0 = arith.constant 4 : i32
    return
  }
  func.func @transform_0(%arg0: i32, %arg1: memref<96xf32, #tpu.memory_space<smem>>, %arg2: memref<32xf32, #tpu.memory_space<smem>>, %arg3: memref<96xf32, #tpu.memory_space<smem>>, %arg4: memref<3xf32, #tpu.memory_space<smem>>) -> (i32, i32, i32) {
    %c0_i32 = arith.constant 0 : i32
    %c0_i32_0 = arith.constant 0 : i32
    %c0_i32_1 = arith.constant 0 : i32
    return %c0_i32, %arg0, %c0_i32_0 : i32, i32, i32
  }
  func.func @transform_1(%arg0: i32, %arg1: memref<96xf32, #tpu.memory_space<smem>>, %arg2: memref<32xf32, #tpu.memory_space<smem>>, %arg3: memref<96xf32, #tpu.memory_space<smem>>, %arg4: memref<3xf32, #tpu.memory_space<smem>>) -> (i32, i32, i32) {
    %c0_i32 = arith.constant 0 : i32
    %c0_i32_0 = arith.constant 0 : i32
    %c0_i32_1 = arith.constant 0 : i32
    return %c0_i32, %arg0, %c0_i32_0 : i32, i32, i32
  }
  func.func @transform_2(%arg0: i32, %arg1: memref<96xf32, #tpu.memory_space<smem>>, %arg2: memref<32xf32, #tpu.memory_space<smem>>, %arg3: memref<96xf32, #tpu.memory_space<smem>>, %arg4: memref<3xf32, #tpu.memory_space<smem>>) -> (i32, i32, i32) {
    %c0_i32 = arith.constant 0 : i32
    %c0_i32_0 = arith.constant 0 : i32
    %c0_i32_1 = arith.constant 0 : i32
    return %c0_i32, %arg0, %c0_i32_0 : i32, i32, i32
  }
}

</mosaic_0001>

<bundles_post_ra>
// kernel: tpu_custom_call.1
= control target key start
LH: loop header
LB: loop body
LE: loop exit
PB: predicated region body
PF: predicated region fallthrough
CT: control target
= control target key end

     0   :  { %s4004_s21 = smov [#allocation3]   ;;  %s6508_s0 = inlined_call_operand.hbm [shape: f32[96], index: 0, kind: input, shape index: {}]   ;;  %s6509_s4 = inlined_call_operand.hbm [shape: f32[3,256,128], index: 4, kind: input, shape index: {}]   ;;  %s6510_s5 = inlined_call_operand.hbm [shape: f32[3,256,128], index: 5, kind: input, shape index: {}]   ;;  %s6511_s6 = inlined_call_operand.hbm [shape: f32[3,256,128], index: 6, kind: output, shape index: {}]   ;;  %s6512_s1 = inlined_call_operand.vmem [shape: f32[32], index: 1, kind: input, shape index: {}]   ;;  %s6513_s2 = inlined_call_operand.vmem [shape: f32[96], index: 2, kind: input, shape index: {}]   ;;  %s6514_s3 = inlined_call_operand.vmem [shape: f32[3], index: 3, kind: input, shape index: {}]  }
   0x1   :  { %12 = dma.hbm_to_smem %s6508_s0, 16, %s4004_s21, [#allocation2] }
   0x2   :  { %s13_s26 = sshll.u32 %s6512_s1, 4  ;;  %s17_s29 = sshll.u32 %s6513_s2, 4  ;;  %s14_s26 = int_to_ptr.vmem [resolvable:$true] %s13_s26  ;;  %s18_s29 = int_to_ptr.vmem [resolvable:$true] %s17_s29 }
   0x3   :  { %s3778_s30 = scalar_lea.vmem %s14_s26, 16  ;;  %p3783_p1 = scmp.lt.s32.totalorder %s14_s26, %s14_s26 }
   0x4   :  { %p3779_p0 = scmp.ne.s32.totalorder %s14_s26, %s3778_s30  ;;  %p3784_p2 = scmp.lt.s32.totalorder %s3778_s30, %s3778_s30 }
   0x6   :  { %p3785_p3 = por %p3784_p2, %p3783_p1 }
   0x8   :  { %p3786_p4 = pnand %p3785_p3, %p3779_p0 }
   0xa   :  { %3789 = shalt.err (!%p3786_p4)  }
   0xb   :  { %s4005_s7 = smov [#allocation4]   ;;  %s21_s9 = sshll.u32 %s6514_s3, 4  ;;  %s22_s9 = int_to_ptr.vmem [resolvable:$true] %s21_s9 }
   0xc   :  { %16 = dma.vmem_to_smem %s14_s26, 16, %s4005_s7, [#allocation2] }
   0xd   :  { %s3790_s1 = scalar_lea.vmem %s18_s29, 16  ;;  %p3795_p6 = scmp.lt.s32.totalorder %s18_s29, %s18_s29 }
   0xe   :  { %p3791_p5 = scmp.ne.s32.totalorder %s18_s29, %s3790_s1  ;;  %p3796_p7 = scmp.lt.s32.totalorder %s3790_s1, %s3790_s1 }
  0x10   :  { %p3797_p8 = por %p3796_p7, %p3795_p6 }
  0x12   :  { %p3798_p9 = pnand %p3797_p8, %p3791_p5 }
  0x14   :  { %3801 = shalt.err (!%p3798_p9)  }
  0x15   :  { %s4006_s2 = smov [#allocation5]   ;;  %s3802_s10 = scalar_lea.vmem %s22_s9, 16 }
  0x16   :  { %20 = dma.vmem_to_smem %s18_s29, 16, %s4006_s2, [#allocation2] }
  0x17   :  { %p3803_p10 = scmp.ne.s32.totalorder %s22_s9, %s3802_s10  ;;  %p3807_p11 = scmp.lt.s32.totalorder %s22_s9, %s22_s9 }
  0x18   :  { %p3808_p12 = scmp.lt.s32.totalorder %s3802_s10, %s3802_s10 }
  0x1a   :  { %p3809_p13 = por %p3808_p12, %p3807_p11 }
  0x1c   :  { %p3810_p0 = pnand %p3809_p13, %p3803_p10 }
  0x1e   :  { %3813 = shalt.err (!%p3810_p0)  }
  0x1f   :  { %s4007_s11 = smov [#allocation6]  }
  0x20   :  { %24 = dma.vmem_to_smem %s22_s9, 16, %s4007_s11, [#allocation2] }
  0x21   :  { %3902 = dma.done.wait [#allocation2], 64 }
  0x22   :  { %3903 = vsyncadd [#allocation2], 4294967232 }
  0x23   :  { %26 = sfence }
  0x24   :  { %27 = vsyncpa [#allocation8], 0 }
  0x25   :  { %29 = vsyncpa [#allocation8 + $0x1], 0 }
  0x26   :  { %30 = vsyncpa [#allocation11], 0 }
  0x27   :  { %32 = vsyncpa [#allocation11 + $0x1], 0 }
  0x28   :  { %33 = vsyncpa [#allocation9], 0 }
  0x29   :  { %35 = vsyncpa [#allocation9 + $0x1], 0  ;;  %s4074_s3 = smov 0   ;;  %s4076_s12 = smov 0  }
  0x2a   :  { %s4078_s13 = smov 0   ;;  %s4080_s14 = smov 0  }
  0x2b LB: > { %s4095_s15 = sadd.s32 4294967295, %s3930_s14   ;;  %s3156_s16 = sadd.s32 4294967294, %s3930_s14   ;;  %s3930_s14 = sphi %s4080_s14, %s6554_s14   ;;  %s3926_s13 = sphi %s4078_s13, %s6553_s13   ;;  %s3922_s12 = sphi %s4076_s12, %s6552_s12   ;;  %s3918_s3 = sphi %s4074_s3, %s6551_s3  }
  0x2c   : > { %s4099_s17 = sadd.s32 1, %s3930_s14   ;;  %s48_s18 = sadd.s32 1, %s3926_s13 }
  0x2d   : > { %s45_s19 = ssub.s32 %s3930_s14, %s4099_s17  ;;  %p55_p1 = scmp.ne.s32.totalorder %s3926_s13, %s3922_s12 }
  0x2e   : > { %p46_p2 = scmp.eq.s32.totalorder %s45_s19, 0  ;;  %p56_p3 = scmp.eq.s32.totalorder %s3930_s14, 0 }
  0x2f   : > { %p61_p4 = scmp.ne.s32.totalorder %s3922_s12, %s3918_s3  ;;  %p62_p5 = scmp.eq.s32.totalorder %s4095_s15, 0 }
  0x30   : > { %s4111_s20 = scalar_select %p46_p2, %s3926_s13, %s48_s18  }
  0x31   : > { %p4113_p6 = por %p56_p3, %p55_p1  ;;  %p4117_p7 = por %p62_p5, %p61_p4 }
  0x32   : > { %p111_p8 = scmp.eq.s32.totalorder %s4095_s15, 1  ;;  %p117_p9 = scmp.eq.s32.totalorder %s3156_s16, 1 }
  0x33   : > { %p3158_p12 = scmp.ge.s32.totalorder %s3930_s14, 2 }
  0x34   : > { %p4122_p10 = por %p111_p8, %p55_p1  ;;  %p4126_p11 = por %p117_p9, %p61_p4 }
  0x35   : > { %133 = sbr.rel (%p3158_p12) target bundleno = 84 (0x54), region = 16 }
  0x3a   : > { %s4134_s25 = sand.u32 1, %s3926_s13   ;;  %s3454_s27 = sshll.u32 %s3930_s14, 11 }
  0x3b   : > { %s3457_s26 = smul.u32 384, %s4134_s25  ;;  %s4008_s28 = smov 4096  }
  0x3c   : > { %3461 = sst [smem:[#allocation14]] (%p4113_p6), %s4008_s28  ;;  %s147_s0 = scalar_lea.hbm %s6509_s4, %s3454_s27 }
  0x3d   : > { %s3460_s29 = scalar_select %p4113_p6, [#allocation0], [#allocation19] }
  0x3e   : > { %s141_s9 = scalar_lea.vmem [#allocation7], %s3457_s26  ;;  %s4009_s2 = smov 2048  }
  0x3f   : > { %s152_s8 = sld [smem:[%s3460_s29]]   ;;  %s160_s1 = sshll.u32 %s141_s9, 4  ;;  %s161_s1 = int_to_ptr.vmem [resolvable:$true] %s160_s1 }
  0x40   : > { %3462 = sst [smem:[#allocation14 + $0x1]] (%p4113_p6), %s4009_s2  ;;  %s4010_s10 = smov 16  }
  0x41   : > { %3463 = sst [smem:[#allocation14 + $0x2]] (%p4113_p6), %s4010_s10  ;;  %s4011_s11 = smov 128  }
  0x42   : > { %3464 = sst [smem:[#allocation14 + $0x3]] (%p4113_p6), %s4011_s11  ;;  %s4012_s16 = smov 8  }
  0x43   : > { %3465 = sst [smem:[#allocation14 + $0x4]] (%p4113_p6), %s4011_s11  ;;  %s138_s28 = scalar_lea.sflag [#allocation8], %s4134_s25 }
  0x44   : > { %3466 = sst [smem:[#allocation14 + $0x5]] (%p4113_p6), %s4012_s16  ;;  %s4013_s29 = smov 131072  }
  0x45   : > { %s3161_s18 = sshll.u32 %s152_s8, 26 }
  0x46   : > { %s3162_s19 = sadd.s32 134217728, %s3161_s18 }
  0x47   : > { %3467 = dma.general (%p4113_p6), %s147_s0, 6144, %s161_s1, %s138_s28, %s4013_s29, [#allocation14], %s3162_s19, 0  }
  0x48   : > { %s193_s9 = scalar_lea.hbm %s6510_s5, %s3454_s27  ;;  %s187_s10 = scalar_lea.vmem [#allocation10], %s3457_s26 }
  0x49   : > { %s3468_s2 = scalar_select %p4113_p6, [#allocation0], [#allocation20] }
  0x4a   : > { %s206_s8 = sshll.u32 %s187_s10, 4  ;;  %s4014_s16 = smov 4096   ;;  %s207_s8 = int_to_ptr.vmem [resolvable:$true] %s206_s8 }
  0x4b   : > { %s198_s11 = sld [smem:[%s3468_s2]]   ;;  %s4015_s0 = smov 2048  }
  0x4c   : > { %3469 = sst [smem:[#allocation16]] (%p4113_p6), %s4014_s16  ;;  %s4016_s1 = smov 16  }
  0x4d   : > { %3470 = sst [smem:[#allocation16 + $0x1]] (%p4113_p6), %s4015_s0  ;;  %s4017_s18 = smov 128  }
  0x4e   : > { %3471 = sst [smem:[#allocation16 + $0x2]] (%p4113_p6), %s4016_s1  ;;  %s4018_s27 = smov 8  }
  0x4f   : > { %3472 = sst [smem:[#allocation16 + $0x3]] (%p4113_p6), %s4017_s18  ;;  %s184_s28 = scalar_lea.sflag [#allocation11], %s4134_s25 }
  0x50   : > { %3473 = sst [smem:[#allocation16 + $0x4]] (%p4113_p6), %s4017_s18  ;;  %s4019_s29 = smov 131072  }
  0x51   : > { %s3165_s26 = sshll.u32 %s198_s11, 26  ;;  %3474 = sst [smem:[#allocation16 + $0x5]] (%p4113_p6), %s4018_s27 }
  0x52   : > { %s3166_s19 = sadd.s32 134217728, %s3165_s26 }
  0x53   : > { %3475 = dma.general (%p4113_p6), %s193_s9, 6144, %s207_s8, %s184_s28, %s4019_s29, [#allocation16], %s3166_s19, 0  }
  0x54 PF: > { %p3167_p13 = scmp.ge.s32.totalorder %s3930_s14, 1  ;;  %p227_p0 = scmp.lt.s32.totalorder %s3930_s14, 3 }
  0x56   : > { %p228_p1 = pnand %p3167_p13, %p227_p0 }
  0x57   : > { %s4181_s30 = sand.u32 (!%p228_p1), 1, %s3922_s12  }
  0x58   : > { %231 = sbr.rel (%p228_p1) target bundleno = 788 (0x314), region = 28  ;;  %s234_s25 = scalar_lea.sflag (!%p228_p1), [#allocation8], %s4181_s30 }
  0x59   : > { %s4184_s7 = smul.u32 (!%p228_p1), 384, %s4181_s30 }
  0x5b   : > { %s237_s2 = scalar_lea.vmem (!%p228_p1), [#allocation7], %s4184_s7 }
  0x5d   : > { %3905 = dma.done.wait (%p4117_p7), %s234_s25, 6144  }
  0x5e   : > { %3907 = vsyncadd (%p4117_p7), %s234_s25, 4294961152  ;;  %s243_s21 = scalar_lea.sflag [#allocation11], %s4181_s30  ;;  %s246_s9 = scalar_lea.vmem [#allocation10], %s4184_s7 }
  0x5f   : > { %3909 = dma.done.wait (%p4117_p7), %s243_s21, 6144  }
  0x60   : > { %3911 = vsyncadd (%p4117_p7), %s243_s21, 4294961152  ;;  %s271_s10 = scalar_lea.vmem [#allocation12], %s4184_s7  ;;  %s4199_s8 = smov 0  }
  0x61 LB: >> { %s4205_s11 = sshll.u32 %s3934_s8, 5  ;;  %v4237_v24 = vmov 0.0   ;;  %v4239_v25 = vmov 0.0   ;;  %v4241_v26 = vmov 0.0   ;;  %v4243_v27 = vmov 0.0   ;;  %s4269_s0 = smov 0   ;;  %s3934_s8 = sphi %s4199_s8, %s280_s8  }
  0x62   : >> { %s282_s16 = scalar_lea.vmem %s237_s2, %s4205_s11 [#allocation7]  ;;  %s299_s22 = scalar_lea.vmem %s246_s9, %s4205_s11 [#allocation10] }
  0x63   : >> { %v283_v0 = vld [vmem:[%s282_s16] sm:$0xff]   ;;  %v284_v1 = vld [vmem:[%s282_s16 + $0x8] sm:$0xff]   ;;  %v285_v2 = vld [vmem:[%s282_s16 + $0x10] sm:$0xff]  }
  0x64   : >> { %v286_v3 = vld [vmem:[%s282_s16 + $0x18] sm:$0xff]   ;;  %v3170_v4 = vld [vmem:[%s282_s16 + $0x80] sm:$0xff]   ;;  %v3171_v5 = vld [vmem:[%s282_s16 + $0x88] sm:$0xff]  }
  0x65   : >> { %v3172_v6 = vld [vmem:[%s282_s16 + $0x90] sm:$0xff]   ;;  %v3173_v7 = vld [vmem:[%s282_s16 + $0x98] sm:$0xff]   ;;  %v3175_v8 = vld [vmem:[%s282_s16 + $0x100] sm:$0xff]  }
  0x66   : >> { %v3176_v9 = vld [vmem:[%s282_s16 + $0x108] sm:$0xff]   ;;  %v3177_v10 = vld [vmem:[%s282_s16 + $0x110] sm:$0xff]   ;;  %v3178_v11 = vld [vmem:[%s282_s16 + $0x118] sm:$0xff]  }
  0x67   : >> { %v4213_v12 = vld [vmem:[%s299_s22] sm:$0xff]  ;;  %v4215_v13 = vld [vmem:[%s299_s22 + $0x8] sm:$0xff]  ;;  %v4217_v14 = vld [vmem:[%s299_s22 + $0x10] sm:$0xff] }
  0x68   : >> { %v4219_v15 = vld [vmem:[%s299_s22 + $0x18] sm:$0xff]  ;;  %v4221_v16 = vld [vmem:[%s299_s22 + $0x80] sm:$0xff]  ;;  %v4223_v17 = vld [vmem:[%s299_s22 + $0x88] sm:$0xff] }
  0x69   : >> { %v4225_v18 = vld [vmem:[%s299_s22 + $0x90] sm:$0xff]  ;;  %v4227_v19 = vld [vmem:[%s299_s22 + $0x98] sm:$0xff]  ;;  %v4229_v20 = vld [vmem:[%s299_s22 + $0x100] sm:$0xff] }
  0x6a   : >> { %v4231_v21 = vld [vmem:[%s299_s22 + $0x108] sm:$0xff]  ;;  %v4233_v22 = vld [vmem:[%s299_s22 + $0x110] sm:$0xff]  ;;  %v4235_v23 = vld [vmem:[%s299_s22 + $0x118] sm:$0xff] }
  0x6b LB: >>> { %v336_v28 = vmul.f32 %v3998_v0, %v3998_v0  ;;  %v337_v29 = vmul.f32 %v3994_v1, %v3994_v1  ;;  %v338_v30 = vmul.f32 %v3990_v2, %v3990_v2  ;;  %v339_v31 = vmul.f32 %v3986_v3, %v3986_v3  ;;  %s319_s0 = sadd.s32 1, %s4002_s0   ;;  %s4002_s0 = sphi %s4269_s0, %s319_s0   ;;  %v3998_v0 = vphi %v283_v0, %v6550_v0   ;;  %v3994_v1 = vphi %v284_v1, %v6549_v1   ;;  %v3990_v2 = vphi %v285_v2, %v6548_v2   ;;  %v3986_v3 = vphi %v286_v3, %v6547_v3   ;;  %v3982_v4 = vphi %v3170_v4, %v6546_v4   ;;  %v3978_v5 = vphi %v3171_v5, %v6545_v5   ;;  %v3974_v6 = vphi %v3172_v6, %v6544_v6   ;;  %v3970_v7 = vphi %v3173_v7, %v6543_v7   ;;  %v3966_v8 = vphi %v3175_v8, %v6542_v8   ;;  %v3962_v9 = vphi %v3176_v9, %v6541_v9   ;;  %v3958_v10 = vphi %v3177_v10, %v6540_v10   ;;  %v3954_v11 = vphi %v3178_v11, %v6539_v11   ;;  %v3950_v27 = vphi %v4243_v27, %v6538_v27   ;;  %v3946_v26 = vphi %v4241_v26, %v6537_v26   ;;  %v3942_v25 = vphi %v4239_v25, %v6536_v25   ;;  %v3938_v24 = vphi %v4237_v24, %v6535_v24  }
  0x6c   : >>> { %v340_v32 = vmul.f32 %v3982_v4, %v3982_v4  ;;  %v341_v33 = vmul.f32 %v3978_v5, %v3978_v5  ;;  %v342_v34 = vmul.f32 %v3974_v6, %v3974_v6  ;;  %v343_v35 = vmul.f32 %v3970_v7, %v3970_v7  ;;  %p4667_p2 = scmp.ge.s32.totalorder %s319_s0, 16  }
  0x6d   : >>> { %v348_v36 = vmul.f32 %v3966_v8, %v3966_v8  ;;  %v349_v37 = vmul.f32 %v3962_v9, %v3962_v9  ;;  %v350_v38 = vmul.f32 %v3958_v10, %v3958_v10  ;;  %v351_v39 = vmul.f32 %v3954_v11, %v3954_v11  ;;  %s730_s18 = sld [smem:[#allocation3]] (%p4667_p2)  ;;  %s280_s8 = sadd.s32 (%p4667_p2), 1, %s3934_s8  }
  0x6e   : >>> { %v344_v40 = vadd.f32 %v340_v32, %v336_v28  ;;  %v345_v41 = vadd.f32 %v341_v33, %v337_v29  ;;  %v346_v42 = vadd.f32 %v342_v34, %v338_v30  ;;  %v347_v43 = vadd.f32 %v343_v35, %v339_v31  ;;  %s3207_s26 = sld [smem:[#allocation3 + $0x20]] (%p4667_p2)  ;;  %p277_p3 = scmp.ge.s32.totalorder (%p4667_p2), %s280_s8, 4  }
  0x6f   : >>> { %vm392_vm8 = vcmp.lt.f32.partialorder %v3950_v27, 10.0  ;;  %vm393_vm9 = vcmp.lt.f32.partialorder %v3946_v26, 10.0  ;;  %vm394_vm11 = vcmp.lt.f32.partialorder %v3942_v25, 10.0  ;;  %vm395_vm13 = vcmp.lt.f32.partialorder %v3938_v24, 10.0  ;;  %s3208_s27 = sld [smem:[#allocation3 + $0x40]] (%p4667_p2) }
  0x70   : >>> { %v352_v44 = vadd.f32 %v348_v36, %v344_v40  ;;  %v353_v45 = vadd.f32 %v349_v37, %v345_v41  ;;  %v354_v46 = vadd.f32 %v350_v38, %v346_v42  ;;  %v355_v47 = vadd.f32 %v351_v39, %v347_v43  ;;  %s756_s19 = sld [smem:[#allocation4]] (%p4667_p2) }
  0x71   : >> { %s3211_s28 = sld [smem:[#allocation3 + $0x1]] (%p4667_p2) }
  0x72   : >>> { %3690 = vrsqrt.f32 %v352_v44  ;;  %vm358_vm0 = vcmp.eq.f32.partialorder %v352_v44, inf  ;;  %vm360_vm1 = vcmp.eq.f32.partialorder %v352_v44, 0.0  ;;  %v361_v49 = vand.u32 2147483648, %v352_v44  ;;  %s766_s29 = sld [smem:[#allocation5]] (%p4667_p2) }
  0x73   : >>> { %3692 = vrsqrt.f32 %v353_v45  ;;  %vm365_vm2 = vcmp.eq.f32.partialorder %v353_v45, inf  ;;  %vm367_vm3 = vcmp.eq.f32.partialorder %v353_v45, 0.0  ;;  %v368_v52 = vand.u32 2147483648, %v353_v45  ;;  %s3212_s25 = sld [smem:[#allocation3 + $0x21]] (%p4667_p2) }
  0x74   : >>> { %3694 = vrsqrt.f32 %v354_v46  ;;  %vm372_vm4 = vcmp.eq.f32.partialorder %v354_v46, inf  ;;  %vm374_vm5 = vcmp.eq.f32.partialorder %v354_v46, 0.0  ;;  %v375_v55 = vand.u32 2147483648, %v354_v46  ;;  %s3209_s21 = sld [smem:[#allocation5 + $0x1]] (%p4667_p2) }
  0x75   : >>> { %3696 = vrsqrt.f32 %v355_v47  ;;  %vm379_vm6 = vcmp.eq.f32.partialorder %v355_v47, inf  ;;  %v382_v59 = vand.u32 2147483648, %v355_v47  ;;  %vm381_vm7 = vcmp.eq.f32.partialorder %v355_v47, 0.0  ;;  %s4735_s16 = sld [smem:[#allocation6]] (%p4667_p2) }
  0x76   : >> { %s4737_s22 = sld [smem:[#allocation6 + $0x1]] (%p4667_p2) }
  0x77   : >> { %s3206_s0 = sld [smem:[#allocation6 + $0x2]] (%p4667_p2) }
  0x78   : >> { %s3210_s1 = sld [smem:[#allocation5 + $0x2]] (%p4667_p2) }
  0x7f   : >>> { %v3691_v48 = vpop.eup %3690 }
  0x80   : >>> { %v3693_v50 = vpop.eup %3692  ;;  %v357_v51 = vmul.f32 %v3691_v48, %v352_v44 }
  0x81   : >>> { %v3695_v53 = vpop.eup %3694  ;;  %v364_v54 = vmul.f32 %v3693_v50, %v353_v45 }
  0x82   : >>> { %v3697_v56 = vpop.eup %3696  ;;  %v359_v57 = vsel %vm358_vm0, %v352_v44, %v357_v51  ;;  %v371_v58 = vmul.f32 %v3695_v53, %v354_v46 }
  0x83   : >>> { %v362_v60 = vsel %vm360_vm1, %v361_v49, %v359_v57  ;;  %v366_v61 = vsel %vm365_vm2, %v353_v45, %v364_v54  ;;  %v378_v62 = vmul.f32 %v3697_v56, %v355_v47 }
  0x84   : >>> { %v369_v63 = vsel %vm367_vm3, %v368_v52, %v366_v61  ;;  %v373_v28 = vsel %vm372_vm4, %v354_v46, %v371_v58  ;;  %v3189_v29 = vadd.f32 -1.0, %v362_v60 }
  0x85   : >>> { %v376_v30 = vsel %vm374_vm5, %v375_v55, %v373_v28  ;;  %v380_v31 = vsel %vm379_vm6, %v355_v47, %v378_v62  ;;  %v3190_v32 = vadd.f32 -1.0, %v369_v63 }
  0x86   : >>> { %v383_v33 = vsel %vm381_vm7, %v382_v59, %v380_v31  ;;  %v3191_v34 = vadd.f32 -1.0, %v376_v30  ;;  %vm388_vm10 = vcmp.le.f32.partialorder %v3189_v29, 0.001 }
  0x87   : >>> { %v3192_v35 = vadd.f32 -1.0, %v383_v33  ;;  %vm389_vm12 = vcmp.le.f32.partialorder %v3190_v32, 0.001  ;;  %vm396_vm14 = vmand %vm388_vm10, %vm392_vm8 }
  0x88   : >>> { %vm390_vm15 = vcmp.le.f32.partialorder %v3191_v34, 0.001  ;;  %vm397_vm0 = vmand %vm389_vm12, %vm393_vm9  ;;  %v400_v36 = vsel %vm396_vm14, 0.0, %v3189_v29 }
  0x89   : >>> { %vm391_vm1 = vcmp.le.f32.partialorder %v3192_v35, 0.001  ;;  %vm398_vm2 = vmand %vm390_vm15, %vm394_vm11  ;;  %v401_v37 = vsel %vm397_vm0, 0.0, %v3190_v32  ;;  %v408_v38 = vmul.f32 %v400_v36, %v4213_v12  ;;  %v416_v41 = vmul.f32 %v4221_v16, %v400_v36 }
  0x8a   : >>> { %vm399_vm3 = vmand %vm391_vm1, %vm395_vm13  ;;  %v402_v39 = vsel %vm398_vm2, 0.0, %v3191_v34  ;;  %v409_v40 = vmul.f32 %v401_v37, %v4215_v13  ;;  %v417_v47 = vmul.f32 %v4223_v17, %v401_v37  ;;  %v425_v53 = vmul.f32 %v4231_v21, %v401_v37 }
  0x8b   : >>> { %v403_v42 = vsel %vm399_vm3, 0.0, %v3192_v35  ;;  %v410_v43 = vmul.f32 %v402_v39, %v4217_v14  ;;  %v4358_v45 = vadd.f32 %v3998_v0, %v408_v38  ;;  %v418_v49 = vmul.f32 %v4225_v18, %v402_v39 }
  0x8c   : >>> { %v411_v44 = vmul.f32 %v403_v42, %v4219_v15  ;;  %v4361_v46 = vadd.f32 %v3994_v1, %v409_v40  ;;  %v419_v50 = vmul.f32 %v4227_v19, %v403_v42  ;;  %v4370_v51 = vadd.f32 %v3982_v4, %v416_v41 }
  0x8d   : >>> { %v4365_v48 = vadd.f32 %v3990_v2, %v410_v43  ;;  %v4376_v0 = vadd.f32 %v3978_v5, %v417_v47  ;;  %v424_v1 = vmul.f32 %v4229_v20, %v400_v36  ;;  %v4381_v2 = vadd.f32 %v3974_v6, %v418_v49 }
  0x8e   : >>> { %v4373_v52 = vadd.f32 %v3986_v3, %v411_v44  ;;  %v4384_v54 = vadd.f32 %v3970_v7, %v419_v50  ;;  %v426_v55 = vmul.f32 %v4233_v22, %v402_v39  ;;  %v427_v4 = vmul.f32 %v4235_v23, %v403_v42 }
  0x8f   : >>> { %v4389_v3 = vadd.f32 %v3966_v8, %v424_v1  ;;  %v4392_v5 = vadd.f32 %v3962_v9, %v425_v53  ;;  %v432_v56 = vmul.f32 %v4358_v45, %v4358_v45  ;;  %v433_v6 = vmul.f32 %v4361_v46, %v4361_v46 }
  0x90   : >>> { %v4399_v57 = vadd.f32 %v3958_v10, %v426_v55  ;;  %v4402_v7 = vadd.f32 %v3954_v11, %v427_v4  ;;  %v434_v58 = vmul.f32 %v4365_v48, %v4365_v48  ;;  %v435_v8 = vmul.f32 %v4373_v52, %v4373_v52 }
  0x91   : >>> { %v436_v9 = vmul.f32 %v4370_v51, %v4370_v51  ;;  %v437_v59 = vmul.f32 %v4376_v0, %v4376_v0  ;;  %v438_v60 = vmul.f32 %v4381_v2, %v4381_v2  ;;  %v439_v10 = vmul.f32 %v4384_v54, %v4384_v54 }
  0x92   : >>> { %v444_v11 = vmul.f32 %v4389_v3, %v4389_v3  ;;  %v445_v61 = vmul.f32 %v4392_v5, %v4392_v5  ;;  %v446_v62 = vmul.f32 %v4399_v57, %v4399_v57  ;;  %v447_v63 = vmul.f32 %v4402_v7, %v4402_v7 }
  0x93   : >>> { %v440_v28 = vadd.f32 %v436_v9, %v432_v56  ;;  %v441_v29 = vadd.f32 %v437_v59, %v433_v6  ;;  %v442_v30 = vadd.f32 %v438_v60, %v434_v58  ;;  %v443_v31 = vadd.f32 %v439_v10, %v435_v8 }
  0x94   : >>> { %v4425_v38 = vadd.f32 %v3950_v27, %v400_v36  ;;  %v4428_v40 = vadd.f32 %v3946_v26, %v401_v37  ;;  %v4431_v41 = vadd.f32 %v3942_v25, %v402_v39  ;;  %v4434_v44 = vadd.f32 %v3938_v24, %v403_v42 }
  0x95   : >>> { %v448_v32 = vadd.f32 %v444_v11, %v440_v28  ;;  %v449_v33 = vadd.f32 %v445_v61, %v441_v29  ;;  %v450_v34 = vadd.f32 %v446_v62, %v442_v30  ;;  %v451_v35 = vadd.f32 %v447_v63, %v443_v31 }
  0x96   : >>> { %vm488_vm12 = vcmp.lt.f32.partialorder %v4425_v38, 10.0  ;;  %vm489_vm13 = vcmp.lt.f32.partialorder %v4428_v40, 10.0  ;;  %vm490_vm15 = vcmp.lt.f32.partialorder %v4431_v41, 10.0  ;;  %vm491_vm1 = vcmp.lt.f32.partialorder %v4434_v44, 10.0 }
  0x97   : >>> { %3698 = vrsqrt.f32 %v448_v32  ;;  %vm454_vm4 = vcmp.eq.f32.partialorder %v448_v32, inf  ;;  %vm456_vm5 = vcmp.eq.f32.partialorder %v448_v32, 0.0  ;;  %v457_v47 = vand.u32 2147483648, %v448_v32 }
  0x98   : >>> { %3700 = vrsqrt.f32 %v449_v33  ;;  %vm461_vm6 = vcmp.eq.f32.partialorder %v449_v33, inf  ;;  %vm463_vm7 = vcmp.eq.f32.partialorder %v449_v33, 0.0  ;;  %v464_v1 = vand.u32 2147483648, %v449_v33 }
  0x99   : >>> { %3702 = vrsqrt.f32 %v450_v34  ;;  %vm468_vm8 = vcmp.eq.f32.partialorder %v450_v34, inf  ;;  %vm470_vm9 = vcmp.eq.f32.partialorder %v450_v34, 0.0  ;;  %v471_v26 = vand.u32 2147483648, %v450_v34 }
  0x9a   : >>> { %3704 = vrsqrt.f32 %v451_v35  ;;  %vm475_vm10 = vcmp.eq.f32.partialorder %v451_v35, inf  ;;  %v478_v53 = vand.u32 2147483648, %v451_v35  ;;  %vm477_vm11 = vcmp.eq.f32.partialorder %v451_v35, 0.0 }
  0xa4   : >>> { %v3699_v43 = vpop.eup %3698 }
  0xa5   : >>> { %v3701_v49 = vpop.eup %3700  ;;  %v453_v50 = vmul.f32 %v3699_v43, %v448_v32 }
  0xa6   : >>> { %v3703_v27 = vpop.eup %3702  ;;  %v460_v36 = vmul.f32 %v3701_v49, %v449_v33 }
  0xa7   : >>> { %v3705_v37 = vpop.eup %3704  ;;  %v455_v25 = vsel %vm454_vm4, %v448_v32, %v453_v50  ;;  %v467_v39 = vmul.f32 %v3703_v27, %v450_v34 }
  0xa8   : >>> { %v458_v24 = vsel %vm456_vm5, %v457_v47, %v455_v25  ;;  %v462_v42 = vsel %vm461_vm6, %v449_v33, %v460_v36  ;;  %v474_v55 = vmul.f32 %v3705_v37, %v451_v35 }
  0xa9   : >>> { %v465_v4 = vsel %vm463_vm7, %v464_v1, %v462_v42  ;;  %v469_v56 = vsel %vm468_vm8, %v450_v34, %v467_v39  ;;  %v3193_v6 = vadd.f32 -1.0, %v458_v24 }
  0xaa   : >>> { %v472_v58 = vsel %vm470_vm9, %v471_v26, %v469_v56  ;;  %v476_v8 = vsel %vm475_vm10, %v451_v35, %v474_v55  ;;  %v3194_v9 = vadd.f32 -1.0, %v465_v4 }
  0xab   : >>> { %v479_v59 = vsel %vm477_vm11, %v478_v53, %v476_v8  ;;  %v3195_v60 = vadd.f32 -1.0, %v472_v58  ;;  %vm484_vm14 = vcmp.le.f32.partialorder %v3193_v6, 0.001 }
  0xac   : >>> { %v3196_v10 = vadd.f32 -1.0, %v479_v59  ;;  %vm485_vm0 = vcmp.le.f32.partialorder %v3194_v9, 0.001  ;;  %vm492_vm2 = vmand %vm484_vm14, %vm488_vm12 }
  0xad   : >>> { %vm486_vm3 = vcmp.le.f32.partialorder %v3195_v60, 0.001  ;;  %vm493_vm4 = vmand %vm485_vm0, %vm489_vm13  ;;  %v496_v11 = vsel %vm492_vm2, 0.0, %v3193_v6 }
  0xae   : >>> { %vm487_vm5 = vcmp.le.f32.partialorder %v3196_v10, 0.001  ;;  %vm494_vm6 = vmand %vm486_vm3, %vm490_vm15  ;;  %v497_v61 = vsel %vm493_vm4, 0.0, %v3194_v9  ;;  %v504_v62 = vmul.f32 %v496_v11, %v4213_v12  ;;  %v512_v29 = vmul.f32 %v4221_v16, %v496_v11 }
  0xaf   : >>> { %vm495_vm7 = vmand %vm487_vm5, %vm491_vm1  ;;  %v498_v63 = vsel %vm494_vm6, 0.0, %v3195_v60  ;;  %v505_v28 = vmul.f32 %v497_v61, %v4215_v13  ;;  %v513_v35 = vmul.f32 %v4223_v17, %v497_v61  ;;  %v521_v27 = vmul.f32 %v4231_v21, %v497_v61 }
  0xb0   : >>> { %v499_v30 = vsel %vm495_vm7, 0.0, %v3196_v10  ;;  %v506_v31 = vmul.f32 %v498_v63, %v4217_v14  ;;  %v4448_v33 = vadd.f32 %v504_v62, %v4358_v45  ;;  %v514_v47 = vmul.f32 %v4225_v18, %v498_v63 }
  0xb1   : >>> { %v507_v32 = vmul.f32 %v499_v30, %v4219_v15  ;;  %v4451_v34 = vadd.f32 %v505_v28, %v4361_v46  ;;  %v515_v49 = vmul.f32 %v4227_v19, %v499_v30  ;;  %v4460_v50 = vadd.f32 %v512_v29, %v4370_v51 }
  0xb2   : >>> { %v4455_v43 = vadd.f32 %v506_v31, %v4365_v48  ;;  %v4466_v45 = vadd.f32 %v513_v35, %v4376_v0  ;;  %v520_v46 = vmul.f32 %v4229_v20, %v496_v11  ;;  %v4471_v48 = vadd.f32 %v514_v47, %v4381_v2 }
  0xb3   : >>> { %v4463_v1 = vadd.f32 %v507_v32, %v4373_v52  ;;  %v4474_v36 = vadd.f32 %v515_v49, %v4384_v54  ;;  %v522_v26 = vmul.f32 %v4233_v22, %v498_v63  ;;  %v523_v51 = vmul.f32 %v4235_v23, %v499_v30 }
  0xb4   : >>> { %v4479_v52 = vadd.f32 %v520_v46, %v4389_v3  ;;  %v4482_v0 = vadd.f32 %v521_v27, %v4392_v5  ;;  %v528_v37 = vmul.f32 %v4448_v33, %v4448_v33  ;;  %v529_v2 = vmul.f32 %v4451_v34, %v4451_v34 }
  0xb5   : >>> { %v4489_v25 = vadd.f32 %v522_v26, %v4399_v57  ;;  %v4492_v54 = vadd.f32 %v523_v51, %v4402_v7  ;;  %v530_v39 = vmul.f32 %v4455_v43, %v4455_v43  ;;  %v531_v3 = vmul.f32 %v4463_v1, %v4463_v1 }
  0xb6   : >>> { %v532_v5 = vmul.f32 %v4460_v50, %v4460_v50  ;;  %v533_v53 = vmul.f32 %v4466_v45, %v4466_v45  ;;  %v534_v24 = vmul.f32 %v4471_v48, %v4471_v48  ;;  %v535_v57 = vmul.f32 %v4474_v36, %v4474_v36 }
  0xb7   : >>> { %v540_v7 = vmul.f32 %v4479_v52, %v4479_v52  ;;  %v541_v42 = vmul.f32 %v4482_v0, %v4482_v0  ;;  %v542_v55 = vmul.f32 %v4489_v25, %v4489_v25  ;;  %v543_v4 = vmul.f32 %v4492_v54, %v4492_v54 }
  0xb8   : >>> { %v536_v56 = vadd.f32 %v532_v5, %v528_v37  ;;  %v537_v6 = vadd.f32 %v533_v53, %v529_v2  ;;  %v538_v58 = vadd.f32 %v534_v24, %v530_v39  ;;  %v539_v8 = vadd.f32 %v535_v57, %v531_v3 }
  0xb9   : >>> { %v4515_v62 = vadd.f32 %v496_v11, %v4425_v38  ;;  %v4518_v28 = vadd.f32 %v497_v61, %v4428_v40  ;;  %v4521_v29 = vadd.f32 %v498_v63, %v4431_v41  ;;  %v4524_v32 = vadd.f32 %v499_v30, %v4434_v44 }
  0xba   : >>> { %v544_v9 = vadd.f32 %v540_v7, %v536_v56  ;;  %v545_v59 = vadd.f32 %v541_v42, %v537_v6  ;;  %v546_v60 = vadd.f32 %v542_v55, %v538_v58  ;;  %v547_v10 = vadd.f32 %v543_v4, %v539_v8 }
  0xbb   : >>> { %vm584_vm0 = vcmp.lt.f32.partialorder %v4515_v62, 10.0  ;;  %vm585_vm1 = vcmp.lt.f32.partialorder %v4518_v28, 10.0  ;;  %vm586_vm3 = vcmp.lt.f32.partialorder %v4521_v29, 10.0  ;;  %vm587_vm5 = vcmp.lt.f32.partialorder %v4524_v32, 10.0 }
  0xbc   : >>> { %3706 = vrsqrt.f32 %v544_v9  ;;  %vm550_vm8 = vcmp.eq.f32.partialorder %v544_v9, inf  ;;  %vm552_vm9 = vcmp.eq.f32.partialorder %v544_v9, 0.0  ;;  %v553_v35 = vand.u32 2147483648, %v544_v9 }
  0xbd   : >>> { %3708 = vrsqrt.f32 %v545_v59  ;;  %vm557_vm10 = vcmp.eq.f32.partialorder %v545_v59, inf  ;;  %vm559_vm11 = vcmp.eq.f32.partialorder %v545_v59, 0.0  ;;  %v560_v46 = vand.u32 2147483648, %v545_v59 }
  0xbe   : >>> { %3710 = vrsqrt.f32 %v546_v60  ;;  %vm564_vm12 = vcmp.eq.f32.partialorder %v546_v60, inf  ;;  %vm566_vm13 = vcmp.eq.f32.partialorder %v546_v60, 0.0  ;;  %v567_v40 = vand.u32 2147483648, %v546_v60 }
  0xbf   : >>> { %3712 = vrsqrt.f32 %v547_v10  ;;  %vm571_vm14 = vcmp.eq.f32.partialorder %v547_v10, inf  ;;  %v574_v27 = vand.u32 2147483648, %v547_v10  ;;  %vm573_vm15 = vcmp.eq.f32.partialorder %v547_v10, 0.0 }
  0xc9   : >>> { %v3707_v31 = vpop.eup %3706 }
  0xca   : >>> { %v3709_v47 = vpop.eup %3708  ;;  %v549_v49 = vmul.f32 %v3707_v31, %v544_v9 }
  0xcb   : >>> { %v3711_v38 = vpop.eup %3710  ;;  %v556_v11 = vmul.f32 %v3709_v47, %v545_v59 }
  0xcc   : >>> { %v3713_v61 = vpop.eup %3712  ;;  %v551_v41 = vsel %vm550_vm8, %v544_v9, %v549_v49  ;;  %v563_v63 = vmul.f32 %v3711_v38, %v546_v60 }
  0xcd   : >>> { %v554_v44 = vsel %vm552_vm9, %v553_v35, %v551_v41  ;;  %v558_v30 = vsel %vm557_vm10, %v545_v59, %v556_v11  ;;  %v570_v26 = vmul.f32 %v3713_v61, %v547_v10 }
  0xce   : >>> { %v561_v51 = vsel %vm559_vm11, %v560_v46, %v558_v30  ;;  %v565_v37 = vsel %vm564_vm12, %v546_v60, %v563_v63  ;;  %v3197_v2 = vadd.f32 -1.0, %v554_v44 }
  0xcf   : >>> { %v568_v39 = vsel %vm566_vm13, %v567_v40, %v565_v37  ;;  %v572_v3 = vsel %vm571_vm14, %v547_v10, %v570_v26  ;;  %v3198_v5 = vadd.f32 -1.0, %v561_v51 }
  0xd0   : >>> { %v575_v53 = vsel %vm573_vm15, %v574_v27, %v572_v3  ;;  %v3199_v24 = vadd.f32 -1.0, %v568_v39  ;;  %vm580_vm2 = vcmp.le.f32.partialorder %v3197_v2, 0.001 }
  0xd1   : >>> { %v3200_v57 = vadd.f32 -1.0, %v575_v53  ;;  %vm581_vm4 = vcmp.le.f32.partialorder %v3198_v5, 0.001  ;;  %vm588_vm6 = vmand %vm580_vm2, %vm584_vm0 }
  0xd2   : >>> { %vm582_vm7 = vcmp.le.f32.partialorder %v3199_v24, 0.001  ;;  %vm589_vm8 = vmand %vm581_vm4, %vm585_vm1  ;;  %v592_v7 = vsel %vm588_vm6, 0.0, %v3197_v2 }
  0xd3   : >>> { %vm583_vm9 = vcmp.le.f32.partialorder %v3200_v57, 0.001  ;;  %vm590_vm10 = vmand %vm582_vm7, %vm586_vm3  ;;  %v593_v42 = vsel %vm589_vm8, 0.0, %v3198_v5  ;;  %v600_v55 = vmul.f32 %v592_v7, %v4213_v12  ;;  %v608_v6 = vmul.f32 %v4221_v16, %v592_v7 }
  0xd4   : >>> { %vm591_vm11 = vmand %vm583_vm9, %vm587_vm5  ;;  %v594_v4 = vsel %vm590_vm10, 0.0, %v3199_v24  ;;  %v601_v56 = vmul.f32 %v593_v42, %v4215_v13  ;;  %v609_v10 = vmul.f32 %v4223_v17, %v593_v42  ;;  %v617_v38 = vmul.f32 %v4231_v21, %v593_v42 }
  0xd5   : >>> { %v595_v58 = vsel %vm591_vm11, 0.0, %v3200_v57  ;;  %v602_v8 = vmul.f32 %v594_v4, %v4217_v14  ;;  %v4538_v59 = vadd.f32 %v600_v55, %v4448_v33  ;;  %v610_v35 = vmul.f32 %v4225_v18, %v594_v4 }
  0xd6   : >>> { %v603_v9 = vmul.f32 %v595_v58, %v4219_v15  ;;  %v4541_v60 = vadd.f32 %v601_v56, %v4451_v34  ;;  %v611_v47 = vmul.f32 %v4227_v19, %v595_v58  ;;  %v4550_v49 = vadd.f32 %v608_v6, %v4460_v50 }
  0xd7   : >>> { %v4545_v31 = vadd.f32 %v602_v8, %v4455_v43  ;;  %v4556_v33 = vadd.f32 %v609_v10, %v4466_v45  ;;  %v616_v34 = vmul.f32 %v4229_v20, %v592_v7  ;;  %v4561_v43 = vadd.f32 %v610_v35, %v4471_v48 }
  0xd8   : >>> { %v4553_v46 = vadd.f32 %v603_v9, %v4463_v1  ;;  %v4564_v11 = vadd.f32 %v611_v47, %v4474_v36  ;;  %v618_v40 = vmul.f32 %v4233_v22, %v594_v4  ;;  %v619_v50 = vmul.f32 %v4235_v23, %v595_v58 }
  0xd9   : >>> { %v4569_v1 = vadd.f32 %v616_v34, %v4479_v52  ;;  %v4572_v45 = vadd.f32 %v617_v38, %v4482_v0  ;;  %v624_v61 = vmul.f32 %v4538_v59, %v4538_v59  ;;  %v625_v48 = vmul.f32 %v4541_v60, %v4541_v60 }
  0xda   : >>> { %v4579_v41 = vadd.f32 %v618_v40, %v4489_v25  ;;  %v4582_v36 = vadd.f32 %v619_v50, %v4492_v54  ;;  %v626_v63 = vmul.f32 %v4545_v31, %v4545_v31  ;;  %v627_v52 = vmul.f32 %v4553_v46, %v4553_v46 }
  0xdb   : >>> { %v628_v0 = vmul.f32 %v4550_v49, %v4550_v49  ;;  %v629_v27 = vmul.f32 %v4556_v33, %v4556_v33  ;;  %v630_v44 = vmul.f32 %v4561_v43, %v4561_v43  ;;  %v631_v25 = vmul.f32 %v4564_v11, %v4564_v11 }
  0xdc   : >>> { %v636_v54 = vmul.f32 %v4569_v1, %v4569_v1  ;;  %v637_v30 = vmul.f32 %v4572_v45, %v4572_v45  ;;  %v638_v26 = vmul.f32 %v4579_v41, %v4579_v41  ;;  %v639_v51 = vmul.f32 %v4582_v36, %v4582_v36 }
  0xdd   : >>> { %v632_v37 = vadd.f32 %v628_v0, %v624_v61  ;;  %v633_v2 = vadd.f32 %v629_v27, %v625_v48  ;;  %v634_v39 = vadd.f32 %v630_v44, %v626_v63  ;;  %v635_v3 = vadd.f32 %v631_v25, %v627_v52 }
  0xde   : >>> { %v596_v55 = vadd.f32 %v592_v7, %v4515_v62  ;;  %v597_v56 = vadd.f32 %v593_v42, %v4518_v28  ;;  %v598_v6 = vadd.f32 %v594_v4, %v4521_v29  ;;  %v599_v9 = vadd.f32 %v595_v58, %v4524_v32 }
  0xdf   : >>> { %v640_v5 = vadd.f32 %v636_v54, %v632_v37  ;;  %v641_v53 = vadd.f32 %v637_v30, %v633_v2  ;;  %v642_v24 = vadd.f32 %v638_v26, %v634_v39  ;;  %v643_v57 = vadd.f32 %v639_v51, %v635_v3 }
  0xe0   : >>> { %vm680_vm4 = vcmp.lt.f32.partialorder %v596_v55, 10.0  ;;  %vm681_vm5 = vcmp.lt.f32.partialorder %v597_v56, 10.0  ;;  %vm682_vm7 = vcmp.lt.f32.partialorder %v598_v6, 10.0  ;;  %vm683_vm9 = vcmp.lt.f32.partialorder %v599_v9, 10.0 }
  0xe1   : >>> { %3714 = vrsqrt.f32 %v640_v5  ;;  %vm646_vm12 = vcmp.eq.f32.partialorder %v640_v5, inf  ;;  %vm648_vm13 = vcmp.eq.f32.partialorder %v640_v5, 0.0  ;;  %v649_v10 = vand.u32 2147483648, %v640_v5 }
  0xe2   : >>> { %3716 = vrsqrt.f32 %v641_v53  ;;  %vm653_vm14 = vcmp.eq.f32.partialorder %v641_v53, inf  ;;  %vm655_vm15 = vcmp.eq.f32.partialorder %v641_v53, 0.0  ;;  %v656_v34 = vand.u32 2147483648, %v641_v53 }
  0xe3   : >>> { %3718 = vrsqrt.f32 %v642_v24  ;;  %vm660_vm0 = vcmp.eq.f32.partialorder %v642_v24, inf  ;;  %vm662_vm1 = vcmp.eq.f32.partialorder %v642_v24, 0.0  ;;  %v663_v62 = vand.u32 2147483648, %v642_v24 }
  0xe4   : >>> { %3720 = vrsqrt.f32 %v643_v57  ;;  %vm667_vm2 = vcmp.eq.f32.partialorder %v643_v57, inf  ;;  %v670_v29 = vand.u32 2147483648, %v643_v57  ;;  %vm669_vm3 = vcmp.eq.f32.partialorder %v643_v57, 0.0 }
  0xee   : >>> { %v3715_v8 = vpop.eup %3714 }
  0xef   : >>> { %v3717_v35 = vpop.eup %3716  ;;  %v645_v47 = vmul.f32 %v3715_v8, %v640_v5 }
  0xf0   : >>> { %v3719_v38 = vpop.eup %3718  ;;  %v652_v40 = vmul.f32 %v3717_v35, %v641_v53 }
  0xf1   : >>> { %v3721_v7 = vpop.eup %3720  ;;  %v647_v28 = vsel %vm646_vm12, %v640_v5, %v645_v47  ;;  %v659_v42 = vmul.f32 %v3719_v38, %v642_v24 }
  0xf2   : >>> { %v650_v32 = vsel %vm648_vm13, %v649_v10, %v647_v28  ;;  %v654_v4 = vsel %vm653_vm14, %v641_v53, %v652_v40  ;;  %v666_v58 = vmul.f32 %v3721_v7, %v643_v57 }
  0xf3   : >>> { %v657_v50 = vsel %vm655_vm15, %v656_v34, %v654_v4  ;;  %v661_v61 = vsel %vm660_vm0, %v642_v24, %v659_v42  ;;  %v3201_v48 = vadd.f32 -1.0, %v650_v32 }
  0xf4   : >>> { %v664_v63 = vsel %vm662_vm1, %v663_v62, %v661_v61  ;;  %v668_v52 = vsel %vm667_vm2, %v643_v57, %v666_v58  ;;  %v3202_v0 = vadd.f32 -1.0, %v657_v50  ;;  %v737_v50 = vstv (%p4667_p2), %s3207_s26  ;;  %s4742_s26 = sld [smem:[#allocation4 + $0x1]] (%p4667_p2) }
  0xf5   : >>> { %v671_v27 = vsel %vm669_vm3, %v670_v29, %v668_v52  ;;  %v3203_v44 = vadd.f32 -1.0, %v664_v63  ;;  %vm676_vm6 = vcmp.le.f32.partialorder %v3201_v48, 0.001  ;;  %v747_v61 = vstv (%p4667_p2), %s3208_s27  ;;  %s4747_s27 = sld [smem:[#allocation3 + $0x2]] (%p4667_p2) }
  0xf6   : >>> { %v3204_v25 = vadd.f32 -1.0, %v671_v27  ;;  %vm677_vm8 = vcmp.le.f32.partialorder %v3202_v0, 0.001  ;;  %vm684_vm10 = vmand %vm676_vm6, %vm680_vm4 }
  0xf7   : >>> { %vm678_vm11 = vcmp.le.f32.partialorder %v3203_v44, 0.001  ;;  %vm685_vm12 = vmand %vm677_vm8, %vm681_vm5  ;;  %v688_v54 = vsel %vm684_vm10, 0.0, %v3201_v48 }
  0xf8   : >>> { %vm679_vm13 = vcmp.le.f32.partialorder %v3204_v25, 0.001  ;;  %vm686_vm14 = vmand %vm678_vm11, %vm682_vm7  ;;  %v689_v30 = vsel %vm685_vm12, 0.0, %v3202_v0  ;;  %v4610_v27 = vadd.f32 %v688_v54, %v596_v55   ;;  %v696_v26 = vmul.f32 %v688_v54, %v4213_v12 }
  0xf9   : >>> { %vm687_vm15 = vmand %vm679_vm13, %vm683_vm9  ;;  %v690_v37 = vsel %vm686_vm14, 0.0, %v3203_v44  ;;  %v4613_v2 = vadd.f32 %v689_v30, %v597_v56   ;;  %v697_v3 = vmul.f32 %v689_v30, %v4215_v13  ;;  %v704_v5 = vmul.f32 %v4221_v16, %v688_v54 }
  0xfa   : >>> { %v6519_v51 = vmov %v4610_v27  ;;  %v691_v53 = vsel %vm687_vm15, 0.0, %v3204_v25  ;;  %v4617_v25 = vadd.f32 %v690_v37, %v598_v6   ;;  %v698_v24 = vmul.f32 %v690_v37, %v4217_v14 }
  0xfb   : >>> { %v6520_v39 = vmov %v4613_v2  ;;  %v4621_v0 = vadd.f32 %v696_v26, %v4538_v59   ;;  %v4623_v55 = vadd.f32 %v691_v53, %v599_v9   ;;  %v699_v8 = vmul.f32 %v691_v53, %v4219_v15 }
  0xfc   : >>> { %v6521_v57 = vmov %v4617_v25  ;;  %v4627_v10 = vadd.f32 %v697_v3, %v4541_v60   ;;  %v705_v47 = vmul.f32 %v4223_v17, %v689_v30  ;;  %v4631_v2 = vadd.f32 %v698_v24, %v4545_v31  }
  0xfd   : >>> { %v6522_v35 = vmov %v4621_v0  ;;  %v706_v6 = vmul.f32 %v4225_v18, %v690_v37  ;;  %v707_v38 = vmul.f32 %v4227_v19, %v691_v53  ;;  %v4636_v4 = vadd.f32 %v704_v5, %v4550_v49  }
  0xfe   : >>> { %v6523_v56 = vmov %v4627_v10  ;;  %v6524_v34 = vmov %v4631_v2  ;;  %v4639_v3 = vadd.f32 %v699_v8, %v4553_v46   ;;  %v4642_v5 = vadd.f32 %v705_v47, %v4556_v33  }
  0xff   : >>> { %v6525_v59 = vmov %v4636_v4  ;;  %v712_v60 = vmul.f32 %v4229_v20, %v688_v54  ;;  %v713_v9 = vmul.f32 %v4231_v21, %v689_v30  ;;  %v4647_v6 = vadd.f32 %v706_v6, %v4561_v43  }
 0x100   : >>> { %v6526_v40 = vmov %v4639_v3  ;;  %v6527_v62 = vmov %v4642_v5  ;;  %v4650_v7 = vadd.f32 %v707_v38, %v4564_v11   ;;  %v714_v42 = vmul.f32 %v4233_v22, %v690_v37 }
 0x101   : >>> { %v6528_v31 = vmov %v4647_v6  ;;  %v715_v49 = vmul.f32 %v4235_v23, %v691_v53  ;;  %v4655_v8 = vadd.f32 %v712_v60, %v4569_v1   ;;  %v4658_v9 = vadd.f32 %v713_v9, %v4572_v45  }
 0x102   : >>> { %v6529_v28 = vmov %v4650_v7  ;;  %v4661_v10 = vadd.f32 %v714_v42, %v4579_v41   ;;  %v6535_v24 = vmov %v4623_v55  ;;  %v6536_v25 = vmov %v6521_v57 }
 0x103   : >>> { %v6530_v46 = vmov %v4655_v8  ;;  %v6531_v33 = vmov %v4658_v9  ;;  %v4664_v11 = vadd.f32 %v715_v49, %v4582_v36   ;;  %v6537_v26 = vmov %v6520_v39  ;;  %318 = sbr.rel (!%p4667_p2) target bundleno = 107 (0x6b), region = 124 }
 0x104   : >>> { %v6532_v29 = vmov %v4661_v10  ;;  %v6538_v27 = vmov %v6519_v51  ;;  %v6541_v9 = vmov %v6531_v33  ;;  %v6542_v8 = vmov %v6530_v46 }
 0x105   : >>> { %v6533_v43 = vmov %v4664_v11  ;;  %v6540_v10 = vmov %v6532_v29  ;;  %v6543_v7 = vmov %v6529_v28  ;;  %v6544_v6 = vmov %v6528_v31 }
 0x106   : >>> { %v6539_v11 = vmov %v6533_v43  ;;  %v6545_v5 = vmov %v6527_v62  ;;  %v6546_v4 = vmov %v6525_v59  ;;  %v6547_v3 = vmov %v6526_v40 }
 0x107   : >>> { %v6548_v2 = vmov %v6524_v34  ;;  %v6549_v1 = vmov %v6523_v56  ;;  %v6550_v0 = vmov %v6522_v35  ;;  %v731_v45 = vstv (%p4667_p2), %s730_s18  ;;  %s4739_s18 = sld [smem:[#allocation3 + $0x41]] (%p4667_p2) }
 0x108   : >> { %v732_v41 = vmul.f32 %v731_v45, %v6522_v35  ;;  %v733_v36 = vmul.f32 %v731_v45, %v6523_v56  ;;  %v734_v32 = vmul.f32 %v731_v45, %v6524_v34  ;;  %v735_v58 = vmul.f32 %v731_v45, %v6526_v40 }
 0x109   : >> { %v738_v48 = vmul.f32 %v737_v50, %v6525_v59  ;;  %v739_v63 = vmul.f32 %v737_v50, %v6527_v62  ;;  %v740_v12 = vmul.f32 %v737_v50, %v6528_v31  ;;  %v741_v13 = vmul.f32 %v737_v50, %v6529_v28 }
 0x10a   : >> { %v748_v14 = vmul.f32 %v747_v61, %v6530_v46  ;;  %v749_v15 = vmul.f32 %v747_v61, %v6531_v33  ;;  %v750_v16 = vmul.f32 %v747_v61, %v6532_v29  ;;  %v751_v17 = vmul.f32 %v747_v61, %v6533_v43 }
 0x10b   : >> { %v742_v18 = vadd.f32 %v738_v48, %v732_v41  ;;  %v743_v19 = vadd.f32 %v739_v63, %v733_v36  ;;  %v744_v20 = vadd.f32 %v740_v12, %v734_v32  ;;  %v745_v21 = vadd.f32 %v741_v13, %v735_v58 }
 0x10c   : >> { %v757_v22 = vstv %s756_s19  ;;  %v797_v44 = vstv %s3211_s28  ;;  %v803_v30 = vstv %s3212_s25  ;;  %v767_v37 = vstv %s766_s29  ;;  %s4755_s19 = sld [smem:[#allocation3 + $0x22]] }
 0x10d   : >> { %v752_v23 = vadd.f32 %v748_v14, %v742_v18  ;;  %v753_v11 = vadd.f32 %v749_v15, %v743_v19  ;;  %v754_v1 = vadd.f32 %v750_v16, %v744_v20  ;;  %v755_v7 = vadd.f32 %v751_v17, %v745_v21  ;;  %s4766_s28 = sld [smem:[#allocation5 + $0x3]] }
 0x10e   : >> { %v777_v2 = vstv %s3209_s21  ;;  %v798_v3 = vmul.f32 %v797_v44, %v6522_v35  ;;  %v799_v53 = vmul.f32 %v797_v44, %v6523_v56  ;;  %v800_v24 = vmul.f32 %v797_v44, %v6524_v34  ;;  %s4773_s29 = sld [smem:[#allocation5 + $0x4]] }
 0x10f   : >> { %v758_v4 = vadd.f32 %v757_v22, %v752_v23  ;;  %v759_v52 = vadd.f32 %v757_v22, %v753_v11  ;;  %v760_v0 = vadd.f32 %v757_v22, %v754_v1  ;;  %v761_v27 = vadd.f32 %v757_v22, %v755_v7  ;;  %s4776_s25 = sld [smem:[#allocation3 + $0x42]] }
 0x110   : >> { %v801_v8 = vmul.f32 %v797_v44, %v6526_v40  ;;  %v804_v10 = vmul.f32 %v803_v30, %v6525_v59  ;;  %v805_v47 = vmul.f32 %v803_v30, %v6527_v62  ;;  %v806_v6 = vmul.f32 %v803_v30, %v6528_v31  ;;  %s4784_s21 = sld [smem:[#allocation5 + $0x5]] }
 0x111   : >> { %v762_v25 = vmax.f32 %v758_v4, 0.0  ;;  %v763_v54 = vmax.f32 %v759_v52, 0.0  ;;  %v764_v26 = vmax.f32 %v760_v0, 0.0  ;;  %v765_v5 = vmax.f32 %v761_v27, 0.0 }
 0x112   : >> { %v807_v38 = vmul.f32 %v803_v30, %v6529_v28  ;;  %v725_v60 = vstv %s4735_s16  ;;  %v727_v49 = vstv %s4737_s22  ;;  %v729_v45 = vstv %s3206_s0  ;;  %s4795_s16 = sld [smem:[#allocation4 + $0x2]] }
 0x113   : >> { %v768_v9 = vmul.f32 %v767_v37, %v762_v25  ;;  %v769_v42 = vmul.f32 %v767_v37, %v763_v54  ;;  %v770_v41 = vmul.f32 %v767_v37, %v764_v26  ;;  %v787_v36 = vstv %s3210_s1  ;;  %s4800_s22 = sld [smem:[#allocation5 + $0x6]] }
 0x114   : >> { %v771_v32 = vmul.f32 %v767_v37, %v765_v5  ;;  %v778_v58 = vmul.f32 %v777_v2, %v762_v25  ;;  %v779_v50 = vmul.f32 %v777_v2, %v763_v54  ;;  %v780_v61 = vmul.f32 %v777_v2, %v764_v26  ;;  %s4802_s0 = sld [smem:[#allocation5 + $0x7]] }
 0x115   : >> { %v808_v48 = vadd.f32 %v804_v10, %v798_v3  ;;  %v809_v63 = vadd.f32 %v805_v47, %v799_v53  ;;  %v810_v12 = vadd.f32 %v806_v6, %v800_v24  ;;  %v811_v13 = vadd.f32 %v807_v38, %v801_v8  ;;  %s4805_s1 = sld [smem:[#allocation5 + $0x8]] }
 0x116   : >> { %v4757_v14 = vadd.f32 %v768_v9, %v725_v60  ;;  %v4759_v15 = vadd.f32 %v769_v42, %v725_v60  ;;  %v781_v16 = vmul.f32 %v777_v2, %v765_v5  ;;  %v813_v17 = vstv %s4739_s18  ;;  %s4811_s18 = sld [smem:[#allocation3 + $0x3]] }
 0x117   : >> { %v814_v18 = vmul.f32 %v813_v17, %v6530_v46  ;;  %v815_v19 = vmul.f32 %v813_v17, %v6531_v33  ;;  %v816_v20 = vmul.f32 %v813_v17, %v6532_v29  ;;  %v817_v21 = vmul.f32 %v813_v17, %v6533_v43 }
 0x118   : >> { %v4768_v22 = vadd.f32 %v770_v41, %v725_v60  ;;  %v4770_v23 = vadd.f32 %v771_v32, %v725_v60  ;;  %v823_v11 = vstv %s4742_s26  ;;  %v863_v1 = vstv %s4747_s27  ;;  %s4813_s26 = sld [smem:[#allocation3 + $0x23]] }
 0x119   : >> { %v818_v7 = vadd.f32 %v814_v18, %v808_v48  ;;  %v819_v4 = vadd.f32 %v815_v19, %v809_v63  ;;  %v820_v52 = vadd.f32 %v816_v20, %v810_v12  ;;  %v821_v0 = vadd.f32 %v817_v21, %v811_v13  ;;  %s4815_s27 = sld [smem:[#allocation3 + $0x43]] }
 0x11a   : >> { %v4778_v27 = vadd.f32 %v778_v58, %v727_v49  ;;  %v4780_v44 = vadd.f32 %v779_v50, %v727_v49  ;;  %v4782_v30 = vadd.f32 %v780_v61, %v727_v49  ;;  %v788_v37 = vmul.f32 %v787_v36, %v762_v25 }
 0x11b   : >> { %v824_v2 = vadd.f32 %v823_v11, %v818_v7  ;;  %v825_v3 = vadd.f32 %v823_v11, %v819_v4  ;;  %v826_v53 = vadd.f32 %v823_v11, %v820_v52  ;;  %v869_v24 = vstv %s4755_s19  ;;  %s4819_s19 = sld [smem:[#allocation4 + $0x3]] }
 0x11c   : >> { %v789_v8 = vmul.f32 %v787_v36, %v763_v54  ;;  %v790_v10 = vmul.f32 %v787_v36, %v764_v26  ;;  %v791_v47 = vmul.f32 %v787_v36, %v765_v5  ;;  %v864_v6 = vmul.f32 %v863_v1, %v6522_v35 }
 0x11d   : >> { %v827_v38 = vadd.f32 %v823_v11, %v821_v0  ;;  %v865_v60 = vmul.f32 %v863_v1, %v6523_v56  ;;  %v866_v9 = vmul.f32 %v863_v1, %v6524_v34  ;;  %v867_v42 = vmul.f32 %v863_v1, %v6526_v40 }
 0x11e   : >> { %v870_v25 = vmul.f32 %v869_v24, %v6525_v59  ;;  %v871_v41 = vmul.f32 %v869_v24, %v6527_v62  ;;  %v872_v54 = vmul.f32 %v869_v24, %v6528_v31  ;;  %v873_v26 = vmul.f32 %v869_v24, %v6529_v28 }
 0x11f   : >> { %v785_v5 = vadd.f32 %v781_v16, %v727_v49  ;;  %v828_v36 = vmax.f32 %v824_v2, 0.0  ;;  %v829_v32 = vmax.f32 %v825_v3, 0.0  ;;  %v830_v58 = vmax.f32 %v826_v53, 0.0 }
 0x120   : >> { %v792_v50 = vadd.f32 %v788_v37, %v729_v45  ;;  %v793_v61 = vadd.f32 %v789_v8, %v729_v45  ;;  %v794_v48 = vadd.f32 %v790_v10, %v729_v45  ;;  %v833_v63 = vstv %s4766_s28  ;;  %s4850_s28 = sld [smem:[#allocation3 + $0x4]] }
 0x121   : >> { %v795_v12 = vadd.f32 %v791_v47, %v729_v45  ;;  %v831_v13 = vmax.f32 %v827_v38, 0.0  ;;  %v843_v17 = vstv %s4773_s29  ;;  %v879_v18 = vstv %s4776_s25  ;;  %s4856_s29 = sld [smem:[#allocation3 + $0x24]] }
 0x122   : >> { %v874_v19 = vadd.f32 %v870_v25, %v864_v6  ;;  %v875_v20 = vadd.f32 %v871_v41, %v865_v60  ;;  %v876_v21 = vadd.f32 %v872_v54, %v866_v9  ;;  %v877_v49 = vadd.f32 %v873_v26, %v867_v42  ;;  %s4858_s25 = sld [smem:[#allocation5 + $0x9]] }
 0x123   : >> { %v834_v16 = vmul.f32 %v833_v63, %v828_v36  ;;  %v835_v11 = vmul.f32 %v833_v63, %v829_v32  ;;  %v836_v1 = vmul.f32 %v833_v63, %v830_v58  ;;  %v853_v7 = vstv %s4784_s21  ;;  %s4864_s21 = sld [smem:[#allocation5 + $0xa]] }
 0x124   : >> { %v880_v4 = vmul.f32 %v879_v18, %v6530_v46  ;;  %v881_v45 = vmul.f32 %v879_v18, %v6531_v33  ;;  %v882_v52 = vmul.f32 %v879_v18, %v6532_v29  ;;  %v883_v0 = vmul.f32 %v879_v18, %v6533_v43 }
 0x125   : >> { %v837_v37 = vmul.f32 %v833_v63, %v831_v13  ;;  %v844_v2 = vmul.f32 %v843_v17, %v828_v36  ;;  %v845_v3 = vmul.f32 %v843_v17, %v829_v32  ;;  %v846_v53 = vmul.f32 %v843_v17, %v830_v58 }
 0x126   : >> { %v884_v24 = vadd.f32 %v880_v4, %v874_v19  ;;  %v885_v8 = vadd.f32 %v881_v45, %v875_v20  ;;  %v886_v10 = vadd.f32 %v882_v52, %v876_v21  ;;  %v887_v47 = vadd.f32 %v883_v0, %v877_v49 }
 0x127   : >> { %v847_v6 = vmul.f32 %v843_v17, %v831_v13  ;;  %v854_v38 = vmul.f32 %v853_v7, %v828_v36  ;;  %v855_v60 = vmul.f32 %v853_v7, %v829_v32  ;;  %v889_v9 = vstv %s4795_s16  ;;  %s4870_s16 = sld [smem:[#allocation5 + $0xb]] }
 0x128   : >> { %v838_v42 = vadd.f32 %v834_v16, %v4757_v14  ;;  %v890_v25 = vadd.f32 %v889_v9, %v884_v24  ;;  %v891_v41 = vadd.f32 %v889_v9, %v885_v8  ;;  %v892_v54 = vadd.f32 %v889_v9, %v886_v10 }
 0x129   : >> { %v839_v26 = vadd.f32 %v835_v11, %v4759_v15  ;;  %v840_v63 = vadd.f32 %v836_v1, %v4768_v22  ;;  %v856_v18 = vmul.f32 %v853_v7, %v830_v58  ;;  %v857_v19 = vmul.f32 %v853_v7, %v831_v13 }
 0x12a   : >> { %v841_v36 = vadd.f32 %v837_v37, %v4770_v23  ;;  %v848_v32 = vadd.f32 %v844_v2, %v4778_v27  ;;  %v849_v14 = vadd.f32 %v845_v3, %v4780_v44  ;;  %v893_v17 = vadd.f32 %v889_v9, %v887_v47 }
 0x12b   : >> { %v4827_v20 = vadd.f32 %v846_v53, %v4782_v30  ;;  %v4829_v15 = vadd.f32 %v847_v6, %v785_v5  ;;  %v4831_v22 = vadd.f32 %v854_v38, %v792_v50  ;;  %v4833_v58 = vadd.f32 %v855_v60, %v793_v61 }
 0x12c   : >> { %v894_v13 = vmax.f32 %v890_v25, 0.0  ;;  %v895_v21 = vmax.f32 %v891_v41, 0.0  ;;  %v896_v23 = vmax.f32 %v892_v54, 0.0  ;;  %v929_v49 = vstv %s4811_s18  ;;  %s4904_s18 = sld [smem:[#allocation3 + $0x5]] }
 0x12d   : >> { %v4836_v27 = vadd.f32 %v856_v18, %v794_v48  ;;  %v4838_v44 = vadd.f32 %v857_v19, %v795_v12  ;;  %v899_v16 = vstv %s4800_s22  ;;  %v909_v11 = vstv %s4802_s0  ;;  %s4872_s22 = sld [smem:[#allocation3 + $0x44]] }
 0x12e   : >> { %v897_v1 = vmax.f32 %v893_v17, 0.0  ;;  %v919_v30 = vstv %s4805_s1  ;;  %v935_v7 = vstv %s4813_s26  ;;  %v945_v5 = vstv %s4815_s27  ;;  %s4880_s0 = sld [smem:[#allocation4 + $0x4]] }
 0x12f   : >> { %v930_v50 = vmul.f32 %v929_v49, %v6522_v35  ;;  %v931_v61 = vmul.f32 %v929_v49, %v6523_v56  ;;  %v932_v4 = vmul.f32 %v929_v49, %v6524_v34  ;;  %v933_v45 = vmul.f32 %v929_v49, %v6526_v40  ;;  %s4883_s1 = sld [smem:[#allocation5 + $0xc]] }
 0x130   : >> { %v900_v52 = vmul.f32 %v899_v16, %v894_v13  ;;  %v901_v0 = vmul.f32 %v899_v16, %v895_v21  ;;  %v902_v48 = vmul.f32 %v899_v16, %v896_v23  ;;  %v955_v37 = vstv %s4819_s19  ;;  %s4915_s26 = sld [smem:[#allocation3 + $0x25]] }
 0x131   : >> { %v936_v12 = vmul.f32 %v935_v7, %v6525_v59  ;;  %v937_v2 = vmul.f32 %v935_v7, %v6527_v62  ;;  %v938_v3 = vmul.f32 %v935_v7, %v6528_v31  ;;  %v939_v53 = vmul.f32 %v935_v7, %v6529_v28  ;;  %s4932_s27 = sld [smem:[#allocation5 + $0xd]] }
 0x132   : >> { %v903_v24 = vmul.f32 %v899_v16, %v897_v1  ;;  %v910_v8 = vmul.f32 %v909_v11, %v894_v13  ;;  %v911_v10 = vmul.f32 %v909_v11, %v895_v21  ;;  %v912_v47 = vmul.f32 %v909_v11, %v896_v23  ;;  %s4938_s19 = sld [smem:[#allocation5 + $0xe]] }
 0x133   : >> { %v940_v6 = vadd.f32 %v936_v12, %v930_v50  ;;  %v941_v38 = vadd.f32 %v937_v2, %v931_v61  ;;  %v942_v60 = vadd.f32 %v938_v3, %v932_v4  ;;  %v943_v9 = vadd.f32 %v939_v53, %v933_v45 }
 0x134   : >> { %v946_v25 = vmul.f32 %v945_v5, %v6530_v46  ;;  %v947_v41 = vmul.f32 %v945_v5, %v6531_v33  ;;  %v948_v54 = vmul.f32 %v945_v5, %v6532_v29  ;;  %v949_v18 = vmul.f32 %v945_v5, %v6533_v43 }
 0x135   : >> { %v4866_v19 = vadd.f32 %v900_v52, %v838_v42  ;;  %v4868_v17 = vadd.f32 %v901_v0, %v839_v26  ;;  %v913_v49 = vmul.f32 %v909_v11, %v897_v1  ;;  %v920_v16 = vmul.f32 %v919_v30, %v894_v13 }
 0x136   : >> { %v950_v7 = vadd.f32 %v946_v25, %v940_v6  ;;  %v951_v50 = vadd.f32 %v947_v41, %v941_v38  ;;  %v952_v61 = vadd.f32 %v948_v54, %v942_v60  ;;  %v953_v4 = vadd.f32 %v949_v18, %v943_v9 }
 0x137   : >> { %v906_v45 = vadd.f32 %v902_v48, %v840_v63  ;;  %v4874_v12 = vadd.f32 %v903_v24, %v841_v36  ;;  %v4876_v5 = vadd.f32 %v910_v8, %v848_v32  ;;  %v4878_v42 = vadd.f32 %v911_v10, %v849_v14 }
 0x138   : >> { %v956_v26 = vadd.f32 %v955_v37, %v950_v7  ;;  %v957_v13 = vadd.f32 %v955_v37, %v951_v50  ;;  %v958_v11 = vadd.f32 %v955_v37, %v952_v61  ;;  %v995_v52 = vstv %s4850_s28  ;;  %s4944_s28 = sld [smem:[#allocation3 + $0x45]] }
 0x139   : >> { %v4886_v0 = vadd.f32 %v912_v47, %v4827_v20  ;;  %v4889_v63 = vadd.f32 %v913_v49, %v4829_v15  ;;  %v921_v36 = vmul.f32 %v919_v30, %v895_v21  ;;  %v922_v32 = vmul.f32 %v919_v30, %v896_v23 }
 0x13a   : >> { %v923_v48 = vmul.f32 %v919_v30, %v897_v1  ;;  %v4892_v14 = vadd.f32 %v920_v16, %v4831_v22  ;;  %v959_v2 = vadd.f32 %v955_v37, %v953_v4  ;;  %v1001_v3 = vstv %s4856_s29  ;;  %s4950_s29 = sld [smem:[#allocation4 + $0x5]] }
 0x13b   : >> { %v965_v53 = vstv %s4858_s25  ;;  %v996_v24 = vmul.f32 %v995_v52, %v6522_v35  ;;  %v997_v8 = vmul.f32 %v995_v52, %v6523_v56  ;;  %v998_v20 = vmul.f32 %v995_v52, %v6524_v34  ;;  %s4954_s25 = sld [smem:[#allocation3 + $0x6]] }
 0x13c   : >> { %v960_v10 = vmax.f32 %v956_v26, 0.0  ;;  %v961_v15 = vmax.f32 %v957_v13, 0.0  ;;  %v962_v21 = vmax.f32 %v958_v11, 0.0  ;;  %v999_v23 = vmul.f32 %v995_v52, %v6526_v40 }
 0x13d   : >> { %v1002_v22 = vmul.f32 %v1001_v3, %v6525_v59  ;;  %v1003_v1 = vmul.f32 %v1001_v3, %v6527_v62  ;;  %v1004_v30 = vmul.f32 %v1001_v3, %v6528_v31  ;;  %v1005_v37 = vmul.f32 %v1001_v3, %v6529_v28 }
 0x13e   : >> { %v4907_v47 = vadd.f32 %v921_v36, %v4833_v58  ;;  %v4910_v6 = vadd.f32 %v922_v32, %v4836_v27  ;;  %v4913_v38 = vadd.f32 %v923_v48, %v4838_v44  ;;  %v963_v60 = vmax.f32 %v959_v2, 0.0 }
 0x13f   : >> { %v975_v9 = vstv %s4864_s21  ;;  %v985_v25 = vstv %s4870_s16  ;;  %v1011_v41 = vstv %s4872_s22  ;;  %v1021_v54 = vstv %s4880_s0  ;;  %s4971_s21 = sld [smem:[#allocation3 + $0x26]] }
 0x140   : >> { %v966_v18 = vmul.f32 %v965_v53, %v960_v10  ;;  %v967_v49 = vmul.f32 %v965_v53, %v961_v15  ;;  %v968_v16 = vmul.f32 %v965_v53, %v962_v21  ;;  %v4922_v7 = vstv %s4883_s1  ;;  %s4984_s16 = sld [smem:[#allocation5 + $0xf]] }
 0x141   : >> { %v1006_v58 = vadd.f32 %v1002_v22, %v996_v24  ;;  %v1007_v50 = vadd.f32 %v1003_v1, %v997_v8  ;;  %v1008_v61 = vadd.f32 %v1004_v30, %v998_v20  ;;  %v1009_v27 = vadd.f32 %v1005_v37, %v999_v23  ;;  %s4992_s22 = sld [smem:[#allocation5 + $0x10]] }
 0x142   : >> { %v969_v4 = vmul.f32 %v965_v53, %v963_v60  ;;  %v976_v26 = vmul.f32 %v975_v9, %v960_v10  ;;  %v977_v44 = vmul.f32 %v975_v9, %v961_v15  ;;  %v978_v13 = vmul.f32 %v975_v9, %v962_v21  ;;  %s4995_s0 = sld [smem:[#allocation3 + $0x46]] }
 0x143   : >> { %v1012_v11 = vmul.f32 %v1011_v41, %v6530_v46  ;;  %v1013_v52 = vmul.f32 %v1011_v41, %v6531_v33  ;;  %v1014_v36 = vmul.f32 %v1011_v41, %v6532_v29  ;;  %v1015_v32 = vmul.f32 %v1011_v41, %v6533_v43  ;;  %s5004_s1 = sld [smem:[#allocation5 + $0x11]] }
 0x144   : >> { %v970_v48 = vadd.f32 %v966_v18, %v4866_v19  ;;  %v971_v2 = vadd.f32 %v967_v49, %v4868_v17  ;;  %v4930_v3 = vadd.f32 %v968_v16, %v906_v45  ;;  %v979_v53 = vmul.f32 %v975_v9, %v963_v60 }
 0x145   : >> { %v1016_v24 = vadd.f32 %v1012_v11, %v1006_v58  ;;  %v1017_v8 = vadd.f32 %v1013_v52, %v1007_v50  ;;  %v1018_v20 = vadd.f32 %v1014_v36, %v1008_v61  ;;  %v1019_v23 = vadd.f32 %v1015_v32, %v1009_v27 }
 0x146   : >> { %v973_v22 = vadd.f32 %v969_v4, %v4874_v12  ;;  %v4936_v1 = vadd.f32 %v976_v26, %v4876_v5  ;;  %v1061_v30 = vstv %s4904_s18  ;;  %v1067_v19 = vstv %s4915_s26  ;;  %s5015_s18 = sld [smem:[#allocation4 + $0x6]] }
 0x147   : >> { %v1022_v37 = vadd.f32 %v1021_v54, %v1016_v24  ;;  %v1023_v17 = vadd.f32 %v1021_v54, %v1017_v8  ;;  %v1024_v45 = vadd.f32 %v1021_v54, %v1018_v20  ;;  %v1025_v41 = vadd.f32 %v1021_v54, %v1019_v23  ;;  %s5022_s26 = sld [smem:[#allocation5 + $0x12]] }
 0x148   : >> { %v981_v9 = vadd.f32 %v977_v44, %v4878_v42  ;;  %v982_v18 = vadd.f32 %v978_v13, %v4886_v0  ;;  %v986_v49 = vmul.f32 %v985_v25, %v960_v10  ;;  %v987_v16 = vmul.f32 %v985_v25, %v961_v15 }
 0x149   : >> { %v988_v12 = vmul.f32 %v985_v25, %v962_v21  ;;  %v989_v58 = vmul.f32 %v985_v25, %v963_v60  ;;  %v1026_v5 = vmax.f32 %v1022_v37, 0.0  ;;  %v1027_v50 = vmax.f32 %v1023_v17, 0.0 }
 0x14a   : >> { %v1062_v61 = vmul.f32 %v1061_v30, %v6522_v35  ;;  %v1063_v27 = vmul.f32 %v1061_v30, %v6523_v56  ;;  %v1064_v4 = vmul.f32 %v1061_v30, %v6524_v34  ;;  %v1068_v54 = vmul.f32 %v1067_v19, %v6525_v59 }
 0x14b   : >> { %v1028_v42 = vmax.f32 %v1024_v45, 0.0  ;;  %v1029_v0 = vmax.f32 %v1025_v41, 0.0  ;;  %v1069_v10 = vmul.f32 %v1067_v19, %v6527_v62  ;;  %v1070_v15 = vmul.f32 %v1067_v19, %v6528_v31 }
 0x14c   : >> { %v983_v21 = vadd.f32 %v979_v53, %v4889_v63  ;;  %v4958_v60 = vadd.f32 %v986_v49, %v4892_v14  ;;  %v1065_v25 = vmul.f32 %v1061_v30, %v6526_v40  ;;  %v1071_v26 = vmul.f32 %v1067_v19, %v6529_v28 }
 0x14d   : >> { %v4963_v44 = vadd.f32 %v987_v16, %v4907_v47  ;;  %v1032_v13 = vmul.f32 %v4922_v7, %v1026_v5  ;;  %v1033_v11 = vmul.f32 %v4922_v7, %v1027_v50  ;;  %v1041_v52 = vstv %s4932_s27  ;;  %s5024_s27 = sld [smem:[#allocation5 + $0x13]] }
 0x14e   : >> { %v992_v36 = vadd.f32 %v988_v12, %v4910_v6  ;;  %v993_v63 = vadd.f32 %v989_v58, %v4913_v38  ;;  %v1051_v32 = vstv %s4938_s19  ;;  %v1072_v14 = vadd.f32 %v1068_v54, %v1062_v61  ;;  %s5027_s19 = sld [smem:[#allocation5 + $0x14]] }
 0x14f   : >> { %v1034_v53 = vmul.f32 %v4922_v7, %v1028_v42  ;;  %v1035_v24 = vmul.f32 %v4922_v7, %v1029_v0  ;;  %v1073_v47 = vadd.f32 %v1069_v10, %v1063_v27  ;;  %v1074_v8 = vadd.f32 %v1070_v15, %v1064_v4 }
 0x150   : >> { %v1042_v20 = vmul.f32 %v1041_v52, %v1026_v5  ;;  %v1043_v23 = vmul.f32 %v1041_v52, %v1027_v50  ;;  %v1075_v30 = vadd.f32 %v1071_v26, %v1065_v25  ;;  %v1077_v19 = vstv %s4944_s28  ;;  %s5033_s28 = sld [smem:[#allocation3 + $0x7]] }
 0x151   : >> { %v4976_v37 = vadd.f32 %v1032_v13, %v970_v48  ;;  %v4978_v6 = vadd.f32 %v1033_v11, %v971_v2  ;;  %v1044_v38 = vmul.f32 %v1041_v52, %v1028_v42  ;;  %v1045_v17 = vmul.f32 %v1041_v52, %v1029_v0 }
 0x152   : >> { %v1078_v45 = vmul.f32 %v1077_v19, %v6530_v46  ;;  %v1079_v41 = vmul.f32 %v1077_v19, %v6531_v33  ;;  %v1080_v7 = vmul.f32 %v1077_v19, %v6532_v29  ;;  %v1081_v49 = vmul.f32 %v1077_v19, %v6533_v43 }
 0x153   : >> { %v4987_v16 = vadd.f32 %v1034_v53, %v4930_v3  ;;  %v4989_v12 = vadd.f32 %v1035_v24, %v973_v22  ;;  %v1087_v48 = vstv %s4950_s29  ;;  %v1127_v2 = vstv %s4954_s25  ;;  %s5035_s29 = sld [smem:[#allocation3 + $0x27]] }
 0x154   : >> { %v1082_v58 = vadd.f32 %v1078_v45, %v1072_v14  ;;  %v1083_v61 = vadd.f32 %v1079_v41, %v1073_v47  ;;  %v1084_v27 = vadd.f32 %v1080_v7, %v1074_v8  ;;  %v1085_v4 = vadd.f32 %v1081_v49, %v1075_v30  ;;  %s5037_s25 = sld [smem:[#allocation3 + $0x47]] }
 0x155   : >> { %v4998_v54 = vadd.f32 %v1042_v20, %v4936_v1  ;;  %v5000_v10 = vadd.f32 %v1043_v23, %v981_v9  ;;  %v5002_v3 = vadd.f32 %v1044_v38, %v982_v18  ;;  %v1052_v22 = vmul.f32 %v1051_v32, %v1026_v5 }
 0x156   : >> { %v1088_v15 = vadd.f32 %v1087_v48, %v1082_v58  ;;  %v1089_v25 = vadd.f32 %v1087_v48, %v1083_v61  ;;  %v1090_v26 = vadd.f32 %v1087_v48, %v1084_v27  ;;  %v1133_v13 = vstv %s4971_s21  ;;  %s5041_s21 = sld [smem:[#allocation4 + $0x7]] }
 0x157   : >> { %v1053_v11 = vmul.f32 %v1051_v32, %v1027_v50  ;;  %v1054_v52 = vmul.f32 %v1051_v32, %v1028_v42  ;;  %v1055_v14 = vmul.f32 %v1051_v32, %v1029_v0  ;;  %v1128_v53 = vmul.f32 %v1127_v2, %v6522_v35 }
 0x158   : >> { %v1091_v24 = vadd.f32 %v1087_v48, %v1085_v4  ;;  %v1129_v1 = vmul.f32 %v1127_v2, %v6523_v56  ;;  %v1130_v9 = vmul.f32 %v1127_v2, %v6524_v34  ;;  %v1131_v18 = vmul.f32 %v1127_v2, %v6526_v40 }
 0x159   : >> { %v1134_v5 = vmul.f32 %v1133_v13, %v6525_v59  ;;  %v1135_v47 = vmul.f32 %v1133_v13, %v6527_v62  ;;  %v1136_v50 = vmul.f32 %v1133_v13, %v6528_v31  ;;  %v1137_v42 = vmul.f32 %v1133_v13, %v6529_v28 }
 0x15a   : >> { %v1049_v0 = vadd.f32 %v1045_v17, %v983_v21  ;;  %v1092_v32 = vmax.f32 %v1088_v15, 0.0  ;;  %v1093_v8 = vmax.f32 %v1089_v25, 0.0  ;;  %v1094_v20 = vmax.f32 %v1090_v26, 0.0 }
 0x15b   : >> { %v1056_v23 = vadd.f32 %v1052_v22, %v4958_v60  ;;  %v1057_v30 = vadd.f32 %v1053_v11, %v4963_v44  ;;  %v1097_v19 = vstv %s4984_s16  ;;  %v1107_v38 = vstv %s4992_s22  ;;  %s5072_s16 = sld [smem:[#allocation3 + $0x8]] }
 0x15c   : >> { %v1058_v45 = vadd.f32 %v1054_v52, %v992_v36  ;;  %v1059_v41 = vadd.f32 %v1055_v14, %v993_v63  ;;  %v1095_v7 = vmax.f32 %v1091_v24, 0.0  ;;  %v1143_v49 = vstv %s4995_s0  ;;  %s5078_s22 = sld [smem:[#allocation3 + $0x28]] }
 0x15d   : >> { %v1138_v48 = vadd.f32 %v1134_v5, %v1128_v53  ;;  %v1139_v21 = vadd.f32 %v1135_v47, %v1129_v1  ;;  %v1140_v17 = vadd.f32 %v1136_v50, %v1130_v9  ;;  %v1141_v2 = vadd.f32 %v1137_v42, %v1131_v18  ;;  %s5080_s0 = sld [smem:[#allocation5 + $0x15]] }
 0x15e   : >> { %v1098_v58 = vmul.f32 %v1097_v19, %v1092_v32  ;;  %v1099_v61 = vmul.f32 %v1097_v19, %v1093_v8  ;;  %v1100_v60 = vmul.f32 %v1097_v19, %v1094_v20  ;;  %v1117_v27 = vstv %s5004_s1  ;;  %s5086_s1 = sld [smem:[#allocation5 + $0x16]] }
 0x15f   : >> { %v1144_v44 = vmul.f32 %v1143_v49, %v6530_v46  ;;  %v1145_v36 = vmul.f32 %v1143_v49, %v6531_v33  ;;  %v1146_v63 = vmul.f32 %v1143_v49, %v6532_v29  ;;  %v1147_v4 = vmul.f32 %v1143_v49, %v6533_v43 }
 0x160   : >> { %v1101_v22 = vmul.f32 %v1097_v19, %v1095_v7  ;;  %v1108_v15 = vmul.f32 %v1107_v38, %v1092_v32  ;;  %v1109_v25 = vmul.f32 %v1107_v38, %v1093_v8  ;;  %v1110_v26 = vmul.f32 %v1107_v38, %v1094_v20 }
 0x161   : >> { %v1148_v13 = vadd.f32 %v1144_v44, %v1138_v48  ;;  %v1149_v11 = vadd.f32 %v1145_v36, %v1139_v21  ;;  %v1150_v52 = vadd.f32 %v1146_v63, %v1140_v17  ;;  %v1151_v14 = vadd.f32 %v1147_v4, %v1141_v2 }
 0x162   : >> { %v1111_v53 = vmul.f32 %v1107_v38, %v1095_v7  ;;  %v1118_v24 = vmul.f32 %v1117_v27, %v1092_v32  ;;  %v1119_v1 = vmul.f32 %v1117_v27, %v1093_v8  ;;  %v1153_v9 = vstv %s5015_s18  ;;  %s5092_s18 = sld [smem:[#allocation5 + $0x17]] }
 0x163   : >> { %v1102_v18 = vadd.f32 %v1098_v58, %v4976_v37  ;;  %v1154_v5 = vadd.f32 %v1153_v9, %v1148_v13  ;;  %v1155_v47 = vadd.f32 %v1153_v9, %v1149_v11  ;;  %v1156_v50 = vadd.f32 %v1153_v9, %v1150_v52 }
 0x164   : >> { %v1103_v42 = vadd.f32 %v1099_v61, %v4978_v6  ;;  %v1104_v19 = vadd.f32 %v1100_v60, %v4987_v16  ;;  %v1120_v49 = vmul.f32 %v1117_v27, %v1094_v20  ;;  %v1121_v48 = vmul.f32 %v1117_v27, %v1095_v7 }
 0x165   : >> { %v1105_v32 = vadd.f32 %v1101_v22, %v4989_v12  ;;  %v1112_v8 = vadd.f32 %v1108_v15, %v4998_v54  ;;  %v1113_v37 = vadd.f32 %v1109_v25, %v5000_v10  ;;  %v1157_v38 = vadd.f32 %v1153_v9, %v1151_v14 }
 0x166   : >> { %v5049_v21 = vadd.f32 %v1110_v26, %v5002_v3  ;;  %v5051_v6 = vadd.f32 %v1111_v53, %v1049_v0  ;;  %v5053_v16 = vadd.f32 %v1118_v24, %v1056_v23  ;;  %v5055_v20 = vadd.f32 %v1119_v1, %v1057_v30 }
 0x167   : >> { %v1158_v7 = vmax.f32 %v1154_v5, 0.0  ;;  %v1159_v17 = vmax.f32 %v1155_v47, 0.0  ;;  %v1160_v12 = vmax.f32 %v1156_v50, 0.0  ;;  %v1193_v2 = vstv %s5033_s28  ;;  %s5126_s28 = sld [smem:[#allocation3 + $0x9]] }
 0x168   : >> { %v5058_v54 = vadd.f32 %v1120_v49, %v1058_v45  ;;  %v5060_v10 = vadd.f32 %v1121_v48, %v1059_v41  ;;  %v1163_v58 = vstv %s5022_s26  ;;  %v1173_v61 = vstv %s5024_s27  ;;  %s5094_s26 = sld [smem:[#allocation3 + $0x48]] }
 0x169   : >> { %v1161_v60 = vmax.f32 %v1157_v38, 0.0  ;;  %v1183_v3 = vstv %s5027_s19  ;;  %v1199_v27 = vstv %s5035_s29  ;;  %v1209_v0 = vstv %s5037_s25  ;;  %s5102_s27 = sld [smem:[#allocation4 + $0x8]] }
 0x16a   : >> { %v1194_v23 = vmul.f32 %v1193_v2, %v6522_v35  ;;  %v1195_v30 = vmul.f32 %v1193_v2, %v6523_v56  ;;  %v1196_v44 = vmul.f32 %v1193_v2, %v6524_v34  ;;  %v1197_v36 = vmul.f32 %v1193_v2, %v6526_v40  ;;  %s5105_s19 = sld [smem:[#allocation5 + $0x18]] }
 0x16b   : >> { %v1164_v63 = vmul.f32 %v1163_v58, %v1158_v7  ;;  %v1165_v4 = vmul.f32 %v1163_v58, %v1159_v17  ;;  %v1166_v45 = vmul.f32 %v1163_v58, %v1160_v12  ;;  %v1219_v22 = vstv %s5041_s21  ;;  %s5137_s29 = sld [smem:[#allocation3 + $0x29]] }
 0x16c   : >> { %v1200_v41 = vmul.f32 %v1199_v27, %v6525_v59  ;;  %v1201_v15 = vmul.f32 %v1199_v27, %v6527_v62  ;;  %v1202_v25 = vmul.f32 %v1199_v27, %v6528_v31  ;;  %v1203_v26 = vmul.f32 %v1199_v27, %v6529_v28  ;;  %s5154_s25 = sld [smem:[#allocation5 + $0x19]] }
 0x16d   : >> { %v1167_v13 = vmul.f32 %v1163_v58, %v1161_v60  ;;  %v1174_v11 = vmul.f32 %v1173_v61, %v1158_v7  ;;  %v1175_v52 = vmul.f32 %v1173_v61, %v1159_v17  ;;  %v1176_v14 = vmul.f32 %v1173_v61, %v1160_v12  ;;  %s5160_s21 = sld [smem:[#allocation5 + $0x1a]] }
 0x16e   : >> { %v1204_v53 = vadd.f32 %v1200_v41, %v1194_v23  ;;  %v1205_v24 = vadd.f32 %v1201_v15, %v1195_v30  ;;  %v1206_v1 = vadd.f32 %v1202_v25, %v1196_v44  ;;  %v1207_v9 = vadd.f32 %v1203_v26, %v1197_v36 }
 0x16f   : >> { %v1210_v5 = vmul.f32 %v1209_v0, %v6530_v46  ;;  %v1211_v47 = vmul.f32 %v1209_v0, %v6531_v33  ;;  %v1212_v50 = vmul.f32 %v1209_v0, %v6532_v29  ;;  %v1213_v49 = vmul.f32 %v1209_v0, %v6533_v43 }
 0x170   : >> { %v5088_v48 = vadd.f32 %v1164_v63, %v1102_v18  ;;  %v5090_v38 = vadd.f32 %v1165_v4, %v1103_v42  ;;  %v1177_v2 = vmul.f32 %v1173_v61, %v1161_v60  ;;  %v1184_v58 = vmul.f32 %v1183_v3, %v1158_v7 }
 0x171   : >> { %v1214_v27 = vadd.f32 %v1210_v5, %v1204_v53  ;;  %v1215_v23 = vadd.f32 %v1211_v47, %v1205_v24  ;;  %v1216_v30 = vadd.f32 %v1212_v50, %v1206_v1  ;;  %v1217_v44 = vadd.f32 %v1213_v49, %v1207_v9 }
 0x172   : >> { %v1170_v36 = vadd.f32 %v1166_v45, %v1104_v19  ;;  %v5096_v41 = vadd.f32 %v1167_v13, %v1105_v32  ;;  %v5098_v0 = vadd.f32 %v1174_v11, %v1112_v8  ;;  %v5100_v18 = vadd.f32 %v1175_v52, %v1113_v37 }
 0x173   : >> { %v1220_v42 = vadd.f32 %v1219_v22, %v1214_v27  ;;  %v1221_v7 = vadd.f32 %v1219_v22, %v1215_v23  ;;  %v1222_v61 = vadd.f32 %v1219_v22, %v1216_v30  ;;  %v1259_v63 = vstv %s5072_s16  ;;  %s5166_s16 = sld [smem:[#allocation3 + $0x49]] }
 0x174   : >> { %v5108_v4 = vadd.f32 %v1176_v14, %v5049_v21  ;;  %v5111_v19 = vadd.f32 %v1177_v2, %v5051_v6  ;;  %v1185_v32 = vmul.f32 %v1183_v3, %v1159_v17  ;;  %v1186_v8 = vmul.f32 %v1183_v3, %v1160_v12 }
 0x175   : >> { %v1187_v45 = vmul.f32 %v1183_v3, %v1161_v60  ;;  %v5114_v37 = vadd.f32 %v1184_v58, %v5053_v16  ;;  %v1223_v15 = vadd.f32 %v1219_v22, %v1217_v44  ;;  %v1265_v25 = vstv %s5078_s22  ;;  %s5172_s22 = sld [smem:[#allocation4 + $0x9]] }
 0x176   : >> { %v1229_v26 = vstv %s5080_s0  ;;  %v1260_v13 = vmul.f32 %v1259_v63, %v6522_v35  ;;  %v1261_v11 = vmul.f32 %v1259_v63, %v6523_v56  ;;  %v1262_v21 = vmul.f32 %v1259_v63, %v6524_v34  ;;  %s5176_s0 = sld [smem:[#allocation3 + $0xa]] }
 0x177   : >> { %v1224_v52 = vmax.f32 %v1220_v42, 0.0  ;;  %v1225_v6 = vmax.f32 %v1221_v7, 0.0  ;;  %v1226_v17 = vmax.f32 %v1222_v61, 0.0  ;;  %v1263_v12 = vmul.f32 %v1259_v63, %v6526_v40 }
 0x178   : >> { %v1266_v16 = vmul.f32 %v1265_v25, %v6525_v59  ;;  %v1267_v60 = vmul.f32 %v1265_v25, %v6527_v62  ;;  %v1268_v3 = vmul.f32 %v1265_v25, %v6528_v31  ;;  %v1269_v22 = vmul.f32 %v1265_v25, %v6529_v28 }
 0x179   : >> { %v5129_v14 = vadd.f32 %v1185_v32, %v5055_v20  ;;  %v5132_v53 = vadd.f32 %v1186_v8, %v5058_v54  ;;  %v5135_v24 = vadd.f32 %v1187_v45, %v5060_v10  ;;  %v1227_v1 = vmax.f32 %v1223_v15, 0.0 }
 0x17a   : >> { %v1239_v9 = vstv %s5086_s1  ;;  %v1249_v5 = vstv %s5092_s18  ;;  %v1275_v47 = vstv %s5094_s26  ;;  %v1285_v50 = vstv %s5102_s27  ;;  %s5193_s1 = sld [smem:[#allocation3 + $0x2a]] }
 0x17b   : >> { %v1230_v49 = vmul.f32 %v1229_v26, %v1224_v52  ;;  %v1231_v2 = vmul.f32 %v1229_v26, %v1225_v6  ;;  %v1232_v58 = vmul.f32 %v1229_v26, %v1226_v17  ;;  %v5144_v27 = vstv %s5105_s19  ;;  %s5206_s18 = sld [smem:[#allocation5 + $0x1b]] }
 0x17c   : >> { %v1270_v20 = vadd.f32 %v1266_v16, %v1260_v13  ;;  %v1271_v23 = vadd.f32 %v1267_v60, %v1261_v11  ;;  %v1272_v30 = vadd.f32 %v1268_v3, %v1262_v21  ;;  %v1273_v54 = vadd.f32 %v1269_v22, %v1263_v12  ;;  %s5214_s26 = sld [smem:[#allocation5 + $0x1c]] }
 0x17d   : >> { %v1233_v44 = vmul.f32 %v1229_v26, %v1227_v1  ;;  %v1240_v42 = vmul.f32 %v1239_v9, %v1224_v52  ;;  %v1241_v10 = vmul.f32 %v1239_v9, %v1225_v6  ;;  %v1242_v7 = vmul.f32 %v1239_v9, %v1226_v17  ;;  %s5217_s27 = sld [smem:[#allocation3 + $0x4a]] }
 0x17e   : >> { %v1276_v61 = vmul.f32 %v1275_v47, %v6530_v46  ;;  %v1277_v63 = vmul.f32 %v1275_v47, %v6531_v33  ;;  %v1278_v32 = vmul.f32 %v1275_v47, %v6532_v29  ;;  %v1279_v8 = vmul.f32 %v1275_v47, %v6533_v43  ;;  %s5226_s19 = sld [smem:[#allocation5 + $0x1d]] }
 0x17f   : >> { %v1234_v45 = vadd.f32 %v1230_v49, %v5088_v48  ;;  %v1235_v15 = vadd.f32 %v1231_v2, %v5090_v38  ;;  %v5152_v25 = vadd.f32 %v1232_v58, %v1170_v36  ;;  %v1243_v26 = vmul.f32 %v1239_v9, %v1227_v1 }
 0x180   : >> { %v1280_v13 = vadd.f32 %v1276_v61, %v1270_v20  ;;  %v1281_v11 = vadd.f32 %v1277_v63, %v1271_v23  ;;  %v1282_v21 = vadd.f32 %v1278_v32, %v1272_v30  ;;  %v1283_v12 = vadd.f32 %v1279_v8, %v1273_v54 }
 0x181   : >> { %v1237_v16 = vadd.f32 %v1233_v44, %v5096_v41  ;;  %v5158_v60 = vadd.f32 %v1240_v42, %v5098_v0  ;;  %v1325_v3 = vstv %s5126_s28  ;;  %v1331_v48 = vstv %s5137_s29  ;;  %s5237_s28 = sld [smem:[#allocation4 + $0xa]] }
 0x182   : >> { %v1286_v22 = vadd.f32 %v1285_v50, %v1280_v13  ;;  %v1287_v38 = vadd.f32 %v1285_v50, %v1281_v11  ;;  %v1288_v36 = vadd.f32 %v1285_v50, %v1282_v21  ;;  %v1289_v47 = vadd.f32 %v1285_v50, %v1283_v12  ;;  %s5244_s29 = sld [smem:[#allocation5 + $0x1e]] }
 0x183   : >> { %v1245_v9 = vadd.f32 %v1241_v10, %v5100_v18  ;;  %v1246_v49 = vadd.f32 %v1242_v7, %v5108_v4  ;;  %v1250_v2 = vmul.f32 %v1249_v5, %v1224_v52  ;;  %v1251_v58 = vmul.f32 %v1249_v5, %v1225_v6 }
 0x184   : >> { %v1252_v41 = vmul.f32 %v1249_v5, %v1226_v17  ;;  %v1253_v20 = vmul.f32 %v1249_v5, %v1227_v1  ;;  %v1290_v0 = vmax.f32 %v1286_v22, 0.0  ;;  %v1291_v23 = vmax.f32 %v1287_v38, 0.0 }
 0x185   : >> { %v1326_v30 = vmul.f32 %v1325_v3, %v6522_v35  ;;  %v1327_v54 = vmul.f32 %v1325_v3, %v6523_v56  ;;  %v1328_v44 = vmul.f32 %v1325_v3, %v6524_v34  ;;  %v1332_v50 = vmul.f32 %v1331_v48, %v6525_v59 }
 0x186   : >> { %v1292_v18 = vmax.f32 %v1288_v36, 0.0  ;;  %v1293_v4 = vmax.f32 %v1289_v47, 0.0  ;;  %v1333_v52 = vmul.f32 %v1331_v48, %v6527_v62  ;;  %v1334_v6 = vmul.f32 %v1331_v48, %v6528_v31 }
 0x187   : >> { %v1247_v17 = vadd.f32 %v1243_v26, %v5111_v19  ;;  %v5180_v1 = vadd.f32 %v1250_v2, %v5114_v37  ;;  %v1329_v5 = vmul.f32 %v1325_v3, %v6526_v40  ;;  %v1335_v42 = vmul.f32 %v1331_v48, %v6529_v28 }
 0x188   : >> { %v5185_v10 = vadd.f32 %v1251_v58, %v5129_v14  ;;  %v1296_v7 = vmul.f32 %v5144_v27, %v1290_v0  ;;  %v1297_v61 = vmul.f32 %v5144_v27, %v1291_v23  ;;  %v1305_v63 = vstv %s5154_s25  ;;  %s5246_s25 = sld [smem:[#allocation5 + $0x1f]] }
 0x189   : >> { %v1256_v32 = vadd.f32 %v1252_v41, %v5132_v53  ;;  %v1257_v19 = vadd.f32 %v1253_v20, %v5135_v24  ;;  %v1315_v8 = vstv %s5160_s21  ;;  %v1336_v37 = vadd.f32 %v1332_v50, %v1326_v30  ;;  %s5249_s21 = sld [smem:[#allocation5 + $0x20]] }
 0x18a   : >> { %v1298_v26 = vmul.f32 %v5144_v27, %v1292_v18  ;;  %v1299_v13 = vmul.f32 %v5144_v27, %v1293_v4  ;;  %v1337_v14 = vadd.f32 %v1333_v52, %v1327_v54  ;;  %v1338_v11 = vadd.f32 %v1334_v6, %v1328_v44 }
 0x18b   : >> { %v1306_v21 = vmul.f32 %v1305_v63, %v1290_v0  ;;  %v1307_v12 = vmul.f32 %v1305_v63, %v1291_v23  ;;  %v1339_v3 = vadd.f32 %v1335_v42, %v1329_v5  ;;  %v1341_v48 = vstv %s5166_s16  ;;  %s5255_s16 = sld [smem:[#allocation3 + $0xb]] }
 0x18c   : >> { %v5198_v22 = vadd.f32 %v1296_v7, %v1234_v45  ;;  %v5200_v53 = vadd.f32 %v1297_v61, %v1235_v15  ;;  %v1308_v24 = vmul.f32 %v1305_v63, %v1292_v18  ;;  %v1309_v38 = vmul.f32 %v1305_v63, %v1293_v4 }
 0x18d   : >> { %v1342_v36 = vmul.f32 %v1341_v48, %v6530_v46  ;;  %v1343_v47 = vmul.f32 %v1341_v48, %v6531_v33  ;;  %v1344_v27 = vmul.f32 %v1341_v48, %v6532_v29  ;;  %v1345_v2 = vmul.f32 %v1341_v48, %v6533_v43 }
 0x18e   : >> { %v5209_v58 = vadd.f32 %v1298_v26, %v5152_v25  ;;  %v5211_v41 = vadd.f32 %v1299_v13, %v1237_v16  ;;  %v1351_v45 = vstv %s5172_s22  ;;  %v1391_v15 = vstv %s5176_s0  ;;  %s5257_s22 = sld [smem:[#allocation3 + $0x2b]] }
 0x18f   : >> { %v1346_v20 = vadd.f32 %v1342_v36, %v1336_v37  ;;  %v1347_v30 = vadd.f32 %v1343_v47, %v1337_v14  ;;  %v1348_v54 = vadd.f32 %v1344_v27, %v1338_v11  ;;  %v1349_v44 = vadd.f32 %v1345_v2, %v1339_v3  ;;  %s5259_s0 = sld [smem:[#allocation3 + $0x4b]] }
 0x190   : >> { %v5220_v50 = vadd.f32 %v1306_v21, %v5158_v60  ;;  %v5222_v52 = vadd.f32 %v1307_v12, %v1245_v9  ;;  %v5224_v25 = vadd.f32 %v1308_v24, %v1246_v49  ;;  %v1316_v16 = vmul.f32 %v1315_v8, %v1290_v0 }
 0x191   : >> { %v1352_v6 = vadd.f32 %v1351_v45, %v1346_v20  ;;  %v1353_v5 = vadd.f32 %v1351_v45, %v1347_v30  ;;  %v1354_v42 = vadd.f32 %v1351_v45, %v1348_v54  ;;  %v1397_v7 = vstv %s5193_s1  ;;  %s5263_s1 = sld [smem:[#allocation4 + $0xb]] }
 0x192   : >> { %v1317_v61 = vmul.f32 %v1315_v8, %v1291_v23  ;;  %v1318_v63 = vmul.f32 %v1315_v8, %v1292_v18  ;;  %v1319_v37 = vmul.f32 %v1315_v8, %v1293_v4  ;;  %v1392_v26 = vmul.f32 %v1391_v15, %v6522_v35 }
 0x193   : >> { %v1355_v13 = vadd.f32 %v1351_v45, %v1349_v44  ;;  %v1393_v60 = vmul.f32 %v1391_v15, %v6523_v56  ;;  %v1394_v9 = vmul.f32 %v1391_v15, %v6524_v34  ;;  %v1395_v49 = vmul.f32 %v1391_v15, %v6526_v40 }
 0x194   : >> { %v1398_v0 = vmul.f32 %v1397_v7, %v6525_v59  ;;  %v1399_v14 = vmul.f32 %v1397_v7, %v6527_v62  ;;  %v1400_v23 = vmul.f32 %v1397_v7, %v6528_v31  ;;  %v1401_v18 = vmul.f32 %v1397_v7, %v6529_v28 }
 0x195   : >> { %v1313_v4 = vadd.f32 %v1309_v38, %v1247_v17  ;;  %v1356_v8 = vmax.f32 %v1352_v6, 0.0  ;;  %v1357_v11 = vmax.f32 %v1353_v5, 0.0  ;;  %v1358_v21 = vmax.f32 %v1354_v42, 0.0 }
 0x196   : >> { %v1320_v12 = vadd.f32 %v1316_v16, %v5180_v1  ;;  %v1321_v3 = vadd.f32 %v1317_v61, %v5185_v10  ;;  %v1361_v48 = vstv %s5206_s18  ;;  %v1371_v24 = vstv %s5214_s26  ;;  %s5294_s18 = sld [smem:[#allocation3 + $0xc]] }
 0x197   : >> { %v1322_v36 = vadd.f32 %v1318_v63, %v1256_v32  ;;  %v1323_v47 = vadd.f32 %v1319_v37, %v1257_v19  ;;  %v1359_v27 = vmax.f32 %v1355_v13, 0.0  ;;  %v1407_v2 = vstv %s5217_s27  ;;  %s5300_s26 = sld [smem:[#allocation3 + $0x2c]] }
 0x198   : >> { %v1402_v45 = vadd.f32 %v1398_v0, %v1392_v26  ;;  %v1403_v17 = vadd.f32 %v1399_v14, %v1393_v60  ;;  %v1404_v38 = vadd.f32 %v1400_v23, %v1394_v9  ;;  %v1405_v15 = vadd.f32 %v1401_v18, %v1395_v49  ;;  %s5302_s27 = sld [smem:[#allocation5 + $0x21]] }
 0x199   : >> { %v1362_v20 = vmul.f32 %v1361_v48, %v1356_v8  ;;  %v1363_v30 = vmul.f32 %v1361_v48, %v1357_v11  ;;  %v1364_v1 = vmul.f32 %v1361_v48, %v1358_v21  ;;  %v1381_v54 = vstv %s5226_s19  ;;  %s5308_s19 = sld [smem:[#allocation5 + $0x22]] }
 0x19a   : >> { %v1408_v10 = vmul.f32 %v1407_v2, %v6530_v46  ;;  %v1409_v32 = vmul.f32 %v1407_v2, %v6531_v33  ;;  %v1410_v19 = vmul.f32 %v1407_v2, %v6532_v29  ;;  %v1411_v44 = vmul.f32 %v1407_v2, %v6533_v43 }
 0x19b   : >> { %v1365_v16 = vmul.f32 %v1361_v48, %v1359_v27  ;;  %v1372_v6 = vmul.f32 %v1371_v24, %v1356_v8  ;;  %v1373_v5 = vmul.f32 %v1371_v24, %v1357_v11  ;;  %v1374_v42 = vmul.f32 %v1371_v24, %v1358_v21 }
 0x19c   : >> { %v1412_v7 = vadd.f32 %v1408_v10, %v1402_v45  ;;  %v1413_v61 = vadd.f32 %v1409_v32, %v1403_v17  ;;  %v1414_v63 = vadd.f32 %v1410_v19, %v1404_v38  ;;  %v1415_v37 = vadd.f32 %v1411_v44, %v1405_v15 }
 0x19d   : >> { %v1375_v26 = vmul.f32 %v1371_v24, %v1359_v27  ;;  %v1382_v13 = vmul.f32 %v1381_v54, %v1356_v8  ;;  %v1383_v60 = vmul.f32 %v1381_v54, %v1357_v11  ;;  %v1417_v9 = vstv %s5237_s28  ;;  %s5314_s28 = sld [smem:[#allocation5 + $0x23]] }
 0x19e   : >> { %v1366_v49 = vadd.f32 %v1362_v20, %v5198_v22  ;;  %v1418_v0 = vadd.f32 %v1417_v9, %v1412_v7  ;;  %v1419_v14 = vadd.f32 %v1417_v9, %v1413_v61  ;;  %v1420_v23 = vadd.f32 %v1417_v9, %v1414_v63 }
 0x19f   : >> { %v1367_v18 = vadd.f32 %v1363_v30, %v5200_v53  ;;  %v1368_v48 = vadd.f32 %v1364_v1, %v5209_v58  ;;  %v1384_v2 = vmul.f32 %v1381_v54, %v1358_v21  ;;  %v1385_v45 = vmul.f32 %v1381_v54, %v1359_v27 }
 0x1a0   : >> { %v1369_v8 = vadd.f32 %v1365_v16, %v5211_v41  ;;  %v1376_v11 = vadd.f32 %v1372_v6, %v5220_v50  ;;  %v1377_v22 = vadd.f32 %v1373_v5, %v5222_v52  ;;  %v1421_v24 = vadd.f32 %v1417_v9, %v1415_v37 }
 0x1a1   : >> { %v5271_v17 = vadd.f32 %v1374_v42, %v5224_v25  ;;  %v5273_v53 = vadd.f32 %v1375_v26, %v1313_v4  ;;  %v5275_v58 = vadd.f32 %v1382_v13, %v1320_v12  ;;  %v5277_v21 = vadd.f32 %v1383_v60, %v1321_v3 }
 0x1a2   : >> { %v1422_v27 = vmax.f32 %v1418_v0, 0.0  ;;  %v1423_v38 = vmax.f32 %v1419_v14, 0.0  ;;  %v1424_v41 = vmax.f32 %v1420_v23, 0.0  ;;  %v1457_v15 = vstv %s5255_s16  ;;  %s5348_s16 = sld [smem:[#allocation3 + $0xd]] }
 0x1a3   : >> { %v5280_v50 = vadd.f32 %v1384_v2, %v1322_v36  ;;  %v5282_v52 = vadd.f32 %v1385_v45, %v1323_v47  ;;  %v1427_v20 = vstv %s5244_s29  ;;  %v1437_v30 = vstv %s5246_s25  ;;  %s5316_s29 = sld [smem:[#allocation3 + $0x4c]] }
 0x1a4   : >> { %v1425_v1 = vmax.f32 %v1421_v24, 0.0  ;;  %v1447_v25 = vstv %s5249_s21  ;;  %v1463_v54 = vstv %s5257_s22  ;;  %v1473_v4 = vstv %s5259_s0  ;;  %s5324_s25 = sld [smem:[#allocation4 + $0xc]] }
 0x1a5   : >> { %v1458_v12 = vmul.f32 %v1457_v15, %v6522_v35  ;;  %v1459_v3 = vmul.f32 %v1457_v15, %v6523_v56  ;;  %v1460_v10 = vmul.f32 %v1457_v15, %v6524_v34  ;;  %v1461_v32 = vmul.f32 %v1457_v15, %v6526_v40  ;;  %s5327_s21 = sld [smem:[#allocation5 + $0x24]] }
 0x1a6   : >> { %v1428_v19 = vmul.f32 %v1427_v20, %v1422_v27  ;;  %v1429_v44 = vmul.f32 %v1427_v20, %v1423_v38  ;;  %v1430_v36 = vmul.f32 %v1427_v20, %v1424_v41  ;;  %v1483_v16 = vstv %s5263_s1  ;;  %s5359_s22 = sld [smem:[#allocation3 + $0x2d]] }
 0x1a7   : >> { %v1464_v47 = vmul.f32 %v1463_v54, %v6525_v59  ;;  %v1465_v6 = vmul.f32 %v1463_v54, %v6527_v62  ;;  %v1466_v5 = vmul.f32 %v1463_v54, %v6528_v31  ;;  %v1467_v42 = vmul.f32 %v1463_v54, %v6529_v28  ;;  %s5376_s0 = sld [smem:[#allocation5 + $0x25]] }
 0x1a8   : >> { %v1431_v7 = vmul.f32 %v1427_v20, %v1425_v1  ;;  %v1438_v61 = vmul.f32 %v1437_v30, %v1422_v27  ;;  %v1439_v63 = vmul.f32 %v1437_v30, %v1423_v38  ;;  %v1440_v37 = vmul.f32 %v1437_v30, %v1424_v41  ;;  %s5382_s1 = sld [smem:[#allocation5 + $0x26]] }
 0x1a9   : >> { %v1468_v26 = vadd.f32 %v1464_v47, %v1458_v12  ;;  %v1469_v13 = vadd.f32 %v1465_v6, %v1459_v3  ;;  %v1470_v60 = vadd.f32 %v1466_v5, %v1460_v10  ;;  %v1471_v9 = vadd.f32 %v1467_v42, %v1461_v32 }
 0x1aa   : >> { %v1474_v0 = vmul.f32 %v1473_v4, %v6530_v46  ;;  %v1475_v14 = vmul.f32 %v1473_v4, %v6531_v33  ;;  %v1476_v23 = vmul.f32 %v1473_v4, %v6532_v29  ;;  %v1477_v2 = vmul.f32 %v1473_v4, %v6533_v43 }
 0x1ab   : >> { %v5310_v45 = vadd.f32 %v1428_v19, %v1366_v49  ;;  %v5312_v24 = vadd.f32 %v1429_v44, %v1367_v18  ;;  %v1441_v15 = vmul.f32 %v1437_v30, %v1425_v1  ;;  %v1448_v20 = vmul.f32 %v1447_v25, %v1422_v27 }
 0x1ac   : >> { %v1478_v54 = vadd.f32 %v1474_v0, %v1468_v26  ;;  %v1479_v12 = vadd.f32 %v1475_v14, %v1469_v13  ;;  %v1480_v3 = vadd.f32 %v1476_v23, %v1470_v60  ;;  %v1481_v10 = vadd.f32 %v1477_v2, %v1471_v9 }
 0x1ad   : >> { %v1434_v32 = vadd.f32 %v1430_v36, %v1368_v48  ;;  %v5318_v47 = vadd.f32 %v1431_v7, %v1369_v8  ;;  %v5320_v4 = vadd.f32 %v1438_v61, %v1376_v11  ;;  %v5322_v49 = vadd.f32 %v1439_v63, %v1377_v22 }
 0x1ae   : >> { %v1484_v18 = vadd.f32 %v1483_v16, %v1478_v54  ;;  %v1485_v27 = vadd.f32 %v1483_v16, %v1479_v12  ;;  %v1486_v30 = vadd.f32 %v1483_v16, %v1480_v3  ;;  %v1523_v19 = vstv %s5294_s18  ;;  %s5388_s18 = sld [smem:[#allocation3 + $0x4d]] }
 0x1af   : >> { %v5330_v44 = vadd.f32 %v1440_v37, %v5271_v17  ;;  %v5333_v48 = vadd.f32 %v1441_v15, %v5273_v53  ;;  %v1449_v8 = vmul.f32 %v1447_v25, %v1423_v38  ;;  %v1450_v11 = vmul.f32 %v1447_v25, %v1424_v41 }
 0x1b0   : >> { %v1451_v36 = vmul.f32 %v1447_v25, %v1425_v1  ;;  %v5336_v22 = vadd.f32 %v1448_v20, %v5275_v58  ;;  %v1487_v6 = vadd.f32 %v1483_v16, %v1481_v10  ;;  %v1529_v5 = vstv %s5300_s26  ;;  %s5394_s26 = sld [smem:[#allocation4 + $0xd]] }
 0x1b1   : >> { %v1493_v42 = vstv %s5302_s27  ;;  %v1524_v7 = vmul.f32 %v1523_v19, %v6522_v35  ;;  %v1525_v61 = vmul.f32 %v1523_v19, %v6523_v56  ;;  %v1526_v17 = vmul.f32 %v1523_v19, %v6524_v34  ;;  %s5398_s27 = sld [smem:[#allocation3 + $0xe]] }
 0x1b2   : >> { %v1488_v63 = vmax.f32 %v1484_v18, 0.0  ;;  %v1489_v53 = vmax.f32 %v1485_v27, 0.0  ;;  %v1490_v38 = vmax.f32 %v1486_v30, 0.0  ;;  %v1527_v41 = vmul.f32 %v1523_v19, %v6526_v40 }
 0x1b3   : >> { %v1530_v58 = vmul.f32 %v1529_v5, %v6525_v59  ;;  %v1531_v1 = vmul.f32 %v1529_v5, %v6527_v62  ;;  %v1532_v25 = vmul.f32 %v1529_v5, %v6528_v31  ;;  %v1533_v16 = vmul.f32 %v1529_v5, %v6529_v28 }
 0x1b4   : >> { %v5351_v37 = vadd.f32 %v1449_v8, %v5277_v21  ;;  %v5354_v26 = vadd.f32 %v1450_v11, %v5280_v50  ;;  %v5357_v13 = vadd.f32 %v1451_v36, %v5282_v52  ;;  %v1491_v60 = vmax.f32 %v1487_v6, 0.0 }
 0x1b5   : >> { %v1503_v9 = vstv %s5308_s19  ;;  %v1513_v0 = vstv %s5314_s28  ;;  %v1539_v14 = vstv %s5316_s29  ;;  %v1549_v23 = vstv %s5324_s25  ;;  %s5415_s19 = sld [smem:[#allocation3 + $0x2e]] }
 0x1b6   : >> { %v1494_v2 = vmul.f32 %v1493_v42, %v1488_v63  ;;  %v1495_v15 = vmul.f32 %v1493_v42, %v1489_v53  ;;  %v1496_v20 = vmul.f32 %v1493_v42, %v1490_v38  ;;  %v5366_v54 = vstv %s5327_s21  ;;  %s5428_s28 = sld [smem:[#allocation5 + $0x27]] }
 0x1b7   : >> { %v1534_v21 = vadd.f32 %v1530_v58, %v1524_v7  ;;  %v1535_v12 = vadd.f32 %v1531_v1, %v1525_v61  ;;  %v1536_v3 = vadd.f32 %v1532_v25, %v1526_v17  ;;  %v1537_v50 = vadd.f32 %v1533_v16, %v1527_v41  ;;  %s5436_s29 = sld [smem:[#allocation5 + $0x28]] }
 0x1b8   : >> { %v1497_v10 = vmul.f32 %v1493_v42, %v1491_v60  ;;  %v1504_v18 = vmul.f32 %v1503_v9, %v1488_v63  ;;  %v1505_v52 = vmul.f32 %v1503_v9, %v1489_v53  ;;  %v1506_v27 = vmul.f32 %v1503_v9, %v1490_v38  ;;  %s5439_s25 = sld [smem:[#allocation3 + $0x4e]] }
 0x1b9   : >> { %v1540_v30 = vmul.f32 %v1539_v14, %v6530_v46  ;;  %v1541_v19 = vmul.f32 %v1539_v14, %v6531_v33  ;;  %v1542_v8 = vmul.f32 %v1539_v14, %v6532_v29  ;;  %v1543_v11 = vmul.f32 %v1539_v14, %v6533_v43  ;;  %s5448_s21 = sld [smem:[#allocation5 + $0x29]] }
 0x1ba   : >> { %v1498_v36 = vadd.f32 %v1494_v2, %v5310_v45  ;;  %v1499_v6 = vadd.f32 %v1495_v15, %v5312_v24  ;;  %v5374_v5 = vadd.f32 %v1496_v20, %v1434_v32  ;;  %v1507_v42 = vmul.f32 %v1503_v9, %v1491_v60 }
 0x1bb   : >> { %v1544_v7 = vadd.f32 %v1540_v30, %v1534_v21  ;;  %v1545_v61 = vadd.f32 %v1541_v19, %v1535_v12  ;;  %v1546_v17 = vadd.f32 %v1542_v8, %v1536_v3  ;;  %v1547_v41 = vadd.f32 %v1543_v11, %v1537_v50 }
 0x1bc   : >> { %v1501_v58 = vadd.f32 %v1497_v10, %v5318_v47  ;;  %v5380_v1 = vadd.f32 %v1504_v18, %v5320_v4  ;;  %v1589_v25 = vstv %s5348_s16  ;;  %v1595_v45 = vstv %s5359_s22  ;;  %s5459_s16 = sld [smem:[#allocation4 + $0xe]] }
 0x1bd   : >> { %v1550_v16 = vadd.f32 %v1549_v23, %v1544_v7  ;;  %v1551_v24 = vadd.f32 %v1549_v23, %v1545_v61  ;;  %v1552_v32 = vadd.f32 %v1549_v23, %v1546_v17  ;;  %v1553_v14 = vadd.f32 %v1549_v23, %v1547_v41  ;;  %s5466_s22 = sld [smem:[#allocation5 + $0x2a]] }
 0x1be   : >> { %v1509_v9 = vadd.f32 %v1505_v52, %v5322_v49  ;;  %v1510_v2 = vadd.f32 %v1506_v27, %v5330_v44  ;;  %v1514_v15 = vmul.f32 %v1513_v0, %v1488_v63  ;;  %v1515_v20 = vmul.f32 %v1513_v0, %v1489_v53 }
 0x1bf   : >> { %v1516_v47 = vmul.f32 %v1513_v0, %v1490_v38  ;;  %v1517_v21 = vmul.f32 %v1513_v0, %v1491_v60  ;;  %v1554_v4 = vmax.f32 %v1550_v16, 0.0  ;;  %v1555_v12 = vmax.f32 %v1551_v24, 0.0 }
 0x1c0   : >> { %v1590_v3 = vmul.f32 %v1589_v25, %v6522_v35  ;;  %v1591_v50 = vmul.f32 %v1589_v25, %v6523_v56  ;;  %v1592_v10 = vmul.f32 %v1589_v25, %v6524_v34  ;;  %v1596_v23 = vmul.f32 %v1595_v45, %v6525_v59 }
 0x1c1   : >> { %v1556_v49 = vmax.f32 %v1552_v32, 0.0  ;;  %v1557_v44 = vmax.f32 %v1553_v14, 0.0  ;;  %v1597_v63 = vmul.f32 %v1595_v45, %v6527_v62  ;;  %v1598_v53 = vmul.f32 %v1595_v45, %v6528_v31 }
 0x1c2   : >> { %v1511_v38 = vadd.f32 %v1507_v42, %v5333_v48  ;;  %v5402_v60 = vadd.f32 %v1514_v15, %v5336_v22  ;;  %v1593_v0 = vmul.f32 %v1589_v25, %v6526_v40  ;;  %v1599_v18 = vmul.f32 %v1595_v45, %v6529_v28 }
 0x1c3   : >> { %v5407_v52 = vadd.f32 %v1515_v20, %v5351_v37  ;;  %v1560_v27 = vmul.f32 %v5366_v54, %v1554_v4  ;;  %v1561_v30 = vmul.f32 %v5366_v54, %v1555_v12  ;;  %v1569_v19 = vstv %s5376_s0  ;;  %s5468_s0 = sld [smem:[#allocation5 + $0x2b]] }
 0x1c4   : >> { %v1520_v8 = vadd.f32 %v1516_v47, %v5354_v26  ;;  %v1521_v48 = vadd.f32 %v1517_v21, %v5357_v13  ;;  %v1579_v11 = vstv %s5382_s1  ;;  %v1600_v22 = vadd.f32 %v1596_v23, %v1590_v3  ;;  %s5471_s1 = sld [smem:[#allocation5 + $0x2c]] }
 0x1c5   : >> { %v1562_v42 = vmul.f32 %v5366_v54, %v1556_v49  ;;  %v1563_v7 = vmul.f32 %v5366_v54, %v1557_v44  ;;  %v1601_v37 = vadd.f32 %v1597_v63, %v1591_v50  ;;  %v1602_v61 = vadd.f32 %v1598_v53, %v1592_v10 }
 0x1c6   : >> { %v1570_v17 = vmul.f32 %v1569_v19, %v1554_v4  ;;  %v1571_v41 = vmul.f32 %v1569_v19, %v1555_v12  ;;  %v1603_v25 = vadd.f32 %v1599_v18, %v1593_v0  ;;  %v1605_v45 = vstv %s5388_s18  ;;  %s5477_s18 = sld [smem:[#allocation3 + $0xf]] }
 0x1c7   : >> { %v5420_v16 = vadd.f32 %v1560_v27, %v1498_v36  ;;  %v5422_v26 = vadd.f32 %v1561_v30, %v1499_v6  ;;  %v1572_v13 = vmul.f32 %v1569_v19, %v1556_v49  ;;  %v1573_v24 = vmul.f32 %v1569_v19, %v1557_v44 }
 0x1c8   : >> { %v1606_v32 = vmul.f32 %v1605_v45, %v6530_v46  ;;  %v1607_v14 = vmul.f32 %v1605_v45, %v6531_v33  ;;  %v1608_v54 = vmul.f32 %v1605_v45, %v6532_v29  ;;  %v1609_v15 = vmul.f32 %v1605_v45, %v6533_v43 }
 0x1c9   : >> { %v5431_v20 = vadd.f32 %v1562_v42, %v5374_v5  ;;  %v5433_v47 = vadd.f32 %v1563_v7, %v1501_v58  ;;  %v1615_v36 = vstv %s5394_s26  ;;  %v1655_v6 = vstv %s5398_s27  ;;  %s5479_s26 = sld [smem:[#allocation3 + $0x2f]] }
 0x1ca   : >> { %v1610_v21 = vadd.f32 %v1606_v32, %v1600_v22  ;;  %v1611_v3 = vadd.f32 %v1607_v14, %v1601_v37  ;;  %v1612_v50 = vadd.f32 %v1608_v54, %v1602_v61  ;;  %v1613_v10 = vadd.f32 %v1609_v15, %v1603_v25  ;;  %s5481_s27 = sld [smem:[#allocation3 + $0x4f]] }
 0x1cb   : >> { %v5442_v23 = vadd.f32 %v1570_v17, %v5380_v1  ;;  %v5444_v63 = vadd.f32 %v1571_v41, %v1509_v9  ;;  %v5446_v5 = vadd.f32 %v1572_v13, %v1510_v2  ;;  %v1580_v58 = vmul.f32 %v1579_v11, %v1554_v4 }
 0x1cc   : >> { %v1616_v53 = vadd.f32 %v1615_v36, %v1610_v21  ;;  %v1617_v0 = vadd.f32 %v1615_v36, %v1611_v3  ;;  %v1618_v18 = vadd.f32 %v1615_v36, %v1612_v50  ;;  %v1661_v27 = vstv %s5415_s19  ;;  %s5485_s19 = sld [smem:[#allocation4 + $0xf]] }
 0x1cd   : >> { %v1581_v30 = vmul.f32 %v1579_v11, %v1555_v12  ;;  %v1582_v19 = vmul.f32 %v1579_v11, %v1556_v49  ;;  %v1583_v22 = vmul.f32 %v1579_v11, %v1557_v44  ;;  %v1656_v42 = vmul.f32 %v1655_v6, %v6522_v35 }
 0x1ce   : >> { %v1619_v7 = vadd.f32 %v1615_v36, %v1613_v10  ;;  %v1657_v1 = vmul.f32 %v1655_v6, %v6523_v56  ;;  %v1658_v9 = vmul.f32 %v1655_v6, %v6524_v34  ;;  %v1659_v2 = vmul.f32 %v1655_v6, %v6526_v40 }
 0x1cf   : >> { %v1662_v4 = vmul.f32 %v1661_v27, %v6525_v59  ;;  %v1663_v37 = vmul.f32 %v1661_v27, %v6527_v62  ;;  %v1664_v12 = vmul.f32 %v1661_v27, %v6528_v31  ;;  %v1665_v49 = vmul.f32 %v1661_v27, %v6529_v28 }
 0x1d0   : >> { %v1577_v44 = vadd.f32 %v1573_v24, %v1511_v38  ;;  %v1620_v11 = vmax.f32 %v1616_v53, 0.0  ;;  %v1621_v61 = vmax.f32 %v1617_v0, 0.0  ;;  %v1622_v17 = vmax.f32 %v1618_v18, 0.0 }
 0x1d1   : >> { %v1584_v41 = vadd.f32 %v1580_v58, %v5402_v60  ;;  %v1585_v25 = vadd.f32 %v1581_v30, %v5407_v52  ;;  %v1625_v45 = vstv %s5428_s28  ;;  %v1635_v13 = vstv %s5436_s29  ;;  %s5516_s28 = sld [smem:[#allocation3 + $0x10]] }
 0x1d2   : >> { %v1586_v32 = vadd.f32 %v1582_v19, %v1520_v8  ;;  %v1587_v14 = vadd.f32 %v1583_v22, %v1521_v48  ;;  %v1623_v54 = vmax.f32 %v1619_v7, 0.0  ;;  %v1671_v15 = vstv %s5439_s25  ;;  %s5522_s29 = sld [smem:[#allocation3 + $0x30]] }
 0x1d3   : >> { %v1666_v36 = vadd.f32 %v1662_v4, %v1656_v42  ;;  %v1667_v38 = vadd.f32 %v1663_v37, %v1657_v1  ;;  %v1668_v24 = vadd.f32 %v1664_v12, %v1658_v9  ;;  %v1669_v6 = vadd.f32 %v1665_v49, %v1659_v2  ;;  %s5524_s25 = sld [smem:[#allocation5 + $0x2d]] }
 0x1d4   : >> { %v1626_v21 = vmul.f32 %v1625_v45, %v1620_v11  ;;  %v1627_v3 = vmul.f32 %v1625_v45, %v1621_v61  ;;  %v1628_v60 = vmul.f32 %v1625_v45, %v1622_v17  ;;  %v1645_v50 = vstv %s5448_s21  ;;  %s5530_s21 = sld [smem:[#allocation5 + $0x2e]] }
 0x1d5   : >> { %v1672_v52 = vmul.f32 %v1671_v15, %v6530_v46  ;;  %v1673_v8 = vmul.f32 %v1671_v15, %v6531_v33  ;;  %v1674_v48 = vmul.f32 %v1671_v15, %v6532_v29  ;;  %v1675_v10 = vmul.f32 %v1671_v15, %v6533_v43 }
 0x1d6   : >> { %v1629_v58 = vmul.f32 %v1625_v45, %v1623_v54  ;;  %v1636_v53 = vmul.f32 %v1635_v13, %v1620_v11  ;;  %v1637_v0 = vmul.f32 %v1635_v13, %v1621_v61  ;;  %v1638_v18 = vmul.f32 %v1635_v13, %v1622_v17 }
 0x1d7   : >> { %v1676_v27 = vadd.f32 %v1672_v52, %v1666_v36  ;;  %v1677_v30 = vadd.f32 %v1673_v8, %v1667_v38  ;;  %v1678_v19 = vadd.f32 %v1674_v48, %v1668_v24  ;;  %v1679_v22 = vadd.f32 %v1675_v10, %v1669_v6 }
 0x1d8   : >> { %v1639_v42 = vmul.f32 %v1635_v13, %v1623_v54  ;;  %v1646_v7 = vmul.f32 %v1645_v50, %v1620_v11  ;;  %v1647_v1 = vmul.f32 %v1645_v50, %v1621_v61  ;;  %v1681_v9 = vstv %s5459_s16  ;;  %s5536_s16 = sld [smem:[#allocation5 + $0x2f]] }
 0x1d9   : >> { %v1630_v2 = vadd.f32 %v1626_v21, %v5420_v16  ;;  %v1682_v4 = vadd.f32 %v1681_v9, %v1676_v27  ;;  %v1683_v37 = vadd.f32 %v1681_v9, %v1677_v30  ;;  %v1684_v12 = vadd.f32 %v1681_v9, %v1678_v19 }
 0x1da   : >> { %v1631_v49 = vadd.f32 %v1627_v3, %v5422_v26  ;;  %v1632_v45 = vadd.f32 %v1628_v60, %v5431_v20  ;;  %v1648_v15 = vmul.f32 %v1645_v50, %v1622_v17  ;;  %v1649_v36 = vmul.f32 %v1645_v50, %v1623_v54 }
 0x1db   : >> { %v1633_v11 = vadd.f32 %v1629_v58, %v5433_v47  ;;  %v1640_v61 = vadd.f32 %v1636_v53, %v5442_v23  ;;  %v1641_v16 = vadd.f32 %v1637_v0, %v5444_v63  ;;  %v1685_v13 = vadd.f32 %v1681_v9, %v1679_v22 }
 0x1dc   : >> { %v5493_v38 = vadd.f32 %v1638_v18, %v5446_v5  ;;  %v5495_v26 = vadd.f32 %v1639_v42, %v1577_v44  ;;  %v5497_v20 = vadd.f32 %v1646_v7, %v1584_v41  ;;  %v5499_v17 = vadd.f32 %v1647_v1, %v1585_v25 }
 0x1dd   : >> { %v1686_v54 = vmax.f32 %v1682_v4, 0.0  ;;  %v1687_v24 = vmax.f32 %v1683_v37, 0.0  ;;  %v1688_v47 = vmax.f32 %v1684_v12, 0.0  ;;  %v1721_v6 = vstv %s5477_s18  ;;  %s5570_s18 = sld [smem:[#allocation3 + $0x11]] }
 0x1de   : >> { %v5502_v23 = vadd.f32 %v1648_v15, %v1586_v32  ;;  %v5504_v63 = vadd.f32 %v1649_v36, %v1587_v14  ;;  %v1691_v21 = vstv %s5466_s22  ;;  %v1701_v3 = vstv %s5468_s0  ;;  %s5538_s22 = sld [smem:[#allocation3 + $0x50]] }
 0x1df   : >> { %v1689_v60 = vmax.f32 %v1685_v13, 0.0  ;;  %v1711_v5 = vstv %s5471_s1  ;;  %v1727_v50 = vstv %s5479_s26  ;;  %v1737_v44 = vstv %s5481_s27  ;;  %s5546_s0 = sld [smem:[#allocation4 + $0x10]] }
 0x1e0   : >> { %v1722_v41 = vmul.f32 %v1721_v6, %v6522_v35  ;;  %v1723_v25 = vmul.f32 %v1721_v6, %v6523_v56  ;;  %v1724_v52 = vmul.f32 %v1721_v6, %v6524_v34  ;;  %v1725_v8 = vmul.f32 %v1721_v6, %v6526_v40  ;;  %s5549_s1 = sld [smem:[#allocation5 + $0x30]] }
 0x1e1   : >> { %v1692_v48 = vmul.f32 %v1691_v21, %v1686_v54  ;;  %v1693_v10 = vmul.f32 %v1691_v21, %v1687_v24  ;;  %v1694_v32 = vmul.f32 %v1691_v21, %v1688_v47  ;;  %v1747_v58 = vstv %s5485_s19  ;;  %s5581_s26 = sld [smem:[#allocation3 + $0x31]] }
 0x1e2   : >> { %v1728_v14 = vmul.f32 %v1727_v50, %v6525_v59  ;;  %v1729_v53 = vmul.f32 %v1727_v50, %v6527_v62  ;;  %v1730_v0 = vmul.f32 %v1727_v50, %v6528_v31  ;;  %v1731_v18 = vmul.f32 %v1727_v50, %v6529_v28  ;;  %s5598_s27 = sld [smem:[#allocation5 + $0x31]] }
 0x1e3   : >> { %v1695_v27 = vmul.f32 %v1691_v21, %v1689_v60  ;;  %v1702_v30 = vmul.f32 %v1701_v3, %v1686_v54  ;;  %v1703_v19 = vmul.f32 %v1701_v3, %v1687_v24  ;;  %v1704_v22 = vmul.f32 %v1701_v3, %v1688_v47  ;;  %s5604_s19 = sld [smem:[#allocation5 + $0x32]] }
 0x1e4   : >> { %v1732_v42 = vadd.f32 %v1728_v14, %v1722_v41  ;;  %v1733_v7 = vadd.f32 %v1729_v53, %v1723_v25  ;;  %v1734_v1 = vadd.f32 %v1730_v0, %v1724_v52  ;;  %v1735_v9 = vadd.f32 %v1731_v18, %v1725_v8 }
 0x1e5   : >> { %v1738_v4 = vmul.f32 %v1737_v44, %v6530_v46  ;;  %v1739_v37 = vmul.f32 %v1737_v44, %v6531_v33  ;;  %v1740_v12 = vmul.f32 %v1737_v44, %v6532_v29  ;;  %v1741_v15 = vmul.f32 %v1737_v44, %v6533_v43 }
 0x1e6   : >> { %v5532_v36 = vadd.f32 %v1692_v48, %v1630_v2  ;;  %v5534_v13 = vadd.f32 %v1693_v10, %v1631_v49  ;;  %v1705_v6 = vmul.f32 %v1701_v3, %v1689_v60  ;;  %v1712_v21 = vmul.f32 %v1711_v5, %v1686_v54 }
 0x1e7   : >> { %v1742_v50 = vadd.f32 %v1738_v4, %v1732_v42  ;;  %v1743_v41 = vadd.f32 %v1739_v37, %v1733_v7  ;;  %v1744_v25 = vadd.f32 %v1740_v12, %v1734_v1  ;;  %v1745_v52 = vadd.f32 %v1741_v15, %v1735_v9 }
 0x1e8   : >> { %v1698_v8 = vadd.f32 %v1694_v32, %v1632_v45  ;;  %v5540_v14 = vadd.f32 %v1695_v27, %v1633_v11  ;;  %v5542_v44 = vadd.f32 %v1702_v30, %v1640_v61  ;;  %v5544_v2 = vadd.f32 %v1703_v19, %v1641_v16 }
 0x1e9   : >> { %v1748_v49 = vadd.f32 %v1747_v58, %v1742_v50  ;;  %v1749_v54 = vadd.f32 %v1747_v58, %v1743_v41  ;;  %v1750_v3 = vadd.f32 %v1747_v58, %v1744_v25  ;;  %v1787_v48 = vstv %s5516_s28  ;;  %s5610_s28 = sld [smem:[#allocation3 + $0x51]] }
 0x1ea   : >> { %v5552_v10 = vadd.f32 %v1704_v22, %v5493_v38  ;;  %v5555_v45 = vadd.f32 %v1705_v6, %v5495_v26  ;;  %v1713_v11 = vmul.f32 %v1711_v5, %v1687_v24  ;;  %v1714_v61 = vmul.f32 %v1711_v5, %v1688_v47 }
 0x1eb   : >> { %v1715_v32 = vmul.f32 %v1711_v5, %v1689_v60  ;;  %v5558_v16 = vadd.f32 %v1712_v21, %v5497_v20  ;;  %v1751_v53 = vadd.f32 %v1747_v58, %v1745_v52  ;;  %v1793_v0 = vstv %s5522_s29  ;;  %s5616_s29 = sld [smem:[#allocation4 + $0x11]] }
 0x1ec   : >> { %v1757_v18 = vstv %s5524_s25  ;;  %v1788_v27 = vmul.f32 %v1787_v48, %v6522_v35  ;;  %v1789_v30 = vmul.f32 %v1787_v48, %v6523_v56  ;;  %v1790_v38 = vmul.f32 %v1787_v48, %v6524_v34  ;;  %s5620_s25 = sld [smem:[#allocation3 + $0x12]] }
 0x1ed   : >> { %v1752_v19 = vmax.f32 %v1748_v49, 0.0  ;;  %v1753_v26 = vmax.f32 %v1749_v54, 0.0  ;;  %v1754_v24 = vmax.f32 %v1750_v3, 0.0  ;;  %v1791_v47 = vmul.f32 %v1787_v48, %v6526_v40 }
 0x1ee   : >> { %v1794_v20 = vmul.f32 %v1793_v0, %v6525_v59  ;;  %v1795_v60 = vmul.f32 %v1793_v0, %v6527_v62  ;;  %v1796_v5 = vmul.f32 %v1793_v0, %v6528_v31  ;;  %v1797_v58 = vmul.f32 %v1793_v0, %v6529_v28 }
 0x1ef   : >> { %v5573_v22 = vadd.f32 %v1713_v11, %v5499_v17  ;;  %v5576_v42 = vadd.f32 %v1714_v61, %v5502_v23  ;;  %v5579_v7 = vadd.f32 %v1715_v32, %v5504_v63  ;;  %v1755_v1 = vmax.f32 %v1751_v53, 0.0 }
 0x1f0   : >> { %v1767_v9 = vstv %s5530_s21  ;;  %v1777_v4 = vstv %s5536_s16  ;;  %v1803_v37 = vstv %s5538_s22  ;;  %v1813_v12 = vstv %s5546_s0  ;;  %s5637_s21 = sld [smem:[#allocation3 + $0x32]] }
 0x1f1   : >> { %v1758_v15 = vmul.f32 %v1757_v18, %v1752_v19  ;;  %v1759_v6 = vmul.f32 %v1757_v18, %v1753_v26  ;;  %v1760_v21 = vmul.f32 %v1757_v18, %v1754_v24  ;;  %v5588_v50 = vstv %s5549_s1  ;;  %s5650_s16 = sld [smem:[#allocation5 + $0x33]] }
 0x1f2   : >> { %v1798_v17 = vadd.f32 %v1794_v20, %v1788_v27  ;;  %v1799_v41 = vadd.f32 %v1795_v60, %v1789_v30  ;;  %v1800_v25 = vadd.f32 %v1796_v5, %v1790_v38  ;;  %v1801_v23 = vadd.f32 %v1797_v58, %v1791_v47  ;;  %s5658_s22 = sld [smem:[#allocation5 + $0x34]] }
 0x1f3   : >> { %v1761_v52 = vmul.f32 %v1757_v18, %v1755_v1  ;;  %v1768_v49 = vmul.f32 %v1767_v9, %v1752_v19  ;;  %v1769_v63 = vmul.f32 %v1767_v9, %v1753_v26  ;;  %v1770_v54 = vmul.f32 %v1767_v9, %v1754_v24  ;;  %s5661_s0 = sld [smem:[#allocation3 + $0x52]] }
 0x1f4   : >> { %v1804_v3 = vmul.f32 %v1803_v37, %v6530_v46  ;;  %v1805_v48 = vmul.f32 %v1803_v37, %v6531_v33  ;;  %v1806_v11 = vmul.f32 %v1803_v37, %v6532_v29  ;;  %v1807_v61 = vmul.f32 %v1803_v37, %v6533_v43  ;;  %s5670_s1 = sld [smem:[#allocation5 + $0x35]] }
 0x1f5   : >> { %v1762_v32 = vadd.f32 %v1758_v15, %v5532_v36  ;;  %v1763_v53 = vadd.f32 %v1759_v6, %v5534_v13  ;;  %v5596_v0 = vadd.f32 %v1760_v21, %v1698_v8  ;;  %v1771_v18 = vmul.f32 %v1767_v9, %v1755_v1 }
 0x1f6   : >> { %v1808_v27 = vadd.f32 %v1804_v3, %v1798_v17  ;;  %v1809_v30 = vadd.f32 %v1805_v48, %v1799_v41  ;;  %v1810_v38 = vadd.f32 %v1806_v11, %v1800_v25  ;;  %v1811_v47 = vadd.f32 %v1807_v61, %v1801_v23 }
 0x1f7   : >> { %v1765_v20 = vadd.f32 %v1761_v52, %v5540_v14  ;;  %v5602_v60 = vadd.f32 %v1768_v49, %v5542_v44  ;;  %v1853_v5 = vstv %s5570_s18  ;;  %v1859_v36 = vstv %s5581_s26  ;;  %s5681_s18 = sld [smem:[#allocation4 + $0x12]] }
 0x1f8   : >> { %v1814_v58 = vadd.f32 %v1813_v12, %v1808_v27  ;;  %v1815_v13 = vadd.f32 %v1813_v12, %v1809_v30  ;;  %v1816_v8 = vadd.f32 %v1813_v12, %v1810_v38  ;;  %v1817_v37 = vadd.f32 %v1813_v12, %v1811_v47  ;;  %s5688_s26 = sld [smem:[#allocation3 + $0x13]] }
 0x1f9   : >> { %v1773_v9 = vadd.f32 %v1769_v63, %v5544_v2  ;;  %v1774_v15 = vadd.f32 %v1770_v54, %v5552_v10  ;;  %v1778_v6 = vmul.f32 %v1777_v4, %v1752_v19  ;;  %v1779_v21 = vmul.f32 %v1777_v4, %v1753_v26 }
 0x1fa   : >> { %v1780_v14 = vmul.f32 %v1777_v4, %v1754_v24  ;;  %v1781_v17 = vmul.f32 %v1777_v4, %v1755_v1  ;;  %v1818_v44 = vmax.f32 %v1814_v58, 0.0  ;;  %v1819_v41 = vmax.f32 %v1815_v13, 0.0 }
 0x1fb   : >> { %v1854_v25 = vmul.f32 %v1853_v5, %v6522_v35  ;;  %v1855_v23 = vmul.f32 %v1853_v5, %v6523_v56  ;;  %v1856_v52 = vmul.f32 %v1853_v5, %v6524_v34  ;;  %v1860_v12 = vmul.f32 %v1859_v36, %v6525_v59 }
 0x1fc   : >> { %v1820_v2 = vmax.f32 %v1816_v8, 0.0  ;;  %v1821_v10 = vmax.f32 %v1817_v37, 0.0  ;;  %v1861_v19 = vmul.f32 %v1859_v36, %v6527_v62  ;;  %v1862_v26 = vmul.f32 %v1859_v36, %v6528_v31 }
 0x1fd   : >> { %v1775_v24 = vadd.f32 %v1771_v18, %v5555_v45  ;;  %v5624_v1 = vadd.f32 %v1778_v6, %v5558_v16  ;;  %v1857_v4 = vmul.f32 %v1853_v5, %v6526_v40  ;;  %v1863_v49 = vmul.f32 %v1859_v36, %v6529_v28 }
 0x1fe   : >> { %v5629_v63 = vadd.f32 %v1779_v21, %v5573_v22  ;;  %v1824_v54 = vmul.f32 %v5588_v50, %v1818_v44  ;;  %v1825_v3 = vmul.f32 %v5588_v50, %v1819_v41  ;;  %v1833_v48 = vstv %s5598_s27  ;;  %s5690_s27 = sld [smem:[#allocation3 + $0x33]] }
 0x1ff   : >> { %v1784_v11 = vadd.f32 %v1780_v14, %v5576_v42  ;;  %v1785_v45 = vadd.f32 %v1781_v17, %v5579_v7  ;;  %v1843_v61 = vstv %s5604_s19  ;;  %v1864_v16 = vadd.f32 %v1860_v12, %v1854_v25  ;;  %s5693_s19 = sld [smem:[#allocation5 + $0x36]] }
 0x200   : >> { %v1826_v18 = vmul.f32 %v5588_v50, %v1820_v2  ;;  %v1827_v27 = vmul.f32 %v5588_v50, %v1821_v10  ;;  %v1865_v22 = vadd.f32 %v1861_v19, %v1855_v23  ;;  %v1866_v30 = vadd.f32 %v1862_v26, %v1856_v52 }
 0x201   : >> { %v1834_v38 = vmul.f32 %v1833_v48, %v1818_v44  ;;  %v1835_v47 = vmul.f32 %v1833_v48, %v1819_v41  ;;  %v1867_v5 = vadd.f32 %v1863_v49, %v1857_v4  ;;  %v1869_v36 = vstv %s5610_s28  ;;  %s5699_s28 = sld [smem:[#allocation5 + $0x37]] }
 0x202   : >> { %v5642_v58 = vadd.f32 %v1824_v54, %v1762_v32  ;;  %v5644_v42 = vadd.f32 %v1825_v3, %v1763_v53  ;;  %v1836_v7 = vmul.f32 %v1833_v48, %v1820_v2  ;;  %v1837_v13 = vmul.f32 %v1833_v48, %v1821_v10 }
 0x203   : >> { %v1870_v8 = vmul.f32 %v1869_v36, %v6530_v46  ;;  %v1871_v37 = vmul.f32 %v1869_v36, %v6531_v33  ;;  %v1872_v50 = vmul.f32 %v1869_v36, %v6532_v29  ;;  %v1873_v6 = vmul.f32 %v1869_v36, %v6533_v43 }
 0x204   : >> { %v5653_v21 = vadd.f32 %v1826_v18, %v5596_v0  ;;  %v5655_v14 = vadd.f32 %v1827_v27, %v1765_v20  ;;  %v1879_v32 = vstv %s5616_s29  ;;  %v1919_v53 = vstv %s5620_s25  ;;  %s5701_s29 = sld [smem:[#allocation5 + $0x38]] }
 0x205   : >> { %v1874_v17 = vadd.f32 %v1870_v8, %v1864_v16  ;;  %v1875_v25 = vadd.f32 %v1871_v37, %v1865_v22  ;;  %v1876_v23 = vadd.f32 %v1872_v50, %v1866_v30  ;;  %v1877_v52 = vadd.f32 %v1873_v6, %v1867_v5  ;;  %s5703_s25 = sld [smem:[#allocation3 + $0x53]] }
 0x206   : >> { %v5664_v12 = vadd.f32 %v1834_v38, %v5602_v60  ;;  %v5666_v19 = vadd.f32 %v1835_v47, %v1773_v9  ;;  %v5668_v0 = vadd.f32 %v1836_v7, %v1774_v15  ;;  %v1844_v20 = vmul.f32 %v1843_v61, %v1818_v44 }
 0x207   : >> { %v1880_v26 = vadd.f32 %v1879_v32, %v1874_v17  ;;  %v1881_v4 = vadd.f32 %v1879_v32, %v1875_v25  ;;  %v1882_v49 = vadd.f32 %v1879_v32, %v1876_v23  ;;  %v1925_v54 = vstv %s5637_s21  ;;  %s5707_s21 = sld [smem:[#allocation4 + $0x13]] }
 0x208   : >> { %v1845_v3 = vmul.f32 %v1843_v61, %v1819_v41  ;;  %v1846_v48 = vmul.f32 %v1843_v61, %v1820_v2  ;;  %v1847_v16 = vmul.f32 %v1843_v61, %v1821_v10  ;;  %v1920_v18 = vmul.f32 %v1919_v53, %v6522_v35 }
 0x209   : >> { %v1883_v27 = vadd.f32 %v1879_v32, %v1877_v52  ;;  %v1921_v60 = vmul.f32 %v1919_v53, %v6523_v56  ;;  %v1922_v9 = vmul.f32 %v1919_v53, %v6524_v34  ;;  %v1923_v15 = vmul.f32 %v1919_v53, %v6526_v40 }
 0x20a   : >> { %v1926_v44 = vmul.f32 %v1925_v54, %v6525_v59  ;;  %v1927_v22 = vmul.f32 %v1925_v54, %v6527_v62  ;;  %v1928_v41 = vmul.f32 %v1925_v54, %v6528_v31  ;;  %v1929_v2 = vmul.f32 %v1925_v54, %v6529_v28 }
 0x20b   : >> { %v1841_v10 = vadd.f32 %v1837_v13, %v1775_v24  ;;  %v1884_v61 = vmax.f32 %v1880_v26, 0.0  ;;  %v1885_v30 = vmax.f32 %v1881_v4, 0.0  ;;  %v1886_v38 = vmax.f32 %v1882_v49, 0.0 }
 0x20c   : >> { %v1848_v47 = vadd.f32 %v1844_v20, %v5624_v1  ;;  %v1849_v5 = vadd.f32 %v1845_v3, %v5629_v63  ;;  %v1889_v36 = vstv %s5650_s16  ;;  %v1899_v7 = vstv %s5658_s22  ;;  %s5738_s16 = sld [smem:[#allocation3 + $0x14]] }
 0x20d   : >> { %v1850_v8 = vadd.f32 %v1846_v48, %v1784_v11  ;;  %v1851_v37 = vadd.f32 %v1847_v16, %v1785_v45  ;;  %v1887_v50 = vmax.f32 %v1883_v27, 0.0  ;;  %v1935_v6 = vstv %s5661_s0  ;;  %s5744_s22 = sld [smem:[#allocation3 + $0x34]] }
 0x20e   : >> { %v1930_v32 = vadd.f32 %v1926_v44, %v1920_v18  ;;  %v1931_v24 = vadd.f32 %v1927_v22, %v1921_v60  ;;  %v1932_v13 = vadd.f32 %v1928_v41, %v1922_v9  ;;  %v1933_v53 = vadd.f32 %v1929_v2, %v1923_v15  ;;  %s5746_s0 = sld [smem:[#allocation5 + $0x39]] }
 0x20f   : >> { %v1890_v17 = vmul.f32 %v1889_v36, %v1884_v61  ;;  %v1891_v25 = vmul.f32 %v1889_v36, %v1885_v30  ;;  %v1892_v1 = vmul.f32 %v1889_v36, %v1886_v38  ;;  %v1909_v23 = vstv %s5670_s1  ;;  %s5752_s1 = sld [smem:[#allocation5 + $0x3a]] }
 0x210   : >> { %v1936_v63 = vmul.f32 %v1935_v6, %v6530_v46  ;;  %v1937_v11 = vmul.f32 %v1935_v6, %v6531_v33  ;;  %v1938_v45 = vmul.f32 %v1935_v6, %v6532_v29  ;;  %v1939_v52 = vmul.f32 %v1935_v6, %v6533_v43 }
 0x211   : >> { %v1893_v20 = vmul.f32 %v1889_v36, %v1887_v50  ;;  %v1900_v26 = vmul.f32 %v1899_v7, %v1884_v61  ;;  %v1901_v4 = vmul.f32 %v1899_v7, %v1885_v30  ;;  %v1902_v49 = vmul.f32 %v1899_v7, %v1886_v38 }
 0x212   : >> { %v1940_v54 = vadd.f32 %v1936_v63, %v1930_v32  ;;  %v1941_v3 = vadd.f32 %v1937_v11, %v1931_v24  ;;  %v1942_v48 = vadd.f32 %v1938_v45, %v1932_v13  ;;  %v1943_v16 = vadd.f32 %v1939_v52, %v1933_v53 }
 0x213   : >> { %v1903_v18 = vmul.f32 %v1899_v7, %v1887_v50  ;;  %v1910_v27 = vmul.f32 %v1909_v23, %v1884_v61  ;;  %v1911_v60 = vmul.f32 %v1909_v23, %v1885_v30  ;;  %v1945_v9 = vstv %s5681_s18  ;;  %s5758_s18 = sld [smem:[#allocation5 + $0x3b]] }
 0x214   : >> { %v1894_v15 = vadd.f32 %v1890_v17, %v5642_v58  ;;  %v1946_v44 = vadd.f32 %v1945_v9, %v1940_v54  ;;  %v1947_v22 = vadd.f32 %v1945_v9, %v1941_v3  ;;  %v1948_v41 = vadd.f32 %v1945_v9, %v1942_v48 }
 0x215   : >> { %v1895_v2 = vadd.f32 %v1891_v25, %v5644_v42  ;;  %v1896_v36 = vadd.f32 %v1892_v1, %v5653_v21  ;;  %v1912_v6 = vmul.f32 %v1909_v23, %v1886_v38  ;;  %v1913_v32 = vmul.f32 %v1909_v23, %v1887_v50 }
 0x216   : >> { %v1897_v61 = vadd.f32 %v1893_v20, %v5655_v14  ;;  %v1904_v30 = vadd.f32 %v1900_v26, %v5664_v12  ;;  %v1905_v58 = vadd.f32 %v1901_v4, %v5666_v19  ;;  %v1949_v7 = vadd.f32 %v1945_v9, %v1943_v16 }
 0x217   : >> { %v5715_v24 = vadd.f32 %v1902_v49, %v5668_v0  ;;  %v5717_v42 = vadd.f32 %v1903_v18, %v1841_v10  ;;  %v5719_v21 = vadd.f32 %v1910_v27, %v1848_v47  ;;  %v5721_v38 = vadd.f32 %v1911_v60, %v1849_v5 }
 0x218   : >> { %v1950_v50 = vmax.f32 %v1946_v44, 0.0  ;;  %v1951_v13 = vmax.f32 %v1947_v22, 0.0  ;;  %v1952_v14 = vmax.f32 %v1948_v41, 0.0  ;;  %v1985_v53 = vstv %s5688_s26  ;;  %s5760_s26 = sld [smem:[#allocation3 + $0x54]] }
 0x219   : >> { %v5724_v12 = vadd.f32 %v1912_v6, %v1850_v8  ;;  %v5726_v19 = vadd.f32 %v1913_v32, %v1851_v37  ;;  %v1955_v17 = vstv %s5693_s19  ;;  %v1965_v25 = vstv %s5699_s28  ;;  %s5771_s19 = sld [smem:[#allocation5 + $0x3c]] }
 0x21a   : >> { %v1953_v1 = vmax.f32 %v1949_v7, 0.0  ;;  %v1975_v0 = vstv %s5701_s29  ;;  %v1991_v23 = vstv %s5690_s27  ;;  %v2001_v10 = vstv %s5703_s25  ;;  %s5768_s27 = sld [smem:[#allocation4 + $0x14]] }
 0x21b   : >> { %v1986_v47 = vmul.f32 %v1985_v53, %v6522_v35  ;;  %v1987_v5 = vmul.f32 %v1985_v53, %v6523_v56  ;;  %v1988_v63 = vmul.f32 %v1985_v53, %v6524_v34  ;;  %v1989_v11 = vmul.f32 %v1985_v53, %v6526_v40  ;;  %s5792_s28 = sld [smem:[#allocation3 + $0x15]] }
 0x21c   : >> { %v1956_v45 = vmul.f32 %v1955_v17, %v1950_v50  ;;  %v1957_v52 = vmul.f32 %v1955_v17, %v1951_v13  ;;  %v1958_v8 = vmul.f32 %v1955_v17, %v1952_v14  ;;  %v2011_v20 = vstv %s5707_s21  ;;  %s5803_s29 = sld [smem:[#allocation3 + $0x35]] }
 0x21d   : >> { %v1992_v37 = vmul.f32 %v1991_v23, %v6525_v59  ;;  %v1993_v26 = vmul.f32 %v1991_v23, %v6527_v62  ;;  %v1994_v4 = vmul.f32 %v1991_v23, %v6528_v31  ;;  %v1995_v49 = vmul.f32 %v1991_v23, %v6529_v28  ;;  %s5820_s25 = sld [smem:[#allocation5 + $0x3d]] }
 0x21e   : >> { %v1959_v54 = vmul.f32 %v1955_v17, %v1953_v1  ;;  %v1966_v3 = vmul.f32 %v1965_v25, %v1950_v50  ;;  %v1967_v48 = vmul.f32 %v1965_v25, %v1951_v13  ;;  %v1968_v16 = vmul.f32 %v1965_v25, %v1952_v14  ;;  %s5826_s21 = sld [smem:[#allocation5 + $0x3e]] }
 0x21f   : >> { %v1996_v18 = vadd.f32 %v1992_v37, %v1986_v47  ;;  %v1997_v27 = vadd.f32 %v1993_v26, %v1987_v5  ;;  %v1998_v60 = vadd.f32 %v1994_v4, %v1988_v63  ;;  %v1999_v9 = vadd.f32 %v1995_v49, %v1989_v11 }
 0x220   : >> { %v2002_v44 = vmul.f32 %v2001_v10, %v6530_v46  ;;  %v2003_v22 = vmul.f32 %v2001_v10, %v6531_v33  ;;  %v2004_v41 = vmul.f32 %v2001_v10, %v6532_v29  ;;  %v2005_v6 = vmul.f32 %v2001_v10, %v6533_v43 }
 0x221   : >> { %v5754_v32 = vadd.f32 %v1956_v45, %v1894_v15  ;;  %v5756_v7 = vadd.f32 %v1957_v52, %v1895_v2  ;;  %v1969_v53 = vmul.f32 %v1965_v25, %v1953_v1  ;;  %v1976_v17 = vmul.f32 %v1975_v0, %v1950_v50 }
 0x222   : >> { %v2006_v23 = vadd.f32 %v2002_v44, %v1996_v18  ;;  %v2007_v47 = vadd.f32 %v2003_v22, %v1997_v27  ;;  %v2008_v5 = vadd.f32 %v2004_v41, %v1998_v60  ;;  %v2009_v63 = vadd.f32 %v2005_v6, %v1999_v9 }
 0x223   : >> { %v1962_v11 = vadd.f32 %v1958_v8, %v1896_v36  ;;  %v5762_v37 = vadd.f32 %v1959_v54, %v1897_v61  ;;  %v5764_v10 = vadd.f32 %v1966_v3, %v1904_v30  ;;  %v5766_v15 = vadd.f32 %v1967_v48, %v1905_v58 }
 0x224   : >> { %v2012_v2 = vadd.f32 %v2011_v20, %v2006_v23  ;;  %v2013_v50 = vadd.f32 %v2011_v20, %v2007_v47  ;;  %v2014_v25 = vadd.f32 %v2011_v20, %v2008_v5  ;;  %v2051_v45 = vstv %s5738_s16  ;;  %s5832_s16 = sld [smem:[#allocation3 + $0x55]] }
 0x225   : >> { %v5774_v52 = vadd.f32 %v1968_v16, %v5715_v24  ;;  %v5777_v36 = vadd.f32 %v1969_v53, %v5717_v42  ;;  %v1977_v61 = vmul.f32 %v1975_v0, %v1951_v13  ;;  %v1978_v30 = vmul.f32 %v1975_v0, %v1952_v14 }
 0x226   : >> { %v1979_v8 = vmul.f32 %v1975_v0, %v1953_v1  ;;  %v5780_v58 = vadd.f32 %v1976_v17, %v5719_v21  ;;  %v2015_v26 = vadd.f32 %v2011_v20, %v2009_v63  ;;  %v2057_v4 = vstv %s5744_s22  ;;  %s5838_s22 = sld [smem:[#allocation4 + $0x15]] }
 0x227   : >> { %v2021_v49 = vstv %s5746_s0  ;;  %v2052_v54 = vmul.f32 %v2051_v45, %v6522_v35  ;;  %v2053_v3 = vmul.f32 %v2051_v45, %v6523_v56  ;;  %v2054_v24 = vmul.f32 %v2051_v45, %v6524_v34  ;;  %s5842_s0 = sld [smem:[#allocation3 + $0x16]] }
 0x228   : >> { %v2016_v48 = vmax.f32 %v2012_v2, 0.0  ;;  %v2017_v42 = vmax.f32 %v2013_v50, 0.0  ;;  %v2018_v13 = vmax.f32 %v2014_v25, 0.0  ;;  %v2055_v14 = vmul.f32 %v2051_v45, %v6526_v40 }
 0x229   : >> { %v2058_v21 = vmul.f32 %v2057_v4, %v6525_v59  ;;  %v2059_v1 = vmul.f32 %v2057_v4, %v6527_v62  ;;  %v2060_v0 = vmul.f32 %v2057_v4, %v6528_v31  ;;  %v2061_v20 = vmul.f32 %v2057_v4, %v6529_v28 }
 0x22a   : >> { %v5795_v16 = vadd.f32 %v1977_v61, %v5721_v38  ;;  %v5798_v18 = vadd.f32 %v1978_v30, %v5724_v12  ;;  %v5801_v27 = vadd.f32 %v1979_v8, %v5726_v19  ;;  %v2019_v60 = vmax.f32 %v2015_v26, 0.0 }
 0x22b   : >> { %v2031_v9 = vstv %s5752_s1  ;;  %v2041_v44 = vstv %s5758_s18  ;;  %v2067_v22 = vstv %s5760_s26  ;;  %v2077_v41 = vstv %s5768_s27  ;;  %s5859_s1 = sld [smem:[#allocation3 + $0x36]] }
 0x22c   : >> { %v2022_v6 = vmul.f32 %v2021_v49, %v2016_v48  ;;  %v2023_v53 = vmul.f32 %v2021_v49, %v2017_v42  ;;  %v2024_v17 = vmul.f32 %v2021_v49, %v2018_v13  ;;  %v5810_v23 = vstv %s5771_s19  ;;  %s5872_s18 = sld [smem:[#allocation5 + $0x3f]] }
 0x22d   : >> { %v2062_v38 = vadd.f32 %v2058_v21, %v2052_v54  ;;  %v2063_v47 = vadd.f32 %v2059_v1, %v2053_v3  ;;  %v2064_v5 = vadd.f32 %v2060_v0, %v2054_v24  ;;  %v2065_v12 = vadd.f32 %v2061_v20, %v2055_v14  ;;  %s5880_s26 = sld [smem:[#allocation5 + $0x40]] }
 0x22e   : >> { %v2025_v63 = vmul.f32 %v2021_v49, %v2019_v60  ;;  %v2032_v2 = vmul.f32 %v2031_v9, %v2016_v48  ;;  %v2033_v19 = vmul.f32 %v2031_v9, %v2017_v42  ;;  %v2034_v50 = vmul.f32 %v2031_v9, %v2018_v13  ;;  %s5883_s27 = sld [smem:[#allocation3 + $0x56]] }
 0x22f   : >> { %v2068_v25 = vmul.f32 %v2067_v22, %v6530_v46  ;;  %v2069_v45 = vmul.f32 %v2067_v22, %v6531_v33  ;;  %v2070_v61 = vmul.f32 %v2067_v22, %v6532_v29  ;;  %v2071_v30 = vmul.f32 %v2067_v22, %v6533_v43  ;;  %s5892_s19 = sld [smem:[#allocation5 + $0x41]] }
 0x230   : >> { %v2026_v8 = vadd.f32 %v2022_v6, %v5754_v32  ;;  %v2027_v26 = vadd.f32 %v2023_v53, %v5756_v7  ;;  %v5818_v4 = vadd.f32 %v2024_v17, %v1962_v11  ;;  %v2035_v49 = vmul.f32 %v2031_v9, %v2019_v60 }
 0x231   : >> { %v2072_v54 = vadd.f32 %v2068_v25, %v2062_v38  ;;  %v2073_v3 = vadd.f32 %v2069_v45, %v2063_v47  ;;  %v2074_v24 = vadd.f32 %v2070_v61, %v2064_v5  ;;  %v2075_v14 = vadd.f32 %v2071_v30, %v2065_v12 }
 0x232   : >> { %v2029_v21 = vadd.f32 %v2025_v63, %v5762_v37  ;;  %v5824_v1 = vadd.f32 %v2032_v2, %v5764_v10  ;;  %v2117_v0 = vstv %s5792_s28  ;;  %v2123_v32 = vstv %s5803_s29  ;;  %s5903_s28 = sld [smem:[#allocation4 + $0x16]] }
 0x233   : >> { %v2078_v20 = vadd.f32 %v2077_v41, %v2072_v54  ;;  %v2079_v7 = vadd.f32 %v2077_v41, %v2073_v3  ;;  %v2080_v11 = vadd.f32 %v2077_v41, %v2074_v24  ;;  %v2081_v22 = vadd.f32 %v2077_v41, %v2075_v14  ;;  %s5910_s29 = sld [smem:[#allocation3 + $0x17]] }
 0x234   : >> { %v2037_v9 = vadd.f32 %v2033_v19, %v5766_v15  ;;  %v2038_v6 = vadd.f32 %v2034_v50, %v5774_v52  ;;  %v2042_v53 = vmul.f32 %v2041_v44, %v2016_v48  ;;  %v2043_v17 = vmul.f32 %v2041_v44, %v2017_v42 }
 0x235   : >> { %v2044_v37 = vmul.f32 %v2041_v44, %v2018_v13  ;;  %v2045_v38 = vmul.f32 %v2041_v44, %v2019_v60  ;;  %v2082_v10 = vmax.f32 %v2078_v20, 0.0  ;;  %v2083_v47 = vmax.f32 %v2079_v7, 0.0 }
 0x236   : >> { %v2118_v5 = vmul.f32 %v2117_v0, %v6522_v35  ;;  %v2119_v12 = vmul.f32 %v2117_v0, %v6523_v56  ;;  %v2120_v63 = vmul.f32 %v2117_v0, %v6524_v34  ;;  %v2124_v41 = vmul.f32 %v2123_v32, %v6525_v59 }
 0x237   : >> { %v2084_v15 = vmax.f32 %v2080_v11, 0.0  ;;  %v2085_v52 = vmax.f32 %v2081_v22, 0.0  ;;  %v2125_v48 = vmul.f32 %v2123_v32, %v6527_v62  ;;  %v2126_v42 = vmul.f32 %v2123_v32, %v6528_v31 }
 0x238   : >> { %v2039_v13 = vadd.f32 %v2035_v49, %v5777_v36  ;;  %v5846_v60 = vadd.f32 %v2042_v53, %v5780_v58  ;;  %v2121_v44 = vmul.f32 %v2117_v0, %v6526_v40  ;;  %v2127_v2 = vmul.f32 %v2123_v32, %v6529_v28 }
 0x239   : >> { %v5851_v19 = vadd.f32 %v2043_v17, %v5795_v16  ;;  %v2088_v50 = vmul.f32 %v5810_v23, %v2082_v10  ;;  %v2089_v25 = vmul.f32 %v5810_v23, %v2083_v47  ;;  %v2097_v45 = vstv %s5820_s25  ;;  %s5912_s25 = sld [smem:[#allocation3 + $0x37]] }
 0x23a   : >> { %v2048_v61 = vadd.f32 %v2044_v37, %v5798_v18  ;;  %v2049_v36 = vadd.f32 %v2045_v38, %v5801_v27  ;;  %v2107_v30 = vstv %s5826_s21  ;;  %v2128_v58 = vadd.f32 %v2124_v41, %v2118_v5  ;;  %s5915_s21 = sld [smem:[#allocation5 + $0x42]] }
 0x23b   : >> { %v2090_v49 = vmul.f32 %v5810_v23, %v2084_v15  ;;  %v2091_v54 = vmul.f32 %v5810_v23, %v2085_v52  ;;  %v2129_v16 = vadd.f32 %v2125_v48, %v2119_v12  ;;  %v2130_v3 = vadd.f32 %v2126_v42, %v2120_v63 }
 0x23c   : >> { %v2098_v24 = vmul.f32 %v2097_v45, %v2082_v10  ;;  %v2099_v14 = vmul.f32 %v2097_v45, %v2083_v47  ;;  %v2131_v0 = vadd.f32 %v2127_v2, %v2121_v44  ;;  %v2133_v32 = vstv %s5832_s16  ;;  %s5921_s16 = sld [smem:[#allocation5 + $0x43]] }
 0x23d   : >> { %v5864_v20 = vadd.f32 %v2088_v50, %v2026_v8  ;;  %v5866_v18 = vadd.f32 %v2089_v25, %v2027_v26  ;;  %v2100_v27 = vmul.f32 %v2097_v45, %v2084_v15  ;;  %v2101_v7 = vmul.f32 %v2097_v45, %v2085_v52 }
 0x23e   : >> { %v2134_v11 = vmul.f32 %v2133_v32, %v6530_v46  ;;  %v2135_v22 = vmul.f32 %v2133_v32, %v6531_v33  ;;  %v2136_v23 = vmul.f32 %v2133_v32, %v6532_v29  ;;  %v2137_v53 = vmul.f32 %v2133_v32, %v6533_v43 }
 0x23f   : >> { %v5875_v17 = vadd.f32 %v2090_v49, %v5818_v4  ;;  %v5877_v37 = vadd.f32 %v2091_v54, %v2029_v21  ;;  %v2143_v8 = vstv %s5838_s22  ;;  %v2183_v26 = vstv %s5842_s0  ;;  %s5923_s22 = sld [smem:[#allocation5 + $0x44]] }
 0x240   : >> { %v2138_v38 = vadd.f32 %v2134_v11, %v2128_v58  ;;  %v2139_v5 = vadd.f32 %v2135_v22, %v2129_v16  ;;  %v2140_v12 = vadd.f32 %v2136_v23, %v2130_v3  ;;  %v2141_v63 = vadd.f32 %v2137_v53, %v2131_v0  ;;  %s5925_s0 = sld [smem:[#allocation3 + $0x57]] }
 0x241   : >> { %v5886_v41 = vadd.f32 %v2098_v24, %v5824_v1  ;;  %v5888_v48 = vadd.f32 %v2099_v14, %v2037_v9  ;;  %v5890_v4 = vadd.f32 %v2100_v27, %v2038_v6  ;;  %v2108_v21 = vmul.f32 %v2107_v30, %v2082_v10 }
 0x242   : >> { %v2144_v42 = vadd.f32 %v2143_v8, %v2138_v38  ;;  %v2145_v44 = vadd.f32 %v2143_v8, %v2139_v5  ;;  %v2146_v2 = vadd.f32 %v2143_v8, %v2140_v12  ;;  %v2189_v50 = vstv %s5859_s1  ;;  %s5929_s1 = sld [smem:[#allocation4 + $0x17]] }
 0x243   : >> { %v2109_v25 = vmul.f32 %v2107_v30, %v2083_v47  ;;  %v2110_v45 = vmul.f32 %v2107_v30, %v2084_v15  ;;  %v2111_v58 = vmul.f32 %v2107_v30, %v2085_v52  ;;  %v2184_v49 = vmul.f32 %v2183_v26, %v6522_v35 }
 0x244   : >> { %v2147_v54 = vadd.f32 %v2143_v8, %v2141_v63  ;;  %v2185_v1 = vmul.f32 %v2183_v26, %v6523_v56  ;;  %v2186_v9 = vmul.f32 %v2183_v26, %v6524_v34  ;;  %v2187_v6 = vmul.f32 %v2183_v26, %v6526_v40 }
 0x245   : >> { %v2190_v10 = vmul.f32 %v2189_v50, %v6525_v59  ;;  %v2191_v16 = vmul.f32 %v2189_v50, %v6527_v62  ;;  %v2192_v47 = vmul.f32 %v2189_v50, %v6528_v31  ;;  %v2193_v15 = vmul.f32 %v2189_v50, %v6529_v28 }
 0x246   : >> { %v2105_v52 = vadd.f32 %v2101_v7, %v2039_v13  ;;  %v2148_v30 = vmax.f32 %v2144_v42, 0.0  ;;  %v2149_v3 = vmax.f32 %v2145_v44, 0.0  ;;  %v2150_v24 = vmax.f32 %v2146_v2, 0.0 }
 0x247   : >> { %v2112_v14 = vadd.f32 %v2108_v21, %v5846_v60  ;;  %v2113_v0 = vadd.f32 %v2109_v25, %v5851_v19  ;;  %v2153_v32 = vstv %s5872_s18  ;;  %v2163_v27 = vstv %s5880_s26  ;;  %s5960_s18 = sld [smem:[#allocation3 + $0x18]] }
 0x248   : >> { %v2114_v11 = vadd.f32 %v2110_v45, %v2048_v61  ;;  %v2115_v22 = vadd.f32 %v2111_v58, %v2049_v36  ;;  %v2151_v23 = vmax.f32 %v2147_v54, 0.0  ;;  %v2199_v53 = vstv %s5883_s27  ;;  %s5966_s26 = sld [smem:[#allocation3 + $0x38]] }
 0x249   : >> { %v2194_v8 = vadd.f32 %v2190_v10, %v2184_v49  ;;  %v2195_v13 = vadd.f32 %v2191_v16, %v2185_v1  ;;  %v2196_v7 = vadd.f32 %v2192_v47, %v2186_v9  ;;  %v2197_v26 = vadd.f32 %v2193_v15, %v2187_v6  ;;  %s5968_s27 = sld [smem:[#allocation5 + $0x45]] }
 0x24a   : >> { %v2154_v38 = vmul.f32 %v2153_v32, %v2148_v30  ;;  %v2155_v5 = vmul.f32 %v2153_v32, %v2149_v3  ;;  %v2156_v60 = vmul.f32 %v2153_v32, %v2150_v24  ;;  %v2173_v12 = vstv %s5892_s19  ;;  %s5974_s19 = sld [smem:[#allocation5 + $0x46]] }
 0x24b   : >> { %v2200_v19 = vmul.f32 %v2199_v53, %v6530_v46  ;;  %v2201_v61 = vmul.f32 %v2199_v53, %v6531_v33  ;;  %v2202_v36 = vmul.f32 %v2199_v53, %v6532_v29  ;;  %v2203_v63 = vmul.f32 %v2199_v53, %v6533_v43 }
 0x24c   : >> { %v2157_v21 = vmul.f32 %v2153_v32, %v2151_v23  ;;  %v2164_v42 = vmul.f32 %v2163_v27, %v2148_v30  ;;  %v2165_v44 = vmul.f32 %v2163_v27, %v2149_v3  ;;  %v2166_v2 = vmul.f32 %v2163_v27, %v2150_v24 }
 0x24d   : >> { %v2204_v50 = vadd.f32 %v2200_v19, %v2194_v8  ;;  %v2205_v25 = vadd.f32 %v2201_v61, %v2195_v13  ;;  %v2206_v45 = vadd.f32 %v2202_v36, %v2196_v7  ;;  %v2207_v58 = vadd.f32 %v2203_v63, %v2197_v26 }
 0x24e   : >> { %v2167_v49 = vmul.f32 %v2163_v27, %v2151_v23  ;;  %v2174_v54 = vmul.f32 %v2173_v12, %v2148_v30  ;;  %v2175_v1 = vmul.f32 %v2173_v12, %v2149_v3  ;;  %v2209_v9 = vstv %s5903_s28  ;;  %s5980_s28 = sld [smem:[#allocation5 + $0x47]] }
 0x24f   : >> { %v2158_v6 = vadd.f32 %v2154_v38, %v5864_v20  ;;  %v2210_v10 = vadd.f32 %v2209_v9, %v2204_v50  ;;  %v2211_v16 = vadd.f32 %v2209_v9, %v2205_v25  ;;  %v2212_v47 = vadd.f32 %v2209_v9, %v2206_v45 }
 0x250   : >> { %v2159_v15 = vadd.f32 %v2155_v5, %v5866_v18  ;;  %v2160_v32 = vadd.f32 %v2156_v60, %v5875_v17  ;;  %v2176_v53 = vmul.f32 %v2173_v12, %v2150_v24  ;;  %v2177_v8 = vmul.f32 %v2173_v12, %v2151_v23 }
 0x251   : >> { %v2161_v30 = vadd.f32 %v2157_v21, %v5877_v37  ;;  %v2168_v3 = vadd.f32 %v2164_v42, %v5886_v41  ;;  %v2169_v20 = vadd.f32 %v2165_v44, %v5888_v48  ;;  %v2213_v27 = vadd.f32 %v2209_v9, %v2207_v58 }
 0x252   : >> { %v5937_v13 = vadd.f32 %v2166_v2, %v5890_v4  ;;  %v5939_v18 = vadd.f32 %v2167_v49, %v2105_v52  ;;  %v5941_v17 = vadd.f32 %v2174_v54, %v2112_v14  ;;  %v5943_v24 = vadd.f32 %v2175_v1, %v2113_v0 }
 0x253   : >> { %v2214_v23 = vmax.f32 %v2210_v10, 0.0  ;;  %v2215_v7 = vmax.f32 %v2211_v16, 0.0  ;;  %v2216_v37 = vmax.f32 %v2212_v47, 0.0  ;;  %v2249_v26 = vstv %s5910_s29  ;;  %s5982_s29 = sld [smem:[#allocation3 + $0x58]] }
 0x254   : >> { %v5946_v41 = vadd.f32 %v2176_v53, %v2114_v11  ;;  %v5948_v48 = vadd.f32 %v2177_v8, %v2115_v22  ;;  %v2219_v38 = vstv %s5915_s21  ;;  %v2229_v5 = vstv %s5921_s16  ;;  %s5993_s21 = sld [smem:[#allocation5 + $0x48]] }
 0x255   : >> { %v2217_v60 = vmax.f32 %v2213_v27, 0.0  ;;  %v2239_v4 = vstv %s5923_s22  ;;  %v2255_v12 = vstv %s5912_s25  ;;  %v2265_v52 = vstv %s5925_s0  ;;  %s5990_s25 = sld [smem:[#allocation4 + $0x18]] }
 0x256   : >> { %v2250_v14 = vmul.f32 %v2249_v26, %v6522_v35  ;;  %v2251_v0 = vmul.f32 %v2249_v26, %v6523_v56  ;;  %v2252_v19 = vmul.f32 %v2249_v26, %v6524_v34  ;;  %v2253_v61 = vmul.f32 %v2249_v26, %v6526_v40  ;;  %s6014_s16 = sld [smem:[#allocation3 + $0x19]] }
 0x257   : >> { %v2220_v36 = vmul.f32 %v2219_v38, %v2214_v23  ;;  %v2221_v63 = vmul.f32 %v2219_v38, %v2215_v7  ;;  %v2222_v11 = vmul.f32 %v2219_v38, %v2216_v37  ;;  %v2275_v21 = vstv %s5929_s1  ;;  %s6025_s22 = sld [smem:[#allocation3 + $0x39]] }
 0x258   : >> { %v2256_v22 = vmul.f32 %v2255_v12, %v6525_v59  ;;  %v2257_v42 = vmul.f32 %v2255_v12, %v6527_v62  ;;  %v2258_v44 = vmul.f32 %v2255_v12, %v6528_v31  ;;  %v2259_v2 = vmul.f32 %v2255_v12, %v6529_v28  ;;  %s6042_s0 = sld [smem:[#allocation5 + $0x49]] }
 0x259   : >> { %v2223_v50 = vmul.f32 %v2219_v38, %v2217_v60  ;;  %v2230_v25 = vmul.f32 %v2229_v5, %v2214_v23  ;;  %v2231_v45 = vmul.f32 %v2229_v5, %v2215_v7  ;;  %v2232_v58 = vmul.f32 %v2229_v5, %v2216_v37  ;;  %s6048_s1 = sld [smem:[#allocation5 + $0x4a]] }
 0x25a   : >> { %v2260_v49 = vadd.f32 %v2256_v22, %v2250_v14  ;;  %v2261_v54 = vadd.f32 %v2257_v42, %v2251_v0  ;;  %v2262_v1 = vadd.f32 %v2258_v44, %v2252_v19  ;;  %v2263_v9 = vadd.f32 %v2259_v2, %v2253_v61 }
 0x25b   : >> { %v2266_v10 = vmul.f32 %v2265_v52, %v6530_v46  ;;  %v2267_v16 = vmul.f32 %v2265_v52, %v6531_v33  ;;  %v2268_v47 = vmul.f32 %v2265_v52, %v6532_v29  ;;  %v2269_v53 = vmul.f32 %v2265_v52, %v6533_v43 }
 0x25c   : >> { %v5976_v8 = vadd.f32 %v2220_v36, %v2158_v6  ;;  %v5978_v27 = vadd.f32 %v2221_v63, %v2159_v15  ;;  %v2233_v26 = vmul.f32 %v2229_v5, %v2217_v60  ;;  %v2240_v38 = vmul.f32 %v2239_v4, %v2214_v23 }
 0x25d   : >> { %v2270_v12 = vadd.f32 %v2266_v10, %v2260_v49  ;;  %v2271_v14 = vadd.f32 %v2267_v16, %v2261_v54  ;;  %v2272_v0 = vadd.f32 %v2268_v47, %v2262_v1  ;;  %v2273_v19 = vadd.f32 %v2269_v53, %v2263_v9 }
 0x25e   : >> { %v2226_v61 = vadd.f32 %v2222_v11, %v2160_v32  ;;  %v5984_v22 = vadd.f32 %v2223_v50, %v2161_v30  ;;  %v5986_v52 = vadd.f32 %v2230_v25, %v2168_v3  ;;  %v5988_v6 = vadd.f32 %v2231_v45, %v2169_v20 }
 0x25f   : >> { %v2276_v15 = vadd.f32 %v2275_v21, %v2270_v12  ;;  %v2277_v23 = vadd.f32 %v2275_v21, %v2271_v14  ;;  %v2278_v5 = vadd.f32 %v2275_v21, %v2272_v0  ;;  %v2315_v36 = vstv %s5960_s18  ;;  %s6054_s18 = sld [smem:[#allocation3 + $0x59]] }
 0x260   : >> { %v5996_v63 = vadd.f32 %v2232_v58, %v5937_v13  ;;  %v5999_v32 = vadd.f32 %v2233_v26, %v5939_v18  ;;  %v2241_v30 = vmul.f32 %v2239_v4, %v2215_v7  ;;  %v2242_v3 = vmul.f32 %v2239_v4, %v2216_v37 }
 0x261   : >> { %v2243_v11 = vmul.f32 %v2239_v4, %v2217_v60  ;;  %v6002_v20 = vadd.f32 %v2240_v38, %v5941_v17  ;;  %v2279_v42 = vadd.f32 %v2275_v21, %v2273_v19  ;;  %v2321_v44 = vstv %s5966_s26  ;;  %s6060_s26 = sld [smem:[#allocation4 + $0x19]] }
 0x262   : >> { %v2285_v2 = vstv %s5968_s27  ;;  %v2316_v50 = vmul.f32 %v2315_v36, %v6522_v35  ;;  %v2317_v25 = vmul.f32 %v2315_v36, %v6523_v56  ;;  %v2318_v13 = vmul.f32 %v2315_v36, %v6524_v34  ;;  %s6064_s27 = sld [smem:[#allocation3 + $0x1a]] }
 0x263   : >> { %v2280_v45 = vmax.f32 %v2276_v15, 0.0  ;;  %v2281_v18 = vmax.f32 %v2277_v23, 0.0  ;;  %v2282_v7 = vmax.f32 %v2278_v5, 0.0  ;;  %v2319_v37 = vmul.f32 %v2315_v36, %v6526_v40 }
 0x264   : >> { %v2322_v17 = vmul.f32 %v2321_v44, %v6525_v59  ;;  %v2323_v60 = vmul.f32 %v2321_v44, %v6527_v62  ;;  %v2324_v4 = vmul.f32 %v2321_v44, %v6528_v31  ;;  %v2325_v21 = vmul.f32 %v2321_v44, %v6529_v28 }
 0x265   : >> { %v6017_v58 = vadd.f32 %v2241_v30, %v5943_v24  ;;  %v6020_v49 = vadd.f32 %v2242_v3, %v5946_v41  ;;  %v6023_v54 = vadd.f32 %v2243_v11, %v5948_v48  ;;  %v2283_v1 = vmax.f32 %v2279_v42, 0.0 }
 0x266   : >> { %v2295_v9 = vstv %s5974_s19  ;;  %v2305_v10 = vstv %s5980_s28  ;;  %v2331_v16 = vstv %s5982_s29  ;;  %v2341_v47 = vstv %s5990_s25  ;;  %s6081_s19 = sld [smem:[#allocation3 + $0x3a]] }
 0x267   : >> { %v2286_v53 = vmul.f32 %v2285_v2, %v2280_v45  ;;  %v2287_v26 = vmul.f32 %v2285_v2, %v2281_v18  ;;  %v2288_v38 = vmul.f32 %v2285_v2, %v2282_v7  ;;  %v6032_v12 = vstv %s5993_s21  ;;  %s6094_s28 = sld [smem:[#allocation5 + $0x4b]] }
 0x268   : >> { %v2326_v24 = vadd.f32 %v2322_v17, %v2316_v50  ;;  %v2327_v14 = vadd.f32 %v2323_v60, %v2317_v25  ;;  %v2328_v0 = vadd.f32 %v2324_v4, %v2318_v13  ;;  %v2329_v41 = vadd.f32 %v2325_v21, %v2319_v37  ;;  %s6102_s29 = sld [smem:[#allocation5 + $0x4c]] }
 0x269   : >> { %v2289_v19 = vmul.f32 %v2285_v2, %v2283_v1  ;;  %v2296_v15 = vmul.f32 %v2295_v9, %v2280_v45  ;;  %v2297_v48 = vmul.f32 %v2295_v9, %v2281_v18  ;;  %v2298_v23 = vmul.f32 %v2295_v9, %v2282_v7  ;;  %s6105_s25 = sld [smem:[#allocation3 + $0x5a]] }
 0x26a   : >> { %v2332_v5 = vmul.f32 %v2331_v16, %v6530_v46  ;;  %v2333_v36 = vmul.f32 %v2331_v16, %v6531_v33  ;;  %v2334_v30 = vmul.f32 %v2331_v16, %v6532_v29  ;;  %v2335_v3 = vmul.f32 %v2331_v16, %v6533_v43  ;;  %s6114_s21 = sld [smem:[#allocation5 + $0x4d]] }
 0x26b   : >> { %v2290_v11 = vadd.f32 %v2286_v53, %v5976_v8  ;;  %v2291_v42 = vadd.f32 %v2287_v26, %v5978_v27  ;;  %v6040_v44 = vadd.f32 %v2288_v38, %v2226_v61  ;;  %v2299_v2 = vmul.f32 %v2295_v9, %v2283_v1 }
 0x26c   : >> { %v2336_v50 = vadd.f32 %v2332_v5, %v2326_v24  ;;  %v2337_v25 = vadd.f32 %v2333_v36, %v2327_v14  ;;  %v2338_v13 = vadd.f32 %v2334_v30, %v2328_v0  ;;  %v2339_v37 = vadd.f32 %v2335_v3, %v2329_v41 }
 0x26d   : >> { %v2293_v17 = vadd.f32 %v2289_v19, %v5984_v22  ;;  %v6046_v60 = vadd.f32 %v2296_v15, %v5986_v52  ;;  %v2381_v4 = vstv %s6014_s16  ;;  %v2387_v8 = vstv %s6025_s22  ;;  %s6125_s16 = sld [smem:[#allocation4 + $0x1a]] }
 0x26e   : >> { %v2342_v21 = vadd.f32 %v2341_v47, %v2336_v50  ;;  %v2343_v27 = vadd.f32 %v2341_v47, %v2337_v25  ;;  %v2344_v61 = vadd.f32 %v2341_v47, %v2338_v13  ;;  %v2345_v16 = vadd.f32 %v2341_v47, %v2339_v37  ;;  %s6132_s22 = sld [smem:[#allocation3 + $0x1b]] }
 0x26f   : >> { %v2301_v9 = vadd.f32 %v2297_v48, %v5988_v6  ;;  %v2302_v53 = vadd.f32 %v2298_v23, %v5996_v63  ;;  %v2306_v26 = vmul.f32 %v2305_v10, %v2280_v45  ;;  %v2307_v38 = vmul.f32 %v2305_v10, %v2281_v18 }
 0x270   : >> { %v2308_v22 = vmul.f32 %v2305_v10, %v2282_v7  ;;  %v2309_v24 = vmul.f32 %v2305_v10, %v2283_v1  ;;  %v2346_v52 = vmax.f32 %v2342_v21, 0.0  ;;  %v2347_v14 = vmax.f32 %v2343_v27, 0.0 }
 0x271   : >> { %v2382_v0 = vmul.f32 %v2381_v4, %v6522_v35  ;;  %v2383_v41 = vmul.f32 %v2381_v4, %v6523_v56  ;;  %v2384_v19 = vmul.f32 %v2381_v4, %v6524_v34  ;;  %v2388_v47 = vmul.f32 %v2387_v8, %v6525_v59 }
 0x272   : >> { %v2348_v6 = vmax.f32 %v2344_v61, 0.0  ;;  %v2349_v63 = vmax.f32 %v2345_v16, 0.0  ;;  %v2389_v45 = vmul.f32 %v2387_v8, %v6527_v62  ;;  %v2390_v18 = vmul.f32 %v2387_v8, %v6528_v31 }
 0x273   : >> { %v2303_v7 = vadd.f32 %v2299_v2, %v5999_v32  ;;  %v6068_v1 = vadd.f32 %v2306_v26, %v6002_v20  ;;  %v2385_v10 = vmul.f32 %v2381_v4, %v6526_v40  ;;  %v2391_v15 = vmul.f32 %v2387_v8, %v6529_v28 }
 0x274   : >> { %v6073_v48 = vadd.f32 %v2307_v38, %v6017_v58  ;;  %v2352_v23 = vmul.f32 %v6032_v12, %v2346_v52  ;;  %v2353_v5 = vmul.f32 %v6032_v12, %v2347_v14  ;;  %v2361_v36 = vstv %s6042_s0  ;;  %s6134_s0 = sld [smem:[#allocation3 + $0x3b]] }
 0x275   : >> { %v2312_v30 = vadd.f32 %v2308_v22, %v6020_v49  ;;  %v2313_v32 = vadd.f32 %v2309_v24, %v6023_v54  ;;  %v2371_v3 = vstv %s6048_s1  ;;  %v2392_v20 = vadd.f32 %v2388_v47, %v2382_v0  ;;  %s6137_s1 = sld [smem:[#allocation5 + $0x4e]] }
 0x276   : >> { %v2354_v2 = vmul.f32 %v6032_v12, %v2348_v6  ;;  %v2355_v50 = vmul.f32 %v6032_v12, %v2349_v63  ;;  %v2393_v58 = vadd.f32 %v2389_v45, %v2383_v41  ;;  %v2394_v25 = vadd.f32 %v2390_v18, %v2384_v19 }
 0x277   : >> { %v2362_v13 = vmul.f32 %v2361_v36, %v2346_v52  ;;  %v2363_v37 = vmul.f32 %v2361_v36, %v2347_v14  ;;  %v2395_v4 = vadd.f32 %v2391_v15, %v2385_v10  ;;  %v2397_v8 = vstv %s6054_s18  ;;  %s6143_s18 = sld [smem:[#allocation5 + $0x4f]] }
 0x278   : >> { %v6086_v21 = vadd.f32 %v2352_v23, %v2290_v11  ;;  %v6088_v49 = vadd.f32 %v2353_v5, %v2291_v42  ;;  %v2364_v54 = vmul.f32 %v2361_v36, %v2348_v6  ;;  %v2365_v27 = vmul.f32 %v2361_v36, %v2349_v63 }
 0x279   : >> { %v2398_v61 = vmul.f32 %v2397_v8, %v6530_v46  ;;  %v2399_v16 = vmul.f32 %v2397_v8, %v6531_v33  ;;  %v2400_v12 = vmul.f32 %v2397_v8, %v6532_v29  ;;  %v2401_v26 = vmul.f32 %v2397_v8, %v6533_v43 }
 0x27a   : >> { %v6097_v38 = vadd.f32 %v2354_v2, %v6040_v44  ;;  %v6099_v22 = vadd.f32 %v2355_v50, %v2293_v17  ;;  %v2407_v11 = vstv %s6060_s26  ;;  %v2447_v42 = vstv %s6064_s27  ;;  %s6145_s26 = sld [smem:[#allocation5 + $0x50]] }
 0x27b   : >> { %v2402_v24 = vadd.f32 %v2398_v61, %v2392_v20  ;;  %v2403_v0 = vadd.f32 %v2399_v16, %v2393_v58  ;;  %v2404_v41 = vadd.f32 %v2400_v12, %v2394_v25  ;;  %v2405_v19 = vadd.f32 %v2401_v26, %v2395_v4  ;;  %s6147_s27 = sld [smem:[#allocation3 + $0x5b]] }
 0x27c   : >> { %v6108_v47 = vadd.f32 %v2362_v13, %v6046_v60  ;;  %v6110_v45 = vadd.f32 %v2363_v37, %v2301_v9  ;;  %v6112_v44 = vadd.f32 %v2364_v54, %v2302_v53  ;;  %v2372_v17 = vmul.f32 %v2371_v3, %v2346_v52 }
 0x27d   : >> { %v2408_v18 = vadd.f32 %v2407_v11, %v2402_v24  ;;  %v2409_v10 = vadd.f32 %v2407_v11, %v2403_v0  ;;  %v2410_v15 = vadd.f32 %v2407_v11, %v2404_v41  ;;  %v2453_v23 = vstv %s6081_s19  ;;  %s6151_s19 = sld [smem:[#allocation4 + $0x1b]] }
 0x27e   : >> { %v2373_v5 = vmul.f32 %v2371_v3, %v2347_v14  ;;  %v2374_v36 = vmul.f32 %v2371_v3, %v2348_v6  ;;  %v2375_v20 = vmul.f32 %v2371_v3, %v2349_v63  ;;  %v2448_v2 = vmul.f32 %v2447_v42, %v6522_v35 }
 0x27f   : >> { %v2411_v50 = vadd.f32 %v2407_v11, %v2405_v19  ;;  %v2449_v60 = vmul.f32 %v2447_v42, %v6523_v56  ;;  %v2450_v9 = vmul.f32 %v2447_v42, %v6524_v34  ;;  %v2451_v53 = vmul.f32 %v2447_v42, %v6526_v40 }
 0x280   : >> { %v2454_v52 = vmul.f32 %v2453_v23, %v6525_v59  ;;  %v2455_v58 = vmul.f32 %v2453_v23, %v6527_v62  ;;  %v2456_v14 = vmul.f32 %v2453_v23, %v6528_v31  ;;  %v2457_v6 = vmul.f32 %v2453_v23, %v6529_v28 }
 0x281   : >> { %v2369_v63 = vadd.f32 %v2365_v27, %v2303_v7  ;;  %v2412_v3 = vmax.f32 %v2408_v18, 0.0  ;;  %v2413_v25 = vmax.f32 %v2409_v10, 0.0  ;;  %v2414_v13 = vmax.f32 %v2410_v15, 0.0 }
 0x282   : >> { %v2376_v37 = vadd.f32 %v2372_v17, %v6068_v1  ;;  %v2377_v4 = vadd.f32 %v2373_v5, %v6073_v48  ;;  %v2417_v8 = vstv %s6094_s28  ;;  %v2427_v54 = vstv %s6102_s29  ;;  %s6182_s28 = sld [smem:[#allocation3 + $0x1c]] }
 0x283   : >> { %v2378_v61 = vadd.f32 %v2374_v36, %v2312_v30  ;;  %v2379_v16 = vadd.f32 %v2375_v20, %v2313_v32  ;;  %v2415_v12 = vmax.f32 %v2411_v50, 0.0  ;;  %v2463_v26 = vstv %s6105_s25  ;;  %s6188_s29 = sld [smem:[#allocation3 + $0x3c]] }
 0x284   : >> { %v2458_v11 = vadd.f32 %v2454_v52, %v2448_v2  ;;  %v2459_v7 = vadd.f32 %v2455_v58, %v2449_v60  ;;  %v2460_v27 = vadd.f32 %v2456_v14, %v2450_v9  ;;  %v2461_v42 = vadd.f32 %v2457_v6, %v2451_v53  ;;  %s6190_s25 = sld [smem:[#allocation5 + $0x51]] }
 0x285   : >> { %v2418_v24 = vmul.f32 %v2417_v8, %v2412_v3  ;;  %v2419_v0 = vmul.f32 %v2417_v8, %v2413_v25  ;;  %v2420_v1 = vmul.f32 %v2417_v8, %v2414_v13  ;;  %v2437_v41 = vstv %s6114_s21  ;;  %s6196_s21 = sld [smem:[#allocation5 + $0x52]] }
 0x286   : >> { %v2464_v48 = vmul.f32 %v2463_v26, %v6530_v46  ;;  %v2465_v30 = vmul.f32 %v2463_v26, %v6531_v33  ;;  %v2466_v32 = vmul.f32 %v2463_v26, %v6532_v29  ;;  %v2467_v19 = vmul.f32 %v2463_v26, %v6533_v43 }
 0x287   : >> { %v2421_v17 = vmul.f32 %v2417_v8, %v2415_v12  ;;  %v2428_v18 = vmul.f32 %v2427_v54, %v2412_v3  ;;  %v2429_v10 = vmul.f32 %v2427_v54, %v2413_v25  ;;  %v2430_v15 = vmul.f32 %v2427_v54, %v2414_v13 }
 0x288   : >> { %v2468_v23 = vadd.f32 %v2464_v48, %v2458_v11  ;;  %v2469_v5 = vadd.f32 %v2465_v30, %v2459_v7  ;;  %v2470_v36 = vadd.f32 %v2466_v32, %v2460_v27  ;;  %v2471_v20 = vadd.f32 %v2467_v19, %v2461_v42 }
 0x289   : >> { %v2431_v2 = vmul.f32 %v2427_v54, %v2415_v12  ;;  %v2438_v50 = vmul.f32 %v2437_v41, %v2412_v3  ;;  %v2439_v60 = vmul.f32 %v2437_v41, %v2413_v25  ;;  %v2473_v9 = vstv %s6125_s16  ;;  %s6202_s16 = sld [smem:[#allocation5 + $0x53]] }
 0x28a   : >> { %v2422_v53 = vadd.f32 %v2418_v24, %v6086_v21  ;;  %v2474_v52 = vadd.f32 %v2473_v9, %v2468_v23  ;;  %v2475_v58 = vadd.f32 %v2473_v9, %v2469_v5  ;;  %v2476_v14 = vadd.f32 %v2473_v9, %v2470_v36 }
 0x28b   : >> { %v2423_v6 = vadd.f32 %v2419_v0, %v6088_v49  ;;  %v2424_v8 = vadd.f32 %v2420_v1, %v6097_v38  ;;  %v2440_v26 = vmul.f32 %v2437_v41, %v2414_v13  ;;  %v2441_v11 = vmul.f32 %v2437_v41, %v2415_v12 }
 0x28c   : >> { %v2425_v3 = vadd.f32 %v2421_v17, %v6099_v22  ;;  %v2432_v25 = vadd.f32 %v2428_v18, %v6108_v47  ;;  %v2433_v21 = vadd.f32 %v2429_v10, %v6110_v45  ;;  %v2477_v54 = vadd.f32 %v2473_v9, %v2471_v20 }
 0x28d   : >> { %v6159_v7 = vadd.f32 %v2430_v15, %v6112_v44  ;;  %v6161_v49 = vadd.f32 %v2431_v2, %v2369_v63  ;;  %v6163_v38 = vadd.f32 %v2438_v50, %v2376_v37  ;;  %v6165_v13 = vadd.f32 %v2439_v60, %v2377_v4 }
 0x28e   : >> { %v2478_v12 = vmax.f32 %v2474_v52, 0.0  ;;  %v2479_v27 = vmax.f32 %v2475_v58, 0.0  ;;  %v2480_v22 = vmax.f32 %v2476_v14, 0.0  ;;  %v2513_v42 = vstv %s6132_s22  ;;  %s6204_s22 = sld [smem:[#allocation3 + $0x5c]] }
 0x28f   : >> { %v6168_v47 = vadd.f32 %v2440_v26, %v2378_v61  ;;  %v6170_v45 = vadd.f32 %v2441_v11, %v2379_v16  ;;  %v2483_v24 = vstv %s6137_s1  ;;  %v2493_v0 = vstv %s6143_s18  ;;  %s6215_s1 = sld [smem:[#allocation5 + $0x54]] }
 0x290   : >> { %v2481_v1 = vmax.f32 %v2477_v54, 0.0  ;;  %v2503_v44 = vstv %s6145_s26  ;;  %v2519_v41 = vstv %s6134_s0  ;;  %v2529_v63 = vstv %s6147_s27  ;;  %s6212_s0 = sld [smem:[#allocation4 + $0x1c]] }
 0x291   : >> { %v2514_v37 = vmul.f32 %v2513_v42, %v6522_v35  ;;  %v2515_v4 = vmul.f32 %v2513_v42, %v6523_v56  ;;  %v2516_v48 = vmul.f32 %v2513_v42, %v6524_v34  ;;  %v2517_v30 = vmul.f32 %v2513_v42, %v6526_v40  ;;  %s6236_s18 = sld [smem:[#allocation3 + $0x1d]] }
 0x292   : >> { %v2484_v32 = vmul.f32 %v2483_v24, %v2478_v12  ;;  %v2485_v19 = vmul.f32 %v2483_v24, %v2479_v27  ;;  %v2486_v61 = vmul.f32 %v2483_v24, %v2480_v22  ;;  %v2539_v17 = vstv %s6151_s19  ;;  %s6247_s26 = sld [smem:[#allocation3 + $0x3d]] }
 0x293   : >> { %v2520_v16 = vmul.f32 %v2519_v41, %v6525_v59  ;;  %v2521_v18 = vmul.f32 %v2519_v41, %v6527_v62  ;;  %v2522_v10 = vmul.f32 %v2519_v41, %v6528_v31  ;;  %v2523_v15 = vmul.f32 %v2519_v41, %v6529_v28  ;;  %s6264_s27 = sld [smem:[#allocation5 + $0x55]] }
 0x294   : >> { %v2487_v23 = vmul.f32 %v2483_v24, %v2481_v1  ;;  %v2494_v5 = vmul.f32 %v2493_v0, %v2478_v12  ;;  %v2495_v36 = vmul.f32 %v2493_v0, %v2479_v27  ;;  %v2496_v20 = vmul.f32 %v2493_v0, %v2480_v22  ;;  %s6270_s19 = sld [smem:[#allocation5 + $0x56]] }
 0x295   : >> { %v2524_v2 = vadd.f32 %v2520_v16, %v2514_v37  ;;  %v2525_v50 = vadd.f32 %v2521_v18, %v2515_v4  ;;  %v2526_v60 = vadd.f32 %v2522_v10, %v2516_v48  ;;  %v2527_v9 = vadd.f32 %v2523_v15, %v2517_v30 }
 0x296   : >> { %v2530_v52 = vmul.f32 %v2529_v63, %v6530_v46  ;;  %v2531_v58 = vmul.f32 %v2529_v63, %v6531_v33  ;;  %v2532_v14 = vmul.f32 %v2529_v63, %v6532_v29  ;;  %v2533_v26 = vmul.f32 %v2529_v63, %v6533_v43 }
 0x297   : >> { %v6198_v11 = vadd.f32 %v2484_v32, %v2422_v53  ;;  %v6200_v54 = vadd.f32 %v2485_v19, %v2423_v6  ;;  %v2497_v42 = vmul.f32 %v2493_v0, %v2481_v1  ;;  %v2504_v24 = vmul.f32 %v2503_v44, %v2478_v12 }
 0x298   : >> { %v2534_v41 = vadd.f32 %v2530_v52, %v2524_v2  ;;  %v2535_v37 = vadd.f32 %v2531_v58, %v2525_v50  ;;  %v2536_v4 = vadd.f32 %v2532_v14, %v2526_v60  ;;  %v2537_v48 = vadd.f32 %v2533_v26, %v2527_v9 }
 0x299   : >> { %v2490_v30 = vadd.f32 %v2486_v61, %v2424_v8  ;;  %v6206_v16 = vadd.f32 %v2487_v23, %v2425_v3  ;;  %v6208_v63 = vadd.f32 %v2494_v5, %v2432_v25  ;;  %v6210_v53 = vadd.f32 %v2495_v36, %v2433_v21 }
 0x29a   : >> { %v2540_v6 = vadd.f32 %v2539_v17, %v2534_v41  ;;  %v2541_v12 = vadd.f32 %v2539_v17, %v2535_v37  ;;  %v2542_v0 = vadd.f32 %v2539_v17, %v2536_v4  ;;  %v2579_v32 = vstv %s6182_s28  ;;  %s6276_s28 = sld [smem:[#allocation3 + $0x5d]] }
 0x29b   : >> { %v6218_v19 = vadd.f32 %v2496_v20, %v6159_v7  ;;  %v6221_v8 = vadd.f32 %v2497_v42, %v6161_v49  ;;  %v2505_v3 = vmul.f32 %v2503_v44, %v2479_v27  ;;  %v2506_v25 = vmul.f32 %v2503_v44, %v2480_v22 }
 0x29c   : >> { %v2507_v61 = vmul.f32 %v2503_v44, %v2481_v1  ;;  %v6224_v21 = vadd.f32 %v2504_v24, %v6163_v38  ;;  %v2543_v18 = vadd.f32 %v2539_v17, %v2537_v48  ;;  %v2585_v10 = vstv %s6188_s29  ;;  %s6282_s29 = sld [smem:[#allocation4 + $0x1d]] }
 0x29d   : >> { %v2549_v15 = vstv %s6190_s25  ;;  %v2580_v23 = vmul.f32 %v2579_v32, %v6522_v35  ;;  %v2581_v5 = vmul.f32 %v2579_v32, %v6523_v56  ;;  %v2582_v7 = vmul.f32 %v2579_v32, %v6524_v34  ;;  %s6286_s25 = sld [smem:[#allocation3 + $0x1e]] }
 0x29e   : >> { %v2544_v36 = vmax.f32 %v2540_v6, 0.0  ;;  %v2545_v49 = vmax.f32 %v2541_v12, 0.0  ;;  %v2546_v27 = vmax.f32 %v2542_v0, 0.0  ;;  %v2583_v22 = vmul.f32 %v2579_v32, %v6526_v40 }
 0x29f   : >> { %v2586_v38 = vmul.f32 %v2585_v10, %v6525_v59  ;;  %v2587_v1 = vmul.f32 %v2585_v10, %v6527_v62  ;;  %v2588_v44 = vmul.f32 %v2585_v10, %v6528_v31  ;;  %v2589_v17 = vmul.f32 %v2585_v10, %v6529_v28 }
 0x2a0   : >> { %v6239_v20 = vadd.f32 %v2505_v3, %v6165_v13  ;;  %v6242_v2 = vadd.f32 %v2506_v25, %v6168_v47  ;;  %v6245_v50 = vadd.f32 %v2507_v61, %v6170_v45  ;;  %v2547_v60 = vmax.f32 %v2543_v18, 0.0 }
 0x2a1   : >> { %v2559_v9 = vstv %s6196_s21  ;;  %v2569_v52 = vstv %s6202_s16  ;;  %v2595_v58 = vstv %s6204_s22  ;;  %v2605_v14 = vstv %s6212_s0  ;;  %s6303_s21 = sld [smem:[#allocation3 + $0x3e]] }
 0x2a2   : >> { %v2550_v26 = vmul.f32 %v2549_v15, %v2544_v36  ;;  %v2551_v42 = vmul.f32 %v2549_v15, %v2545_v49  ;;  %v2552_v24 = vmul.f32 %v2549_v15, %v2546_v27  ;;  %v6254_v41 = vstv %s6215_s1  ;;  %s6316_s16 = sld [smem:[#allocation5 + $0x57]] }
 0x2a3   : >> { %v2590_v13 = vadd.f32 %v2586_v38, %v2580_v23  ;;  %v2591_v37 = vadd.f32 %v2587_v1, %v2581_v5  ;;  %v2592_v4 = vadd.f32 %v2588_v44, %v2582_v7  ;;  %v2593_v47 = vadd.f32 %v2589_v17, %v2583_v22  ;;  %s6324_s22 = sld [smem:[#allocation5 + $0x58]] }
 0x2a4   : >> { %v2553_v48 = vmul.f32 %v2549_v15, %v2547_v60  ;;  %v2560_v6 = vmul.f32 %v2559_v9, %v2544_v36  ;;  %v2561_v45 = vmul.f32 %v2559_v9, %v2545_v49  ;;  %v2562_v12 = vmul.f32 %v2559_v9, %v2546_v27  ;;  %s6327_s0 = sld [smem:[#allocation3 + $0x5e]] }
 0x2a5   : >> { %v2596_v0 = vmul.f32 %v2595_v58, %v6530_v46  ;;  %v2597_v32 = vmul.f32 %v2595_v58, %v6531_v33  ;;  %v2598_v3 = vmul.f32 %v2595_v58, %v6532_v29  ;;  %v2599_v25 = vmul.f32 %v2595_v58, %v6533_v43  ;;  %s6336_s1 = sld [smem:[#allocation5 + $0x59]] }
 0x2a6   : >> { %v2554_v61 = vadd.f32 %v2550_v26, %v6198_v11  ;;  %v2555_v18 = vadd.f32 %v2551_v42, %v6200_v54  ;;  %v6262_v10 = vadd.f32 %v2552_v24, %v2490_v30  ;;  %v2563_v15 = vmul.f32 %v2559_v9, %v2547_v60 }
 0x2a7   : >> { %v2600_v23 = vadd.f32 %v2596_v0, %v2590_v13  ;;  %v2601_v5 = vadd.f32 %v2597_v32, %v2591_v37  ;;  %v2602_v7 = vadd.f32 %v2598_v3, %v2592_v4  ;;  %v2603_v22 = vadd.f32 %v2599_v25, %v2593_v47 }
 0x2a8   : >> { %v2557_v38 = vadd.f32 %v2553_v48, %v6206_v16  ;;  %v6268_v1 = vadd.f32 %v2560_v6, %v6208_v63  ;;  %v2645_v44 = vstv %s6236_s18  ;;  %v2651_v11 = vstv %s6247_s26  ;;  %s6347_s18 = sld [smem:[#allocation4 + $0x1e]] }
 0x2a9   : >> { %v2606_v17 = vadd.f32 %v2605_v14, %v2600_v23  ;;  %v2607_v54 = vadd.f32 %v2605_v14, %v2601_v5  ;;  %v2608_v30 = vadd.f32 %v2605_v14, %v2602_v7  ;;  %v2609_v58 = vadd.f32 %v2605_v14, %v2603_v22  ;;  %s6354_s26 = sld [smem:[#allocation3 + $0x1f]] }
 0x2aa   : >> { %v2565_v9 = vadd.f32 %v2561_v45, %v6210_v53  ;;  %v2566_v26 = vadd.f32 %v2562_v12, %v6218_v19  ;;  %v2570_v42 = vmul.f32 %v2569_v52, %v2544_v36  ;;  %v2571_v24 = vmul.f32 %v2569_v52, %v2545_v49 }
 0x2ab   : >> { %v2572_v16 = vmul.f32 %v2569_v52, %v2546_v27  ;;  %v2573_v13 = vmul.f32 %v2569_v52, %v2547_v60  ;;  %v2610_v63 = vmax.f32 %v2606_v17, 0.0  ;;  %v2611_v37 = vmax.f32 %v2607_v54, 0.0 }
 0x2ac   : >> { %v2646_v4 = vmul.f32 %v2645_v44, %v6522_v35  ;;  %v2647_v47 = vmul.f32 %v2645_v44, %v6523_v56  ;;  %v2648_v48 = vmul.f32 %v2645_v44, %v6524_v34  ;;  %v2652_v14 = vmul.f32 %v2651_v11, %v6525_v59 }
 0x2ad   : >> { %v2612_v53 = vmax.f32 %v2608_v30, 0.0  ;;  %v2613_v19 = vmax.f32 %v2609_v58, 0.0  ;;  %v2653_v36 = vmul.f32 %v2651_v11, %v6527_v62  ;;  %v2654_v49 = vmul.f32 %v2651_v11, %v6528_v31 }
 0x2ae   : >> { %v2567_v27 = vadd.f32 %v2563_v15, %v6221_v8  ;;  %v6290_v60 = vadd.f32 %v2570_v42, %v6224_v21  ;;  %v2649_v52 = vmul.f32 %v2645_v44, %v6526_v40  ;;  %v2655_v6 = vmul.f32 %v2651_v11, %v6529_v28 }
 0x2af   : >> { %v6295_v45 = vadd.f32 %v2571_v24, %v6239_v20  ;;  %v2616_v12 = vmul.f32 %v6254_v41, %v2610_v63  ;;  %v2617_v0 = vmul.f32 %v6254_v41, %v2611_v37  ;;  %v2625_v32 = vstv %s6264_s27  ;;  %s6356_s27 = sld [smem:[#allocation3 + $0x3f]] }
 0x2b0   : >> { %v2576_v3 = vadd.f32 %v2572_v16, %v6242_v2  ;;  %v2577_v8 = vadd.f32 %v2573_v13, %v6245_v50  ;;  %v2635_v25 = vstv %s6270_s19  ;;  %v2656_v21 = vadd.f32 %v2652_v14, %v2646_v4  ;;  %s6359_s19 = sld [smem:[#allocation5 + $0x5a]] }
 0x2b1   : >> { %v2618_v15 = vmul.f32 %v6254_v41, %v2612_v53  ;;  %v2619_v23 = vmul.f32 %v6254_v41, %v2613_v19  ;;  %v2657_v20 = vadd.f32 %v2653_v36, %v2647_v47  ;;  %v2658_v5 = vadd.f32 %v2654_v49, %v2648_v48 }
 0x2b2   : >> { %v2626_v7 = vmul.f32 %v2625_v32, %v2610_v63  ;;  %v2627_v22 = vmul.f32 %v2625_v32, %v2611_v37  ;;  %v2659_v44 = vadd.f32 %v2655_v6, %v2649_v52  ;;  %v2661_v11 = vstv %s6276_s28  ;;  %s6365_s28 = sld [smem:[#allocation5 + $0x5b]] }
 0x2b3   : >> { %v6308_v17 = vadd.f32 %v2616_v12, %v2554_v61  ;;  %v6310_v2 = vadd.f32 %v2617_v0, %v2555_v18  ;;  %v2628_v50 = vmul.f32 %v2625_v32, %v2612_v53  ;;  %v2629_v54 = vmul.f32 %v2625_v32, %v2613_v19 }
 0x2b4   : >> { %v2662_v30 = vmul.f32 %v2661_v11, %v6530_v46  ;;  %v2663_v58 = vmul.f32 %v2661_v11, %v6531_v33  ;;  %v2664_v41 = vmul.f32 %v2661_v11, %v6532_v29  ;;  %v2665_v42 = vmul.f32 %v2661_v11, %v6533_v43 }
 0x2b5   : >> { %v6319_v24 = vadd.f32 %v2618_v15, %v6262_v10  ;;  %v6321_v16 = vadd.f32 %v2619_v23, %v2557_v38  ;;  %v2671_v61 = vstv %s6282_s29  ;;  %v2711_v18 = vstv %s6286_s25  ;;  %s6367_s29 = sld [smem:[#allocation5 + $0x5c]] }
 0x2b6   : >> { %v2666_v13 = vadd.f32 %v2662_v30, %v2656_v21  ;;  %v2667_v4 = vadd.f32 %v2663_v58, %v2657_v20  ;;  %v2668_v47 = vadd.f32 %v2664_v41, %v2658_v5  ;;  %v2669_v48 = vadd.f32 %v2665_v42, %v2659_v44  ;;  %s6369_s25 = sld [smem:[#allocation3 + $0x5f]] }
 0x2b7   : >> { %v6330_v14 = vadd.f32 %v2626_v7, %v6268_v1  ;;  %v6332_v36 = vadd.f32 %v2627_v22, %v2565_v9  ;;  %v6334_v10 = vadd.f32 %v2628_v50, %v2566_v26  ;;  %v2636_v38 = vmul.f32 %v2635_v25, %v2610_v63 }
 0x2b8   : >> { %v2672_v49 = vadd.f32 %v2671_v61, %v2666_v13  ;;  %v2673_v52 = vadd.f32 %v2671_v61, %v2667_v4  ;;  %v2674_v6 = vadd.f32 %v2671_v61, %v2668_v47  ;;  %v2717_v12 = vstv %s6303_s21  ;;  %s6373_s21 = sld [smem:[#allocation4 + $0x1f]] }
 0x2b9   : >> { %v2637_v0 = vmul.f32 %v2635_v25, %v2611_v37  ;;  %v2638_v32 = vmul.f32 %v2635_v25, %v2612_v53  ;;  %v2639_v21 = vmul.f32 %v2635_v25, %v2613_v19  ;;  %v2712_v15 = vmul.f32 %v2711_v18, %v6522_v35 }
 0x2ba   : >> { %v2675_v23 = vadd.f32 %v2671_v61, %v2669_v48  ;;  %v2713_v1 = vmul.f32 %v2711_v18, %v6523_v56  ;;  %v2714_v9 = vmul.f32 %v2711_v18, %v6524_v34  ;;  %v2715_v26 = vmul.f32 %v2711_v18, %v6526_v40 }
 0x2bb   : >> { %v2718_v63 = vmul.f32 %v2717_v12, %v6525_v59  ;;  %v2719_v20 = vmul.f32 %v2717_v12, %v6527_v62  ;;  %v2720_v37 = vmul.f32 %v2717_v12, %v6528_v31  ;;  %v2721_v53 = vmul.f32 %v2717_v12, %v6529_v28 }
 0x2bc   : >> { %v2633_v19 = vadd.f32 %v2629_v54, %v2567_v27  ;;  %v2676_v25 = vmax.f32 %v2672_v49, 0.0  ;;  %v2677_v5 = vmax.f32 %v2673_v52, 0.0  ;;  %v2678_v7 = vmax.f32 %v2674_v6, 0.0 }
 0x2bd   : >> { %v2640_v22 = vadd.f32 %v2636_v38, %v6290_v60  ;;  %v2641_v44 = vadd.f32 %v2637_v0, %v6295_v45  ;;  %v2681_v11 = vstv %s6316_s16  ;;  %v2691_v50 = vstv %s6324_s22  ;;  %s6400_s16 = sld [smem:[#allocation5 + $0x5d]] }
 0x2be   : >> { %v2642_v30 = vadd.f32 %v2638_v32, %v2576_v3  ;;  %v2643_v58 = vadd.f32 %v2639_v21, %v2577_v8  ;;  %v2679_v41 = vmax.f32 %v2675_v23, 0.0  ;;  %v2727_v42 = vstv %s6327_s0  ;;  %s6406_s22 = sld [smem:[#allocation5 + $0x5e]] }
 0x2bf   : >> { %v2722_v61 = vadd.f32 %v2718_v63, %v2712_v15  ;;  %v2723_v27 = vadd.f32 %v2719_v20, %v2713_v1  ;;  %v2724_v54 = vadd.f32 %v2720_v37, %v2714_v9  ;;  %v2725_v18 = vadd.f32 %v2721_v53, %v2715_v26  ;;  %s6412_s0 = sld [smem:[#allocation5 + $0x5f]] }
 0x2c0   : >> { %v2682_v13 = vmul.f32 %v2681_v11, %v2676_v25  ;;  %v2683_v4 = vmul.f32 %v2681_v11, %v2677_v5  ;;  %v2684_v60 = vmul.f32 %v2681_v11, %v2678_v7  ;;  %v2701_v47 = vstv %s6336_s1  ;;  %s6426_s1 = scalar_lea.vmem %s271_s10, %s4205_s11 [#allocation12]  ;;  %s2942_s11 = scalar_lea.sflag (%p277_p3), [#allocation9], %s4181_s30 }
 0x2c1   : >> { %v2728_v45 = vmul.f32 %v2727_v42, %v6530_v46  ;;  %v2729_v3 = vmul.f32 %v2727_v42, %v6531_v33  ;;  %v2730_v8 = vmul.f32 %v2727_v42, %v6532_v29  ;;  %v2731_v48 = vmul.f32 %v2727_v42, %v6533_v43 }
 0x2c2   : >> { %v2685_v38 = vmul.f32 %v2681_v11, %v2679_v41  ;;  %v2692_v49 = vmul.f32 %v2691_v50, %v2676_v25  ;;  %v2693_v52 = vmul.f32 %v2691_v50, %v2677_v5  ;;  %v2694_v6 = vmul.f32 %v2691_v50, %v2678_v7 }
 0x2c3   : >> { %v2732_v12 = vadd.f32 %v2728_v45, %v2722_v61  ;;  %v2733_v0 = vadd.f32 %v2729_v3, %v2723_v27  ;;  %v2734_v32 = vadd.f32 %v2730_v8, %v2724_v54  ;;  %v2735_v21 = vadd.f32 %v2731_v48, %v2725_v18 }
 0x2c4   : >> { %v2695_v15 = vmul.f32 %v2691_v50, %v2679_v41  ;;  %v2702_v23 = vmul.f32 %v2701_v47, %v2676_v25  ;;  %v2703_v1 = vmul.f32 %v2701_v47, %v2677_v5  ;;  %v2737_v9 = vstv %s6347_s18 }
 0x2c5   : >> { %v2686_v26 = vadd.f32 %v2682_v13, %v6308_v17  ;;  %v2738_v63 = vadd.f32 %v2737_v9, %v2732_v12  ;;  %v2739_v20 = vadd.f32 %v2737_v9, %v2733_v0  ;;  %v2740_v37 = vadd.f32 %v2737_v9, %v2734_v32 }
 0x2c6   : >> { %v2687_v53 = vadd.f32 %v2683_v4, %v6310_v2  ;;  %v2688_v11 = vadd.f32 %v2684_v60, %v6319_v24  ;;  %v2704_v42 = vmul.f32 %v2701_v47, %v2678_v7  ;;  %v2705_v61 = vmul.f32 %v2701_v47, %v2679_v41 }
 0x2c7   : >> { %v2689_v25 = vadd.f32 %v2685_v38, %v6321_v16  ;;  %v2696_v5 = vadd.f32 %v2692_v49, %v6330_v14  ;;  %v2697_v17 = vadd.f32 %v2693_v52, %v6332_v36  ;;  %v2741_v50 = vadd.f32 %v2737_v9, %v2735_v21 }
 0x2c8   : >> { %v2698_v27 = vadd.f32 %v2694_v6, %v6334_v10  ;;  %v2699_v54 = vadd.f32 %v2695_v15, %v2633_v19  ;;  %v6381_v2 = vadd.f32 %v2702_v23, %v2640_v22  ;;  %v6383_v24 = vadd.f32 %v2703_v1, %v2641_v44 }
 0x2c9   : >> { %v2742_v7 = vmax.f32 %v2738_v63, 0.0  ;;  %v2743_v41 = vmax.f32 %v2739_v20, 0.0  ;;  %v2744_v18 = vmax.f32 %v2740_v37, 0.0  ;;  %v2777_v13 = vstv %s6354_s26 }
 0x2ca   : >> { %v6386_v16 = vadd.f32 %v2704_v42, %v2642_v30  ;;  %v6388_v14 = vadd.f32 %v2705_v61, %v2643_v58  ;;  %v2747_v36 = vstv %s6359_s19  ;;  %v2757_v4 = vstv %s6365_s28 }
 0x2cb   : >> { %v2745_v60 = vmax.f32 %v2741_v50, 0.0  ;;  %v2767_v47 = vstv %s6367_s29  ;;  %v2783_v45 = vstv %s6356_s27  ;;  %v2793_v10 = vstv %s6369_s25 }
 0x2cc   : >> { %v2778_v19 = vmul.f32 %v2777_v13, %v6522_v35  ;;  %v2779_v22 = vmul.f32 %v2777_v13, %v6523_v56  ;;  %v2780_v44 = vmul.f32 %v2777_v13, %v6524_v34  ;;  %v2781_v3 = vmul.f32 %v2777_v13, %v6526_v40 }
 0x2cd   : >> { %v2748_v8 = vmul.f32 %v2747_v36, %v2742_v7  ;;  %v2749_v48 = vmul.f32 %v2747_v36, %v2743_v41  ;;  %v2750_v30 = vmul.f32 %v2747_v36, %v2744_v18  ;;  %v2803_v38 = vstv %s6373_s21 }
 0x2ce   : >> { %v2784_v58 = vmul.f32 %v2783_v45, %v6525_v59  ;;  %v2785_v49 = vmul.f32 %v2783_v45, %v6527_v62  ;;  %v2786_v52 = vmul.f32 %v2783_v45, %v6528_v31  ;;  %v2787_v35 = vmul.f32 %v2783_v45, %v6529_v28 }
 0x2cf   : >> { %v2751_v56 = vmul.f32 %v2747_v36, %v2745_v60  ;;  %v2758_v34 = vmul.f32 %v2757_v4, %v2742_v7  ;;  %v2759_v6 = vmul.f32 %v2757_v4, %v2743_v41  ;;  %v2760_v40 = vmul.f32 %v2757_v4, %v2744_v18 }
 0x2d0   : >> { %v2788_v12 = vadd.f32 %v2784_v58, %v2778_v19  ;;  %v2789_v0 = vadd.f32 %v2785_v49, %v2779_v22  ;;  %v2790_v32 = vadd.f32 %v2786_v52, %v2780_v44  ;;  %v2791_v21 = vadd.f32 %v2787_v35, %v2781_v3 }
 0x2d1   : >> { %v2794_v15 = vmul.f32 %v2793_v10, %v6530_v46  ;;  %v2795_v59 = vmul.f32 %v2793_v10, %v6531_v33  ;;  %v2796_v62 = vmul.f32 %v2793_v10, %v6532_v29  ;;  %v2797_v31 = vmul.f32 %v2793_v10, %v6533_v43 }
 0x2d2   : >> { %v2752_v23 = vadd.f32 %v2748_v8, %v2686_v26  ;;  %v2753_v28 = vadd.f32 %v2749_v48, %v2687_v53  ;;  %v2754_v1 = vadd.f32 %v2750_v30, %v2688_v11  ;;  %v2761_v9 = vmul.f32 %v2757_v4, %v2745_v60 }
 0x2d3   : >> { %v2798_v63 = vadd.f32 %v2794_v15, %v2788_v12  ;;  %v2799_v20 = vadd.f32 %v2795_v59, %v2789_v0  ;;  %v2800_v37 = vadd.f32 %v2796_v62, %v2790_v32  ;;  %v2801_v42 = vadd.f32 %v2797_v31, %v2791_v21 }
 0x2d4   : >> { %v2755_v61 = vadd.f32 %v2751_v56, %v2689_v25  ;;  %v2762_v46 = vadd.f32 %v2758_v34, %v2696_v5  ;;  %v2763_v50 = vadd.f32 %v2759_v6, %v2697_v17  ;;  %v2768_v33 = vmul.f32 %v2767_v47, %v2742_v7 }
 0x2d5   : >> { %v2804_v13 = vadd.f32 %v2803_v38, %v2798_v63  ;;  %v2805_v29 = vadd.f32 %v2803_v38, %v2799_v20  ;;  %v2806_v36 = vadd.f32 %v2803_v38, %v2800_v37  ;;  %v2807_v43 = vadd.f32 %v2803_v38, %v2801_v42 }
 0x2d6   : >> { %v2764_v26 = vadd.f32 %v2760_v40, %v2698_v27  ;;  %v2765_v53 = vadd.f32 %v2761_v9, %v2699_v54  ;;  %v2813_v11 = vstv %s6400_s16  ;;  %v2823_v4 = vstv %s6406_s22 }
 0x2d7   : >> { %v2808_v45 = vmax.f32 %v2804_v13, 0.0  ;;  %v2809_v10 = vmax.f32 %v2805_v29, 0.0  ;;  %v2810_v19 = vmax.f32 %v2806_v36, 0.0  ;;  %v2811_v22 = vmax.f32 %v2807_v43, 0.0 }
 0x2d8   : >> { %v2769_v44 = vmul.f32 %v2767_v47, %v2743_v41  ;;  %v2770_v3 = vmul.f32 %v2767_v47, %v2744_v18  ;;  %v2771_v8 = vmul.f32 %v2767_v47, %v2745_v60  ;;  %v2772_v25 = vadd.f32 %v2768_v33, %v6381_v2 }
 0x2d9   : >> { %v2814_v5 = vmul.f32 %v2813_v11, %v2808_v45  ;;  %v2815_v17 = vmul.f32 %v2813_v11, %v2809_v10  ;;  %v2816_v7 = vmul.f32 %v2813_v11, %v2810_v19  ;;  %v2817_v48 = vmul.f32 %v2813_v11, %v2811_v22 }
 0x2da   : >> { %v2824_v30 = vmul.f32 %v2823_v4, %v2808_v45  ;;  %v2825_v38 = vmul.f32 %v2823_v4, %v2809_v10  ;;  %v2826_v27 = vmul.f32 %v2823_v4, %v2810_v19  ;;  %v2833_v54 = vstv %s6412_s0 }
 0x2db   : >> { %v2818_v58 = vadd.f32 %v2814_v5, %v2752_v23  ;;  %v2819_v49 = vadd.f32 %v2815_v17, %v2753_v28  ;;  %v2820_v52 = vadd.f32 %v2816_v7, %v2754_v1  ;;  %v2827_v35 = vmul.f32 %v2823_v4, %v2811_v22 }
 0x2dc   : >> { %v2773_v56 = vadd.f32 %v2769_v44, %v6383_v24  ;;  %v2774_v41 = vadd.f32 %v2770_v3, %v6386_v16  ;;  %v2821_v18 = vadd.f32 %v2817_v48, %v2755_v61  ;;  %v2828_v60 = vadd.f32 %v2824_v30, %v2762_v46 }
 0x2dd   : >> { %v2829_v47 = vadd.f32 %v2825_v38, %v2763_v50  ;;  %v2830_v2 = vadd.f32 %v2826_v27, %v2764_v26  ;;  %v2834_v34 = vmul.f32 %v2833_v54, %v2808_v45  ;;  %v2835_v6 = vmul.f32 %v2833_v54, %v2809_v10 }
 0x2de   : >> { %v2836_v40 = vmul.f32 %v2833_v54, %v2810_v19  ;;  %v3428_v12 = vmul.f32 -1.442695, %v2818_v58  ;;  %v3429_v0 = vmul.f32 -1.442695, %v2819_v49  ;;  %v3430_v32 = vmul.f32 -1.442695, %v2820_v52 }
 0x2df   : >> { %v2775_v21 = vadd.f32 %v2771_v8, %v6388_v14  ;;  %v2831_v15 = vadd.f32 %v2827_v35, %v2765_v53  ;;  %v2837_v59 = vmul.f32 %v2833_v54, %v2811_v22  ;;  %v2838_v62 = vadd.f32 %v2834_v34, %v2772_v25 }
 0x2e0   : >> { %3722 = vpow2.f32 %v3428_v12  ;;  %v3431_v31 = vmul.f32 -1.442695, %v2821_v18  ;;  %v3432_v24 = vmul.f32 -1.442695, %v2828_v60  ;;  %v2839_v23 = vadd.f32 %v2835_v6, %v2773_v56 }
 0x2e1   : >> { %3724 = vpow2.f32 %v3429_v0  ;;  %v3433_v16 = vmul.f32 -1.442695, %v2829_v47  ;;  %v2840_v28 = vadd.f32 %v2836_v40, %v2774_v41  ;;  %v3434_v1 = vmul.f32 -1.442695, %v2830_v2 }
 0x2e2   : >> { %3726 = vpow2.f32 %v3430_v32  ;;  %v2841_v9 = vadd.f32 %v2837_v59, %v2775_v21  ;;  %v3435_v63 = vmul.f32 -1.442695, %v2831_v15  ;;  %v3441_v20 = vmul.f32 -1.442695, %v2838_v62 }
 0x2e3   : >> { %3728 = vpow2.f32 %v3431_v31  ;;  %v3442_v37 = vmul.f32 -1.442695, %v2839_v23  ;;  %v3443_v14 = vmul.f32 -1.442695, %v2840_v28  ;;  %vm720_vm0 = vcmp.lt.f32.partialorder %v6519_v51, 10.0 }
 0x2e4   : >> { %3730 = vpow2.f32 %v3432_v24  ;;  %v3444_v42 = vmul.f32 -1.442695, %v2841_v9  ;;  %vm721_vm1 = vcmp.lt.f32.partialorder %v6520_v39, 10.0  ;;  %vm722_vm2 = vcmp.lt.f32.partialorder %v6521_v57, 10.0 }
 0x2e5   : >> { %3732 = vpow2.f32 %v3433_v16  ;;  %vm723_vm3 = vcmp.lt.f32.partialorder %v4623_v55, 10.0 }
 0x2e6   : >> { %3734 = vpow2.f32 %v3434_v1 }
 0x2e7   : >> { %3736 = vpow2.f32 %v3435_v63 }
 0x2e8   : >> { %3738 = vpow2.f32 %v3441_v20 }
 0x2e9   : >> { %3740 = vpow2.f32 %v3442_v37 }
 0x2ea   : >> { %3742 = vpow2.f32 %v3443_v14 }
 0x2eb   : >> { %3744 = vpow2.f32 %v3444_v42 }
 0x2ed   : >> { %v3723_v61 = vpop.eup %3722 }
 0x2ee   : >> { %v3725_v46 = vpop.eup %3724  ;;  %v2854_v50 = vadd.f32 1.0, %v3723_v61 }
 0x2ef   : >> { %v3727_v33 = vpop.eup %3726  ;;  %v2855_v13 = vadd.f32 1.0, %v3725_v46 }
 0x2f0   : >> { %v3729_v29 = vpop.eup %3728  ;;  %v2856_v36 = vadd.f32 1.0, %v3727_v33  ;;  %3746 = vrcp.f32 %v2854_v50 }
 0x2f1   : >> { %v3731_v43 = vpop.eup %3730  ;;  %v2857_v26 = vadd.f32 1.0, %v3729_v29  ;;  %3748 = vrcp.f32 %v2855_v13 }
 0x2f2   : >> { %v3733_v53 = vpop.eup %3732  ;;  %3750 = vrcp.f32 %v2856_v36  ;;  %v2887_v11 = vadd.f32 1.0, %v3731_v43 }
 0x2f3   : >> { %v3735_v4 = vpop.eup %3734  ;;  %3752 = vrcp.f32 %v2857_v26  ;;  %v2888_v45 = vadd.f32 1.0, %v3733_v53 }
 0x2f4   : >> { %v3737_v10 = vpop.eup %3736  ;;  %v2889_v19 = vadd.f32 1.0, %v3735_v4  ;;  %3754 = vrcp.f32 %v2887_v11 }
 0x2f5   : >> { %v3739_v22 = vpop.eup %3738  ;;  %v2890_v44 = vadd.f32 1.0, %v3737_v10  ;;  %3756 = vrcp.f32 %v2888_v45 }
 0x2f6   : >> { %v3741_v3 = vpop.eup %3740  ;;  %3758 = vrcp.f32 %v2889_v19  ;;  %v2920_v8 = vadd.f32 1.0, %v3739_v22 }
 0x2f7   : >> { %v3743_v25 = vpop.eup %3742  ;;  %3760 = vrcp.f32 %v2890_v44  ;;  %v2921_v5 = vadd.f32 1.0, %v3741_v3 }
 0x2f8   : >> { %v3745_v17 = vpop.eup %3744  ;;  %v2922_v7 = vadd.f32 1.0, %v3743_v25  ;;  %3762 = vrcp.f32 %v2920_v8 }
 0x2f9   : >> { %v2923_v48 = vadd.f32 1.0, %v3745_v17  ;;  %3764 = vrcp.f32 %v2921_v5 }
 0x2fa   : >> { %3766 = vrcp.f32 %v2922_v7 }
 0x2fb   : >> { %3768 = vrcp.f32 %v2923_v48 }
 0x2fd   : >> { %v3747_v30 = vpop.eup %3746 }
 0x2fe   : >> { %v3749_v38 = vpop.eup %3748  ;;  %v2866_v27 = vsel %vm720_vm0, %v3747_v30, 0.0 }
 0x2ff   : >> { %v3751_v54 = vpop.eup %3750  ;;  %v2867_v58 = vsel %vm721_vm1, %v3749_v38, 0.0  ;;  %2871 = vst [vmem:[%s6426_s1] sm:$0xff] %v2866_v27 }
 0x300   : >> { %v3753_v49 = vpop.eup %3752  ;;  %v2868_v52 = vsel %vm722_vm2, %v3751_v54, 0.0  ;;  %2872 = vst [vmem:[%s6426_s1 + $0x8] sm:$0xff] %v2867_v58 }
 0x301   : >> { %v3755_v35 = vpop.eup %3754  ;;  %v2869_v56 = vsel %vm723_vm3, %v3753_v49, 0.0  ;;  %2873 = vst [vmem:[%s6426_s1 + $0x10] sm:$0xff] %v2868_v52 }
 0x302   : >> { %v3757_v41 = vpop.eup %3756  ;;  %2874 = vst [vmem:[%s6426_s1 + $0x18] sm:$0xff] %v2869_v56  ;;  %v2899_v18 = vsel %vm720_vm0, %v3755_v35, 0.0 }
 0x303   : >> { %v3759_v60 = vpop.eup %3758  ;;  %v2900_v47 = vsel %vm721_vm1, %v3757_v41, 0.0  ;;  %3437 = vst [vmem:[%s6426_s1 + $0x80] sm:$0xff] %v2899_v18 }
 0x304   : >> { %v3761_v2 = vpop.eup %3760  ;;  %v2901_v34 = vsel %vm722_vm2, %v3759_v60, 0.0  ;;  %3438 = vst [vmem:[%s6426_s1 + $0x88] sm:$0xff] %v2900_v47 }
 0x305   : >> { %v3763_v6 = vpop.eup %3762  ;;  %v2902_v40 = vsel %vm723_vm3, %v3761_v2, 0.0  ;;  %3439 = vst [vmem:[%s6426_s1 + $0x90] sm:$0xff] %v2901_v34 }
 0x306   : >> { %v3765_v12 = vpop.eup %3764  ;;  %3440 = vst [vmem:[%s6426_s1 + $0x98] sm:$0xff] %v2902_v40  ;;  %v2932_v0 = vsel %vm720_vm0, %v3763_v6, 0.0  ;;  %279 = sbr.rel (!%p277_p3) target bundleno = 97 (0x61), region = 135 }
 0x307   : >> { %v3767_v32 = vpop.eup %3766  ;;  %v2933_v21 = vsel %vm721_vm1, %v3765_v12, 0.0  ;;  %3446 = vst [vmem:[%s6426_s1 + $0x100] sm:$0xff] %v2932_v0 }
 0x308   : >> { %v3769_v15 = vpop.eup %3768  ;;  %v2934_v59 = vsel %vm722_vm2, %v3767_v32, 0.0  ;;  %3447 = vst [vmem:[%s6426_s1 + $0x108] sm:$0xff] %v2933_v21 }
 0x309   : >> { %v2935_v62 = vsel %vm723_vm3, %v3769_v15, 0.0  ;;  %3448 = vst [vmem:[%s6426_s1 + $0x110] sm:$0xff] %v2934_v59 }
 0x30a   : >> { %3449 = vst [vmem:[%s6426_s1 + $0x118] sm:$0xff] %v2935_v62 }
 0x30b   : > { %s3456_s18 = sshll.u32 %s4095_s15, 11  ;;  %s2965_s26 = sshll.u32 %s271_s10, 4  ;;  %s2966_s26 = int_to_ptr.vmem [resolvable:$true] %s2965_s26 }
 0x30c   : > { %s2954_s28 = scalar_lea.hbm %s6511_s6, %s3456_s18  ;;  %s4020_s8 = smov 2048  }
 0x30d   : > { %3478 = sst [smem:[#allocation18]] (%p4122_p10), %s4020_s8  ;;  %s4021_s30 = smov 4096  }
 0x30e   : > { %3479 = sst [smem:[#allocation18 + $0x1]] (%p4122_p10), %s4021_s30  ;;  %s4022_s2 = smov 16  }
 0x30f   : > { %3480 = sst [smem:[#allocation18 + $0x2]] (%p4122_p10), %s4022_s2  ;;  %s4023_s9 = smov 128  }
 0x310   : > { %3481 = sst [smem:[#allocation18 + $0x3]] (%p4122_p10), %s4023_s9  ;;  %s4024_s15 = smov 8  }
 0x311   : > { %3482 = sst [smem:[#allocation18 + $0x4]] (%p4122_p10), %s4023_s9  ;;  %s4025_s7 = smov 131072  }
 0x312   : > { %3483 = sst [smem:[#allocation18 + $0x5]] (%p4122_p10), %s4024_s15  ;;  %s4026_s10 = smov 0  }
 0x313   : > { %3484 = dma.general (%p4122_p10), %s2966_s26, 6144, %s2954_s28, %s2942_s11, %s4025_s7, [#allocation18], %s4026_s10, 0  }
 0x314 PF: > { %s2993_s29 = sand.u32 1, %s3918_s3   ;;  %p3487_p4 = pnand %p3158_p12, %p4126_p11 }
 0x315   : > { %s2994_s25 = scalar_lea.sflag [#allocation9], %s2993_s29 }
 0x316   : > { %p3488_p5 = pneg %p3487_p4 }
 0x318   : > { %3913 = dma.done.wait (%p3488_p5), %s2994_s25, 6144  }
 0x319   : > { %3915 = vsyncadd (%p3488_p5), %s2994_s25, 4294961152  ;;  %p38_p6 = scmp.ge.s32.totalorder %s4099_s17, 4   ;;  %s6551_s3 = smov %s3922_s12 }
 0x31a   : > { %s6552_s12 = smov %s3926_s13  ;;  %s6553_s13 = smov %s4111_s20 }
 0x31b   : > { %s6554_s14 = smov %s4099_s17  ;;  %40 = sbr.rel (!%p38_p6) target bundleno = 43 (0x2b), region = 146 }
 0x320   :  { %2999 = vsyncpa [#allocation8], 1 }
 0x321   :  { %3001 = vsyncpa [#allocation8 + $0x1], 1 }
 0x322   :  { %3002 = vsyncpa [#allocation11], 1 }
 0x323   :  { %3004 = vsyncpa [#allocation11 + $0x1], 1 }
 0x324   :  { %3005 = vsyncpa [#allocation9], 1 }
 0x325   :  { %3007 = vsyncpa [#allocation9 + $0x1], 1 }

</bundles_post_ra>
